<compile_context>
chip_gen: v7x
topology: tpu7x:2x2x1
jax: 0.10.0
libtpu: 0.0.40
codegen_flags: <defaults>
</compile_context>

<pallas_src>
import jax
import jax.numpy as jnp
import numpy as np
from jax.experimental import pallas as pl
from jax.experimental.pallas import tpu as pltpu

N_A = 2
IN_DIM = N_A * 2      # 4
H1 = 64
H2 = 32
OUT_DIM = 2

# Rows per grid step.  With batch on sublanes the narrow feature dims are
# lane-padded in VMEM (~3-4 KB of VMEM per batch row per step, counting the
# double-buffered x/out blocks plus the h1/h2 temporaries), so 4096 rows is
# ~14-16 MiB -- comfortably inside the 32 MiB scoped-VMEM limit requested below
# on every generation (v5e's default is only 16 MiB, hence the explicit limit).
MAX_TILE_B = 4096

# For batches at least this large, force an even number of grid steps so
# dimension_semantics=("parallel",) can shard the batch across both v7x
# TensorCores (no effect on v5e/v6e, which have one TC).  Below this, per-step
# work would not cover the ~0.35 us per-step overhead, so one step is better.
MEGACORE_MIN_BATCH = 4096


def _cdiv(a, b):
    return (a + b - 1) // b


def _round_up(x, m):
    return ((x + m - 1) // m) * m


def mlp_kernel(x_ref, w1_ref, b1_ref, w2_ref, b2_ref, w3_ref, b3_ref, o_ref):
    # x_ref: [tile_b, 4] f32   w*_ref: [in, out] f32   b*_ref: [1, out] f32
    # o_ref: [tile_b, 2] f32
    x = x_ref[...]
    h1 = jnp.dot(x, w1_ref[...], preferred_element_type=jnp.float32) + b1_ref[...]
    h1 = jnp.maximum(h1, 0.0)
    h2 = jnp.dot(h1, w2_ref[...], preferred_element_type=jnp.float32) + b2_ref[...]
    h2 = jnp.maximum(h2, 0.0)
    o_ref[...] = jnp.dot(h2, w3_ref[...], preferred_element_type=jnp.float32) + b3_ref[...]


@jax.jit
def my_network_forward(x, w1, b1, w2, b2, w3, b3):
    """x: [B, 4] f32. Weights in torch layout w=[out, in], b=[out]. Returns [B, 2] f32."""
    B = x.shape[0]

    # Balanced tiles, multiple-of-8 rows => padding waste <= 7 rows + balancing,
    # instead of padding B up to a multiple of a fixed tile (up to ~50% waste).
    b8 = _round_up(B, 8)
    num_tiles = _cdiv(b8, MAX_TILE_B)
    if b8 >= MEGACORE_MIN_BATCH and num_tiles % 2 == 1:
        num_tiles += 1                                   # even #steps -> both v7x TCs
    tile_b = _round_up(_cdiv(B, num_tiles), 8)
    padded_b = tile_b * num_tiles

    xp = x if padded_b == B else jnp.pad(x, ((0, padded_b - B), (0, 0)))

    # Torch layout -> [in, out] so the kernel is a plain x @ W.  These are tiny
    # one-time parameter ops (~10 KB total), not batch-sized passes.
    w1t, w2t, w3t = w1.T, w2.T, w3.T
    b1r = b1.reshape(1, H1)
    b2r = b2.reshape(1, H2)
    b3r = b3.reshape(1, OUT_DIM)

    # Constant index_map => parameters are DMA'd once and stay VMEM-resident
    # across the whole batch grid; only the x / out tiles pay HBM bandwidth.
    def resident(shape):
        return pl.BlockSpec(shape, lambda i: (0, 0))

    out = pl.pallas_call(
        mlp_kernel,
        out_shape=jax.ShapeDtypeStruct((padded_b, OUT_DIM), jnp.float32),
        grid=(num_tiles,),
        in_specs=[
            pl.BlockSpec((tile_b, IN_DIM), lambda i: (i, 0)),    # streamed x tiles
            resident(w1t.shape), resident(b1r.shape),
            resident(w2t.shape), resident(b2r.shape),
            resident(w3t.shape), resident(b3r.shape),
        ],
        out_specs=pl.BlockSpec((tile_b, OUT_DIM), lambda i: (i, 0)),
        compiler_params=pltpu.CompilerParams(
            dimension_semantics=("parallel",),
            vmem_limit_bytes=32 * 1024 * 1024,
        ),
    )(xp, w1t, b1r, w2t, b2r, w3t, b3r)

    return out if padded_b == B else out[:B]


def init_linear_params(key, in_f, out_f):
    # Deterministic init mimicking torch.nn.Linear default (uniform +/- 1/sqrt(in_f)).
    kw, kb = jax.random.split(key)
    bound = 1.0 / np.sqrt(in_f)
    w = jax.random.uniform(kw, (out_f, in_f), jnp.float32, -bound, bound)   # [out, in]
    b = jax.random.uniform(kb, (out_f,), jnp.float32, -bound, bound)        # [out]
    return w, b


def reference_forward_np(x, w1, b1, w2, b2, w3, b3):
    # Pure-f32 host reference matching the PyTorch module's math.
    x, w1, b1, w2, b2, w3, b3 = (
        np.asarray(a, np.float32) for a in (x, w1, b1, w2, b2, w3, b3))
    h1 = np.maximum(x @ w1.T + b1, 0.0)
    h2 = np.maximum(h1 @ w2.T + b2, 0.0)
    return h2 @ w3.T + b3


def build_inputs(key, batch):
    # Same construction as the script: two continuous WM targets in [0, n_a),
    # each mapped to (cos, sin), concatenated -> [batch, 4].
    k1, k2 = jax.random.split(key)
    x_1 = jax.random.uniform(k1, (batch,), jnp.float32, 0.0, float(N_A))
    x_2 = jax.random.uniform(k2, (batch,), jnp.float32, 0.0, float(N_A))
    x1s = jnp.stack([jnp.cos(x_1 * 2 * np.pi / N_A), jnp.sin(x_1 * 2 * np.pi / N_A)], axis=1)
    x2s = jnp.stack([jnp.cos(x_2 * 2 * np.pi / N_A), jnp.sin(x_2 * 2 * np.pi / N_A)], axis=1)
    return jnp.concatenate((x1s, x2s), axis=1)   # [batch, 4]


if __name__ == "__main__":
    key = jax.random.PRNGKey(0)
    k_in, k_in2, k1, k2, k3 = jax.random.split(key, 5)

    w1, b1 = init_linear_params(k1, IN_DIM, H1)
    w2, b2 = init_linear_params(k2, H1, H2)
    w3, b3 = init_linear_params(k3, H2, OUT_DIM)

    # Main check: the module's own test batch size (1000) -> single tile,
    # no pad / no slice, grid=(1,).
    x = build_inputs(k_in, 1000)
    out = jax.block_until_ready(my_network_forward(x, w1, b1, w2, b2, w3, b3))
    ref = reference_forward_np(x, w1, b1, w2, b2, w3, b3)
    np.testing.assert_allclose(np.asarray(out), ref, rtol=1e-2, atol=1e-2)

    # Second check: larger, non-tile-aligned batch -> multi-step grid (even step
    # count for the v7x megacore path), tiny pad + slice, VMEM-resident weights.
    x_big = build_inputs(k_in2, 8200)
    out_big = jax.block_until_ready(my_network_forward(x_big, w1, b1, w2, b2, w3, b3))
    ref_big = reference_forward_np(x_big, w1, b1, w2, b2, w3, b3)
    np.testing.assert_allclose(np.asarray(out_big), ref_big, rtol=1e-2, atol=1e-2)

    print("KERNEL_OK")
</pallas_src>

<mosaic_0001>
module attributes {stable_mosaic.version = 11 : i64} {
  func.func @mlp_kernel(%arg0: i32, %arg1: memref<1000x4xf32, #tpu.memory_space<vmem>>, %arg2: memref<4x64xf32, #tpu.memory_space<vmem>>, %arg3: memref<1x64xf32, #tpu.memory_space<vmem>>, %arg4: memref<64x32xf32, #tpu.memory_space<vmem>>, %arg5: memref<1x32xf32, #tpu.memory_space<vmem>>, %arg6: memref<32x2xf32, #tpu.memory_space<vmem>>, %arg7: memref<1x2xf32, #tpu.memory_space<vmem>>, %arg8: memref<1000x2xf32, #tpu.memory_space<vmem>>) attributes {dimension_semantics = [#tpu.dimension_semantics<parallel>], iteration_bounds = array<i64: 1>, scalar_prefetch = 0 : i64, scratch_operands = 0 : i64, tpu.core_type = #tpu.core_type<tc>, window_params = [{transform_indices = @transform_0, window_bounds = array<i64: 1000, 4>}, {pipeline_mode = #tpu.pipeline_mode<synchronous>, transform_indices = @transform_1, window_bounds = array<i64: 4, 64>}, {pipeline_mode = #tpu.pipeline_mode<synchronous>, transform_indices = @transform_2, window_bounds = array<i64: 1, 64>}, {pipeline_mode = #tpu.pipeline_mode<synchronous>, transform_indices = @transform_3, window_bounds = array<i64: 64, 32>}, {pipeline_mode = #tpu.pipeline_mode<synchronous>, transform_indices = @transform_4, window_bounds = array<i64: 1, 32>}, {pipeline_mode = #tpu.pipeline_mode<synchronous>, transform_indices = @transform_5, window_bounds = array<i64: 32, 2>}, {pipeline_mode = #tpu.pipeline_mode<synchronous>, transform_indices = @transform_6, window_bounds = array<i64: 1, 2>}, {transform_indices = @transform_7, window_bounds = array<i64: 1000, 2>}]} {
    %c0 = arith.constant 0 : index
    %c0_0 = arith.constant 0 : index
    %0 = vector.load %arg1[%c0, %c0_0] : memref<1000x4xf32, #tpu.memory_space<vmem>>, vector<1000x4xf32>
    %c0_1 = arith.constant 0 : index
    %c0_2 = arith.constant 0 : index
    %1 = vector.load %arg2[%c0_1, %c0_2] : memref<4x64xf32, #tpu.memory_space<vmem>>, vector<4x64xf32>
    %cst = arith.constant dense<0.000000e+00> : vector<1000x64xf32>
    %2 = tpu.matmul %0, %1, %cst {dimension_numbers = #tpu.dot_dimension_numbers<[1], [0], [0], [1], [0, 0, 1, 1], [], []>} : vector<1000x4xf32>, vector<4x64xf32>, vector<1000x64xf32> -> vector<1000x64xf32>
    %c0_3 = arith.constant 0 : index
    %c0_4 = arith.constant 0 : index
    %3 = vector.load %arg3[%c0_3, %c0_4] : memref<1x64xf32, #tpu.memory_space<vmem>>, vector<1x64xf32>
    %4 = vector.broadcast %3 : vector<1x64xf32> to vector<1000x64xf32>
    %5 = arith.addf %2, %4 : vector<1000x64xf32>
    %cst_5 = arith.constant 0.000000e+00 : f32
    %6 = vector.broadcast %cst_5 : f32 to vector<1000x64xf32>
    %7 = arith.maximumf %5, %6 : vector<1000x64xf32>
    %c0_6 = arith.constant 0 : index
    %c0_7 = arith.constant 0 : index
    %8 = vector.load %arg4[%c0_6, %c0_7] : memref<64x32xf32, #tpu.memory_space<vmem>>, vector<64x32xf32>
    %cst_8 = arith.constant dense<0.000000e+00> : vector<1000x32xf32>
    %9 = tpu.matmul %7, %8, %cst_8 {dimension_numbers = #tpu.dot_dimension_numbers<[1], [0], [0], [1], [0, 0, 1, 1], [], []>} : vector<1000x64xf32>, vector<64x32xf32>, vector<1000x32xf32> -> vector<1000x32xf32>
    %c0_9 = arith.constant 0 : index
    %c0_10 = arith.constant 0 : index
    %10 = vector.load %arg5[%c0_9, %c0_10] : memref<1x32xf32, #tpu.memory_space<vmem>>, vector<1x32xf32>
    %11 = vector.broadcast %10 : vector<1x32xf32> to vector<1000x32xf32>
    %12 = arith.addf %9, %11 : vector<1000x32xf32>
    %cst_11 = arith.constant 0.000000e+00 : f32
    %13 = vector.broadcast %cst_11 : f32 to vector<1000x32xf32>
    %14 = arith.maximumf %12, %13 : vector<1000x32xf32>
    %c0_12 = arith.constant 0 : index
    %c0_13 = arith.constant 0 : index
    %15 = vector.load %arg6[%c0_12, %c0_13] : memref<32x2xf32, #tpu.memory_space<vmem>>, vector<32x2xf32>
    %cst_14 = arith.constant dense<0.000000e+00> : vector<1000x2xf32>
    %16 = tpu.matmul %14, %15, %cst_14 {dimension_numbers = #tpu.dot_dimension_numbers<[1], [0], [0], [1], [0, 0, 1, 1], [], []>} : vector<1000x32xf32>, vector<32x2xf32>, vector<1000x2xf32> -> vector<1000x2xf32>
    %c0_15 = arith.constant 0 : index
    %c0_16 = arith.constant 0 : index
    %17 = vector.load %arg7[%c0_15, %c0_16] : memref<1x2xf32, #tpu.memory_space<vmem>>, vector<1x2xf32>
    %18 = vector.broadcast %17 : vector<1x2xf32> to vector<1000x2xf32>
    %19 = arith.addf %16, %18 : vector<1000x2xf32>
    %c0_17 = arith.constant 0 : index
    %c0_18 = arith.constant 0 : index
    %20 = vector.load %arg8[%c0_17, %c0_18] : memref<1000x2xf32, #tpu.memory_space<vmem>>, vector<1000x2xf32>
    tpu.vector_store %arg8[%c0_17, %c0_18], %19 {strides = array<i32>} : memref<1000x2xf32, #tpu.memory_space<vmem>>, vector<1000x2xf32>,
    return
  }
  func.func @transform_0(%arg0: i32) -> (i32, i32) {
    %c0_i32 = arith.constant 0 : i32
    %c0_i32_0 = arith.constant 0 : i32
    return %arg0, %c0_i32 : i32, i32
  }
  func.func @transform_1(%arg0: i32) -> (i32, i32) {
    %c0_i32 = arith.constant 0 : i32
    %c0_i32_0 = arith.constant 0 : i32
    %c0_i32_1 = arith.constant 0 : i32
    return %c0_i32, %c0_i32_0 : i32, i32
  }
  func.func @transform_2(%arg0: i32) -> (i32, i32) {
    %c0_i32 = arith.constant 0 : i32
    %c0_i32_0 = arith.constant 0 : i32
    %c0_i32_1 = arith.constant 0 : i32
    return %c0_i32, %c0_i32_0 : i32, i32
  }
  func.func @transform_3(%arg0: i32) -> (i32, i32) {
    %c0_i32 = arith.constant 0 : i32
    %c0_i32_0 = arith.constant 0 : i32
    %c0_i32_1 = arith.constant 0 : i32
    return %c0_i32, %c0_i32_0 : i32, i32
  }
  func.func @transform_4(%arg0: i32) -> (i32, i32) {
    %c0_i32 = arith.constant 0 : i32
    %c0_i32_0 = arith.constant 0 : i32
    %c0_i32_1 = arith.constant 0 : i32
    return %c0_i32, %c0_i32_0 : i32, i32
  }
  func.func @transform_5(%arg0: i32) -> (i32, i32) {
    %c0_i32 = arith.constant 0 : i32
    %c0_i32_0 = arith.constant 0 : i32
    %c0_i32_1 = arith.constant 0 : i32
    return %c0_i32, %c0_i32_0 : i32, i32
  }
  func.func @transform_6(%arg0: i32) -> (i32, i32) {
    %c0_i32 = arith.constant 0 : i32
    %c0_i32_0 = arith.constant 0 : i32
    %c0_i32_1 = arith.constant 0 : i32
    return %c0_i32, %c0_i32_0 : i32, i32
  }
  func.func @transform_7(%arg0: i32) -> (i32, i32) {
    %c0_i32 = arith.constant 0 : i32
    %c0_i32_0 = arith.constant 0 : i32
    return %arg0, %c0_i32 : i32, i32
  }
}

</mosaic_0001>

<bundles_post_ra>
// kernel: my_network_forward.1
= control target key start
LH: loop header
LB: loop body
LE: loop exit
PB: predicated region body
PF: predicated region fallthrough
CT: control target
= control target key end

     0   :  { %vm535_vm0 = vcmask 1043456   ;;  %vm159_vm1 = vcmask 31744   ;;  %v5713_v0 = vmov 0.0   ;;  %vm5714_vm2 = vmmov 0   ;;  %s8448_s1 = inlined_call_operand.vmem [shape: f32[4,64], index: 1, kind: input, shape index: {}]   ;;  %s8449_s0 = inlined_call_operand.vmem [shape: f32[1000,4], index: 0, kind: input, shape index: {}]   ;;  %s8450_s3 = inlined_call_operand.vmem [shape: f32[64,32], index: 3, kind: input, shape index: {}]   ;;  %s8451_s5 = inlined_call_operand.vmem [shape: f32[32,2], index: 5, kind: input, shape index: {}]   ;;  %s8452_s2 = inlined_call_operand.vmem [shape: f32[1,64], index: 2, kind: input, shape index: {}]   ;;  %s8453_s4 = inlined_call_operand.vmem [shape: f32[1,32], index: 4, kind: input, shape index: {}]   ;;  %s8454_s6 = inlined_call_operand.vmem [shape: f32[1,2], index: 6, kind: input, shape index: {}]   ;;  %s8455_s7 = inlined_call_operand.vmem [shape: f32[1000,2], index: 7, kind: output, shape index: {}]  }
   0x1   :  { %5703 = vmatprep.subr.mxu1 %v5713_v0  ;;  %v151_v1 = vld [vmem:[%s8448_s1] sm:$0xf]  ;;  %4725 = vmatprep.mubr.msk.f32.mxu1 %vm5714_vm2, %v5713_v0  ;;  %v89_v2 = vld [vmem:[%s8449_s0 + $0x1f8] sm:$0xff]  ;;  %v1355_v4 = vld [vmem:[%s8450_s3 + $0x8] sm:$0xff]  ;;  %v5715_v5 = vmov 0.0|0.0   ;;  %vm1369_vm3 = vcmask 523264  }
   0x2   :  { %v1354_v3 = vld [vmem:[%s8450_s3] sm:$0xff]  ;;  %5704 = vmatpush3.msk.msra.mxu1 %vm535_vm0, %v151_v1  ;;  %4534 = vmatprep.subr.mxu0 %v5713_v0  ;;  %v27_v9 = vld [vmem:[%s8449_s0 + $0x8] sm:$0xff]  ;;  %v1356_v11 = vld [vmem:[%s8450_s3 + $0x10] sm:$0xff]  ;;  %vm2571_vm4 = vcmask 261120   ;;  %vm3637_vm5 = vcmask 15360  }
   0x3   :  { %4726 = vmatmul.mubr.msk.f32.vlgmr.msra.gmra.mrb[0].mxu1 %vm159_vm1, %v89_v2  ;;  %5685 = vmatprep.subr.bf16.mxu1 %v5715_v5  ;;  %v5686_v6 = vpack.c.bf16 %v1355_v4, %v1354_v3  ;;  %v90_v7 = vld [vmem:[%s8449_s0 + $0x200] sm:$0xff]  ;;  %v91_v10 = vld [vmem:[%s8449_s0 + $0x208] sm:$0xff]  ;;  %v1357_v12 = vld [vmem:[%s8450_s3 + $0x18] sm:$0xff] }
   0x4   :  { %4728 = vmatprep.mubr.msk.f32.mxu1 %vm5714_vm2, %v5713_v0  ;;  %4535 = vmatpush3.msk.msra.mxu0 %vm535_vm0, %v151_v1  ;;  %v26_v8 = vld [vmem:[%s8449_s0] sm:$0xff]  ;;  %v28_v13 = vld [vmem:[%s8449_s0 + $0x10] sm:$0xff]  ;;  %v5689_v14 = vpack.c.bf16 %v1357_v12, %v1356_v11  ;;  %v29_v16 = vld [vmem:[%s8449_s0 + $0x18] sm:$0xff] }
   0x5   :  { %5687 = vmatpush3.bf16.msra.mxu1 %v5686_v6  ;;  %4536 = vmatprep.mubr.msk.f32.mxu0 %vm5714_vm2, %v5713_v0  ;;  %v92_v15 = vld [vmem:[%s8449_s0 + $0x210] sm:$0xff]  ;;  %v93_v17 = vld [vmem:[%s8449_s0 + $0x218] sm:$0xff]  ;;  %v30_v18 = vld [vmem:[%s8449_s0 + $0x20] sm:$0xff] }
   0x6   :  { %4537 = vmatmul.mubr.msk.f32.vlgmr.msra.gmra.mrb[0].mxu0 %vm159_vm1, %v26_v8  ;;  %5688 = vmatprep.subr.bf16.mxu1 %v5715_v5  ;;  %v94_v19 = vld [vmem:[%s8449_s0 + $0x220] sm:$0xff]  ;;  %v1359_v21 = vld [vmem:[%s8450_s3 + $0x28] sm:$0xff]  ;;  %v32_v25 = vld [vmem:[%s8449_s0 + $0x30] sm:$0xff] }
   0x7   :  { %4729 = vmatmul.mubr.msk.f32.gmra.mrb[2].mxu1 %vm159_vm1, %v90_v7  ;;  %4539 = vmatprep.mubr.msk.f32.mxu0 %vm5714_vm2, %v5713_v0  ;;  %v1358_v20 = vld [vmem:[%s8450_s3 + $0x20] sm:$0xff]  ;;  %v31_v23 = vld [vmem:[%s8449_s0 + $0x28] sm:$0xff]  ;;  %v96_v26 = vld [vmem:[%s8449_s0 + $0x230] sm:$0xff] }
   0x8   :  { %4731 = vmatprep.mubr.msk.f32.mxu1 %vm5714_vm2, %v5713_v0  ;;  %5697 = vmatprep.subr.bf16.mxu0 %v5715_v5  ;;  %v5692_v22 = vpack.c.bf16 %v1359_v21, %v1358_v20  ;;  %v95_v24 = vld [vmem:[%s8449_s0 + $0x228] sm:$0xff]  ;;  %v33_v27 = vld [vmem:[%s8449_s0 + $0x38] sm:$0xff]  ;;  %v34_v29 = vld [vmem:[%s8449_s0 + $0x40] sm:$0xff] }
   0x9   :  { %5690 = vmatpush3.bf16.msra.mxu1 %v5689_v14  ;;  %v97_v28 = vld [vmem:[%s8449_s0 + $0x238] sm:$0xff]  ;;  %v98_v30 = vld [vmem:[%s8449_s0 + $0x240] sm:$0xff]  ;;  %v35_v31 = vld [vmem:[%s8449_s0 + $0x48] sm:$0xff] }
   0xa   :  { %4540 = vmatmul.mubr.msk.f32.gmra.mrb[2].mxu0 %vm159_vm1, %v27_v9  ;;  %5691 = vmatprep.subr.bf16.mxu1 %v5715_v5  ;;  %v99_v32 = vld [vmem:[%s8449_s0 + $0x248] sm:$0xff]  ;;  %v36_v33 = vld [vmem:[%s8449_s0 + $0x50] sm:$0xff]  ;;  %v37_v35 = vld [vmem:[%s8449_s0 + $0x58] sm:$0xff] }
   0xb   :  { %4732 = vmatmul.mubr.msk.f32.gmra.mrb[4].mxu1 %vm159_vm1, %v91_v10  ;;  %4542 = vmatprep.mubr.msk.f32.mxu0 %vm5714_vm2, %v5713_v0  ;;  %v100_v34 = vld [vmem:[%s8449_s0 + $0x250] sm:$0xff]  ;;  %v101_v36 = vld [vmem:[%s8449_s0 + $0x258] sm:$0xff]  ;;  %v38_v37 = vld [vmem:[%s8449_s0 + $0x60] sm:$0xff] }
   0xc   :  { %4734 = vmatprep.mubr.msk.f32.mxu1 %vm5714_vm2, %v5713_v0  ;;  %v102_v38 = vld [vmem:[%s8449_s0 + $0x260] sm:$0xff]  ;;  %v39_v39 = vld [vmem:[%s8449_s0 + $0x68] sm:$0xff]  ;;  %v40_v41 = vld [vmem:[%s8449_s0 + $0x70] sm:$0xff] }
   0xd   :  { %5693 = vmatpush3.bf16.msra.mxu1 %v5692_v22  ;;  %v103_v40 = vld [vmem:[%s8449_s0 + $0x268] sm:$0xff]  ;;  %v104_v42 = vld [vmem:[%s8449_s0 + $0x270] sm:$0xff]  ;;  %v1361_v44 = vld [vmem:[%s8450_s3 + $0x38] sm:$0xff] }
   0xe   :  { %4543 = vmatmul.mubr.msk.f32.gmra.mrb[4].mxu0 %vm159_vm1, %v28_v13  ;;  %5694 = vmatprep.subr.bf16.mxu1 %v5715_v5  ;;  %v1360_v43 = vld [vmem:[%s8450_s3 + $0x30] sm:$0xff]  ;;  %v41_v46 = vld [vmem:[%s8449_s0 + $0x78] sm:$0xff]  ;;  %v42_v48 = vld [vmem:[%s8449_s0 + $0x80] sm:$0xff] }
   0xf   :  { %4735 = vmatmul.mubr.msk.f32.gmra.mrb[6].mxu1 %vm159_vm1, %v92_v15  ;;  %4545 = vmatprep.mubr.msk.f32.mxu0 %vm5714_vm2, %v5713_v0  ;;  %v5695_v45 = vpack.c.bf16 %v1361_v44, %v1360_v43  ;;  %v105_v47 = vld [vmem:[%s8449_s0 + $0x278] sm:$0xff]  ;;  %v106_v49 = vld [vmem:[%s8449_s0 + $0x280] sm:$0xff]  ;;  %v43_v50 = vld [vmem:[%s8449_s0 + $0x88] sm:$0xff] }
  0x10   :  { %4737 = vmatprep.mubr.msk.f32.mxu1 %vm5714_vm2, %v5713_v0  ;;  %v107_v51 = vld [vmem:[%s8449_s0 + $0x288] sm:$0xff]  ;;  %v44_v52 = vld [vmem:[%s8449_s0 + $0x90] sm:$0xff]  ;;  %v45_v54 = vld [vmem:[%s8449_s0 + $0x98] sm:$0xff] }
  0x11   :  { %5696 = vmatpush3.bf16.msra.mxu1 %v5695_v45  ;;  %v108_v53 = vld [vmem:[%s8449_s0 + $0x290] sm:$0xff]  ;;  %v109_v55 = vld [vmem:[%s8449_s0 + $0x298] sm:$0xff]  ;;  %v46_v56 = vld [vmem:[%s8449_s0 + $0xa0] sm:$0xff] }
  0x12   :  { %4546 = vmatmul.mubr.msk.f32.gmra.mrb[6].mxu0 %vm159_vm1, %v29_v16  ;;  %v110_v57 = vld [vmem:[%s8449_s0 + $0x2a0] sm:$0xff]  ;;  %v47_v58 = vld [vmem:[%s8449_s0 + $0xa8] sm:$0xff]  ;;  %v48_v62 = vld [vmem:[%s8449_s0 + $0xb0] sm:$0xff] }
  0x13   :  { %4738 = vmatmul.mubr.msk.f32.gmra.mrb[8].mxu1 %vm159_vm1, %v93_v17  ;;  %4548 = vmatprep.mubr.msk.f32.mxu0 %vm5714_vm2, %v5713_v0  ;;  %v111_v59 = vld [vmem:[%s8449_s0 + $0x2a8] sm:$0xff]  ;;  %v2560_v60 = vld [vmem:[%s8451_s5] sm:$0xff]  ;;  %v112_v1 = vld [vmem:[%s8449_s0 + $0x2b0] sm:$0xff] }
  0x14   :  { %4740 = vmatprep.mubr.msk.f32.mxu1 %vm5714_vm2, %v5713_v0  ;;  %v2561_v61 = vld [vmem:[%s8451_s5 + $0x8] sm:$0xff]  ;;  %v49_v2 = vld [vmem:[%s8449_s0 + $0xb8] sm:$0xff]  ;;  %v50_v4 = vld [vmem:[%s8449_s0 + $0xc0] sm:$0xff] }
  0x15   :  { %v5698_v63 = vpack.c.bf16 %v2561_v61, %v2560_v60  ;;  %v113_v3 = vld [vmem:[%s8449_s0 + $0x2b8] sm:$0xff]  ;;  %v51_v6 = vld [vmem:[%s8449_s0 + $0xc8] sm:$0xff]  ;;  %v52_v8 = vld [vmem:[%s8449_s0 + $0xd0] sm:$0xff] }
  0x16   :  { %4549 = vmatmul.mubr.msk.f32.gmra.mrb[8].mxu0 %vm159_vm1, %v30_v18  ;;  %v115_v7 = vld [vmem:[%s8449_s0 + $0x2c8] sm:$0xff]  ;;  %v116_v9 = vld [vmem:[%s8449_s0 + $0x2d0] sm:$0xff]  ;;  %v53_v10 = vld [vmem:[%s8449_s0 + $0xd8] sm:$0xff] }
  0x17   :  { %4741 = vmatmul.mubr.msk.f32.gmra.mrb[10].mxu1 %vm159_vm1, %v94_v19  ;;  %4551 = vmatprep.mubr.msk.f32.mxu0 %vm5714_vm2, %v5713_v0  ;;  %v117_v11 = vld [vmem:[%s8449_s0 + $0x2d8] sm:$0xff]  ;;  %v54_v12 = vld [vmem:[%s8449_s0 + $0xe0] sm:$0xff]  ;;  %v55_v14 = vld [vmem:[%s8449_s0 + $0xe8] sm:$0xff] }
  0x18   :  { %4743 = vmatprep.mubr.msk.f32.mxu1 %vm5714_vm2, %v5713_v0  ;;  %5699 = vmatpush3.bf16.msra.mxu0 %v5698_v63  ;;  %v118_v13 = vld [vmem:[%s8449_s0 + $0x2e0] sm:$0xff]  ;;  %v119_v15 = vld [vmem:[%s8449_s0 + $0x2e8] sm:$0xff]  ;;  %v56_v16 = vld [vmem:[%s8449_s0 + $0xf0] sm:$0xff] }
  0x19   :  { %5700 = vmatprep.subr.bf16.mxu0 %v5715_v5  ;;  %v114_v5 = vld [vmem:[%s8449_s0 + $0x2c0] sm:$0xff]  ;;  %v120_v17 = vld [vmem:[%s8449_s0 + $0x2f0] sm:$0xff]  ;;  %v57_v18 = vld [vmem:[%s8449_s0 + $0xf8] sm:$0xff] }
  0x1a   :  { %4552 = vmatmul.mubr.msk.f32.gmra.mrb[10].mxu0 %vm159_vm1, %v31_v23  ;;  %v121_v19 = vld [vmem:[%s8449_s0 + $0x2f8] sm:$0xff]  ;;  %v58_v20 = vld [vmem:[%s8449_s0 + $0x100] sm:$0xff]  ;;  %v59_v22 = vld [vmem:[%s8449_s0 + $0x108] sm:$0xff] }
  0x1b   :  { %4744 = vmatmul.mubr.msk.f32.gmra.mrb[12].mxu1 %vm159_vm1, %v95_v24  ;;  %4554 = vmatprep.mubr.msk.f32.mxu0 %vm5714_vm2, %v5713_v0  ;;  %v122_v21 = vld [vmem:[%s8449_s0 + $0x300] sm:$0xff]  ;;  %v123_v23 = vld [vmem:[%s8449_s0 + $0x308] sm:$0xff]  ;;  %v60_v24 = vld [vmem:[%s8449_s0 + $0x110] sm:$0xff] }
  0x1c   :  { %4746 = vmatprep.mubr.msk.f32.mxu1 %vm5714_vm2, %v5713_v0  ;;  %v133_v43 = vld [vmem:[%s8449_s0 + $0x358] sm:$0xff]  ;;  %v70_v44 = vld [vmem:[%s8449_s0 + $0x160] sm:$0xff] }
  0x1d   :  { %v134_v45 = vld [vmem:[%s8449_s0 + $0x360] sm:$0xff] }
  0x1e   :  { %4555 = vmatmul.mubr.msk.f32.gmra.mrb[12].mxu0 %vm159_vm1, %v32_v25  ;;  %v124_v25 = vld [vmem:[%s8449_s0 + $0x310] sm:$0xff]  ;;  %v78_v60 = vld [vmem:[%s8449_s0 + $0x1a0] sm:$0xff] }
  0x1f   :  { %4747 = vmatmul.mubr.msk.f32.gmra.mrb[14].mxu1 %vm159_vm1, %v96_v26  ;;  %4557 = vmatprep.mubr.msk.f32.mxu0 %vm5714_vm2, %v5713_v0  ;;  %v61_v26 = vld [vmem:[%s8449_s0 + $0x118] sm:$0xff]  ;;  %v142_v61 = vld [vmem:[%s8449_s0 + $0x3a0] sm:$0xff] }
  0x20   :  { %4749 = vmatprep.mubr.msk.f32.mxu1 %vm5714_vm2, %v5713_v0 }
  0x22   :  { %4558 = vmatmul.mubr.msk.f32.gmra.mrb[14].mxu0 %vm159_vm1, %v33_v27  ;;  %v125_v27 = vld [vmem:[%s8449_s0 + $0x318] sm:$0xff] }
  0x23   :  { %4750 = vmatmul.mubr.msk.f32.gmra.mrb[16].mxu1 %vm159_vm1, %v97_v28  ;;  %4560 = vmatprep.mubr.msk.f32.mxu0 %vm5714_vm2, %v5713_v0  ;;  %v62_v28 = vld [vmem:[%s8449_s0 + $0x120] sm:$0xff] }
  0x24   :  { %4752 = vmatprep.mubr.msk.f32.mxu1 %vm5714_vm2, %v5713_v0 }
  0x26   :  { %4561 = vmatmul.mubr.msk.f32.gmra.mrb[16].mxu0 %vm159_vm1, %v34_v29  ;;  %v126_v29 = vld [vmem:[%s8449_s0 + $0x320] sm:$0xff] }
  0x27   :  { %4753 = vmatmul.mubr.msk.f32.gmra.mrb[18].mxu1 %vm159_vm1, %v98_v30  ;;  %4563 = vmatprep.mubr.msk.f32.mxu0 %vm5714_vm2, %v5713_v0  ;;  %v63_v30 = vld [vmem:[%s8449_s0 + $0x128] sm:$0xff] }
  0x28   :  { %4755 = vmatprep.mubr.msk.f32.mxu1 %vm5714_vm2, %v5713_v0 }
  0x2a   :  { %4564 = vmatmul.mubr.msk.f32.gmra.mrb[18].mxu0 %vm159_vm1, %v35_v31  ;;  %v127_v31 = vld [vmem:[%s8449_s0 + $0x328] sm:$0xff] }
  0x2b   :  { %4756 = vmatmul.mubr.msk.f32.gmra.mrb[20].mxu1 %vm159_vm1, %v99_v32  ;;  %4566 = vmatprep.mubr.msk.f32.mxu0 %vm5714_vm2, %v5713_v0  ;;  %v64_v32 = vld [vmem:[%s8449_s0 + $0x130] sm:$0xff] }
  0x2c   :  { %4758 = vmatprep.mubr.msk.f32.mxu1 %vm5714_vm2, %v5713_v0 }
  0x2e   :  { %4567 = vmatmul.mubr.msk.f32.gmra.mrb[20].mxu0 %vm159_vm1, %v36_v33  ;;  %v128_v33 = vld [vmem:[%s8449_s0 + $0x330] sm:$0xff] }
  0x2f   :  { %4759 = vmatmul.mubr.msk.f32.gmra.mrb[22].mxu1 %vm159_vm1, %v100_v34  ;;  %4569 = vmatprep.mubr.msk.f32.mxu0 %vm5714_vm2, %v5713_v0  ;;  %v65_v34 = vld [vmem:[%s8449_s0 + $0x138] sm:$0xff] }
  0x30   :  { %4761 = vmatprep.mubr.msk.f32.mxu1 %vm5714_vm2, %v5713_v0 }
  0x32   :  { %4570 = vmatmul.mubr.msk.f32.gmra.mrb[22].mxu0 %vm159_vm1, %v37_v35  ;;  %v129_v35 = vld [vmem:[%s8449_s0 + $0x338] sm:$0xff] }
  0x33   :  { %4762 = vmatmul.mubr.msk.f32.gmra.mrb[24].mxu1 %vm159_vm1, %v101_v36  ;;  %4572 = vmatprep.mubr.msk.f32.mxu0 %vm5714_vm2, %v5713_v0  ;;  %v66_v36 = vld [vmem:[%s8449_s0 + $0x140] sm:$0xff] }
  0x34   :  { %4764 = vmatprep.mubr.msk.f32.mxu1 %vm5714_vm2, %v5713_v0 }
  0x36   :  { %4573 = vmatmul.mubr.msk.f32.gmra.mrb[24].mxu0 %vm159_vm1, %v38_v37  ;;  %v130_v37 = vld [vmem:[%s8449_s0 + $0x340] sm:$0xff] }
  0x37   :  { %4765 = vmatmul.mubr.msk.f32.gmra.mrb[26].mxu1 %vm159_vm1, %v102_v38  ;;  %4575 = vmatprep.mubr.msk.f32.mxu0 %vm5714_vm2, %v5713_v0  ;;  %v67_v38 = vld [vmem:[%s8449_s0 + $0x148] sm:$0xff] }
  0x38   :  { %4767 = vmatprep.mubr.msk.f32.mxu1 %vm5714_vm2, %v5713_v0 }
  0x3a   :  { %4576 = vmatmul.mubr.msk.f32.gmra.mrb[26].mxu0 %vm159_vm1, %v39_v39  ;;  %v131_v39 = vld [vmem:[%s8449_s0 + $0x348] sm:$0xff] }
  0x3b   :  { %4768 = vmatmul.mubr.msk.f32.gmra.mrb[28].mxu1 %vm159_vm1, %v103_v40  ;;  %4578 = vmatprep.mubr.msk.f32.mxu0 %vm5714_vm2, %v5713_v0  ;;  %v68_v40 = vld [vmem:[%s8449_s0 + $0x150] sm:$0xff] }
  0x3c   :  { %4770 = vmatprep.mubr.msk.f32.mxu1 %vm5714_vm2, %v5713_v0 }
  0x3e   :  { %4579 = vmatmul.mubr.msk.f32.gmra.mrb[28].mxu0 %vm159_vm1, %v40_v41  ;;  %v132_v41 = vld [vmem:[%s8449_s0 + $0x350] sm:$0xff] }
  0x3f   :  { %4771 = vmatmul.mubr.msk.f32.gmra.mrb[30].mxu1 %vm159_vm1, %v104_v42  ;;  %4581 = vmatprep.mubr.msk.f32.mxu0 %vm5714_vm2, %v5713_v0  ;;  %v69_v42 = vld [vmem:[%s8449_s0 + $0x158] sm:$0xff] }
  0x40   :  { %4773 = vmatprep.mubr.msk.f32.mxu1 %vm5714_vm2, %v5713_v0 }
  0x42   :  { %4582 = vmatmul.mubr.msk.f32.gmra.mrb[30].mxu0 %vm159_vm1, %v41_v46  ;;  %v71_v46 = vld [vmem:[%s8449_s0 + $0x168] sm:$0xff] }
  0x43   :  { %4774 = vmatmul.mubr.msk.f32.gmra.mrb[32].mxu1 %vm159_vm1, %v105_v47  ;;  %4584 = vmatprep.mubr.msk.f32.mxu0 %vm5714_vm2, %v5713_v0  ;;  %v135_v47 = vld [vmem:[%s8449_s0 + $0x368] sm:$0xff] }
  0x44   :  { %4776 = vmatprep.mubr.msk.f32.mxu1 %vm5714_vm2, %v5713_v0 }
  0x46   :  { %4585 = vmatmul.mubr.msk.f32.gmra.mrb[32].mxu0 %vm159_vm1, %v42_v48  ;;  %v72_v48 = vld [vmem:[%s8449_s0 + $0x170] sm:$0xff] }
  0x47   :  { %4777 = vmatmul.mubr.msk.f32.gmra.mrb[34].mxu1 %vm159_vm1, %v106_v49  ;;  %4587 = vmatprep.mubr.msk.f32.mxu0 %vm5714_vm2, %v5713_v0  ;;  %v136_v49 = vld [vmem:[%s8449_s0 + $0x370] sm:$0xff] }
  0x48   :  { %4779 = vmatprep.mubr.msk.f32.mxu1 %vm5714_vm2, %v5713_v0 }
  0x4a   :  { %4588 = vmatmul.mubr.msk.f32.gmra.mrb[34].mxu0 %vm159_vm1, %v43_v50  ;;  %v73_v50 = vld [vmem:[%s8449_s0 + $0x178] sm:$0xff] }
  0x4b   :  { %4780 = vmatmul.mubr.msk.f32.gmra.mrb[36].mxu1 %vm159_vm1, %v107_v51  ;;  %4590 = vmatprep.mubr.msk.f32.mxu0 %vm5714_vm2, %v5713_v0  ;;  %v137_v51 = vld [vmem:[%s8449_s0 + $0x378] sm:$0xff] }
  0x4c   :  { %4782 = vmatprep.mubr.msk.f32.mxu1 %vm5714_vm2, %v5713_v0 }
  0x4e   :  { %4591 = vmatmul.mubr.msk.f32.gmra.mrb[36].mxu0 %vm159_vm1, %v44_v52  ;;  %v74_v52 = vld [vmem:[%s8449_s0 + $0x180] sm:$0xff] }
  0x4f   :  { %4783 = vmatmul.mubr.msk.f32.gmra.mrb[38].mxu1 %vm159_vm1, %v108_v53  ;;  %4593 = vmatprep.mubr.msk.f32.mxu0 %vm5714_vm2, %v5713_v0  ;;  %v138_v53 = vld [vmem:[%s8449_s0 + $0x380] sm:$0xff] }
  0x50   :  { %4785 = vmatprep.mubr.msk.f32.mxu1 %vm5714_vm2, %v5713_v0 }
  0x52   :  { %4594 = vmatmul.mubr.msk.f32.gmra.mrb[38].mxu0 %vm159_vm1, %v45_v54  ;;  %v75_v54 = vld [vmem:[%s8449_s0 + $0x188] sm:$0xff] }
  0x53   :  { %4786 = vmatmul.mubr.msk.f32.gmra.mrb[40].mxu1 %vm159_vm1, %v109_v55  ;;  %4596 = vmatprep.mubr.msk.f32.mxu0 %vm5714_vm2, %v5713_v0  ;;  %v139_v55 = vld [vmem:[%s8449_s0 + $0x388] sm:$0xff] }
  0x54   :  { %4788 = vmatprep.mubr.msk.f32.mxu1 %vm5714_vm2, %v5713_v0 }
  0x56   :  { %4597 = vmatmul.mubr.msk.f32.gmra.mrb[40].mxu0 %vm159_vm1, %v46_v56  ;;  %v76_v56 = vld [vmem:[%s8449_s0 + $0x190] sm:$0xff] }
  0x57   :  { %4789 = vmatmul.mubr.msk.f32.gmra.mrb[42].mxu1 %vm159_vm1, %v110_v57  ;;  %4599 = vmatprep.mubr.msk.f32.mxu0 %vm5714_vm2, %v5713_v0  ;;  %v140_v57 = vld [vmem:[%s8449_s0 + $0x390] sm:$0xff] }
  0x58   :  { %4791 = vmatprep.mubr.msk.f32.mxu1 %vm5714_vm2, %v5713_v0 }
  0x5a   :  { %4600 = vmatmul.mubr.msk.f32.gmra.mrb[42].mxu0 %vm159_vm1, %v47_v58  ;;  %v77_v58 = vld [vmem:[%s8449_s0 + $0x198] sm:$0xff] }
  0x5b   :  { %4792 = vmatmul.mubr.msk.f32.gmra.mrb[44].mxu1 %vm159_vm1, %v111_v59  ;;  %4602 = vmatprep.mubr.msk.f32.mxu0 %vm5714_vm2, %v5713_v0  ;;  %v141_v59 = vld [vmem:[%s8449_s0 + $0x398] sm:$0xff] }
  0x5c   :  { %4794 = vmatprep.mubr.msk.f32.mxu1 %vm5714_vm2, %v5713_v0 }
  0x5e   :  { %4603 = vmatmul.mubr.msk.f32.gmra.mrb[44].mxu0 %vm159_vm1, %v48_v62 }
  0x5f   :  { %4795 = vmatmul.mubr.msk.f32.gmra.mrb[46].mxu1 %vm159_vm1, %v112_v1  ;;  %4605 = vmatprep.mubr.msk.f32.mxu0 %vm5714_vm2, %v5713_v0  ;;  %v79_v1 = vld [vmem:[%s8449_s0 + $0x1a8] sm:$0xff] }
  0x60   :  { %4797 = vmatprep.mubr.msk.f32.mxu1 %vm5714_vm2, %v5713_v0 }
  0x62   :  { %4606 = vmatmul.mubr.msk.f32.gmra.mrb[46].mxu0 %vm159_vm1, %v49_v2  ;;  %v143_v2 = vld [vmem:[%s8449_s0 + $0x3a8] sm:$0xff] }
  0x63   :  { %4798 = vmatmul.mubr.msk.f32.gmra.mrb[48].mxu1 %vm159_vm1, %v113_v3  ;;  %4608 = vmatprep.mubr.msk.f32.mxu0 %vm5714_vm2, %v5713_v0 }
  0x64   :  { %4800 = vmatprep.mubr.msk.f32.mxu1 %vm5714_vm2, %v5713_v0 }
  0x66   :  { %4609 = vmatmul.mubr.msk.f32.gmra.mrb[48].mxu0 %vm159_vm1, %v50_v4  ;;  %v2562_v4 = vld [vmem:[%s8451_s5 + $0x10] sm:$0xff] }
  0x67   :  { %4801 = vmatmul.mubr.msk.f32.gmra.mrb[50].mxu1 %vm159_vm1, %v114_v5  ;;  %4611 = vmatprep.mubr.msk.f32.mxu0 %vm5714_vm2, %v5713_v0  ;;  %v2563_v5 = vld [vmem:[%s8451_s5 + $0x18] sm:$0xff] }
  0x68   :  { %4803 = vmatprep.mubr.msk.f32.mxu1 %vm5714_vm2, %v5713_v0 }
  0x6a   :  { %4612 = vmatmul.mubr.msk.f32.gmra.mrb[50].mxu0 %vm159_vm1, %v51_v6 }
  0x6b   :  { %4804 = vmatmul.mubr.msk.f32.gmra.mrb[52].mxu1 %vm159_vm1, %v115_v7  ;;  %4614 = vmatprep.mubr.msk.f32.mxu0 %vm5714_vm2, %v5713_v0 }
  0x6c   :  { %4806 = vmatprep.mubr.msk.f32.mxu1 %vm5714_vm2, %v5713_v0 }
  0x6e   :  { %4615 = vmatmul.mubr.msk.f32.gmra.mrb[52].mxu0 %vm159_vm1, %v52_v8  ;;  %v5701_v8 = vpack.c.bf16 %v2563_v5, %v2562_v4 }
  0x6f   :  { %4807 = vmatmul.mubr.msk.f32.gmra.mrb[54].mxu1 %vm159_vm1, %v116_v9  ;;  %4617 = vmatprep.mubr.msk.f32.mxu0 %vm5714_vm2, %v5713_v0 }
  0x70   :  { %4809 = vmatprep.mubr.msk.f32.mxu1 %vm5714_vm2, %v5713_v0  ;;  %5702 = vmatpush3.bf16.msra.mxu0 %v5701_v8 }
  0x72   :  { %4618 = vmatmul.mubr.msk.f32.gmra.mrb[54].mxu0 %vm159_vm1, %v53_v10  ;;  %v80_v10 = vld [vmem:[%s8449_s0 + $0x1b0] sm:$0xff] }
  0x73   :  { %4810 = vmatmul.mubr.msk.f32.gmra.mrb[56].mxu1 %vm159_vm1, %v117_v11  ;;  %4620 = vmatprep.mubr.msk.f32.mxu0 %vm5714_vm2, %v5713_v0  ;;  %v144_v11 = vld [vmem:[%s8449_s0 + $0x3b0] sm:$0xff] }
  0x74   :  { %4812 = vmatprep.mubr.msk.f32.mxu1 %vm5714_vm2, %v5713_v0 }
  0x76   :  { %4621 = vmatmul.mubr.msk.f32.gmra.mrb[56].mxu0 %vm159_vm1, %v54_v12 }
  0x77   :  { %4813 = vmatmul.mubr.msk.f32.gmra.mrb[58].mxu1 %vm159_vm1, %v118_v13  ;;  %4623 = vmatprep.mubr.msk.f32.mxu0 %vm5714_vm2, %v5713_v0 }
  0x78   :  { %4815 = vmatprep.mubr.msk.f32.mxu1 %vm5714_vm2, %v5713_v0 }
  0x7a   :  { %4624 = vmatmul.mubr.msk.f32.gmra.mrb[58].mxu0 %vm159_vm1, %v55_v14 }
  0x7b   :  { %4816 = vmatmul.mubr.msk.f32.gmra.mrb[60].mxu1 %vm159_vm1, %v119_v15  ;;  %4626 = vmatprep.mubr.msk.f32.mxu0 %vm5714_vm2, %v5713_v0 }
  0x7c   :  { %4818 = vmatprep.mubr.msk.f32.mxu1 %vm5714_vm2, %v5713_v0 }
  0x7e   :  { %4627 = vmatmul.mubr.msk.f32.gmra.mrb[60].mxu0 %vm159_vm1, %v56_v16  ;;  %v81_v16 = vld [vmem:[%s8449_s0 + $0x1b8] sm:$0xff] }
  0x7f   :  { %4819 = vmatmul.mubr.msk.f32.gmra.mrb[62].mxu1 %vm159_vm1, %v120_v17  ;;  %4629 = vmatprep.mubr.msk.f32.mxu0 %vm5714_vm2, %v5713_v0  ;;  %v145_v17 = vld [vmem:[%s8449_s0 + $0x3b8] sm:$0xff] }
  0x80   :  { %4821 = vmatprep.mubr.msk.f32.mxu1 %vm5714_vm2, %v5713_v0 }
  0x82   :  { %4630 = vmatmul.mubr.msk.f32.gmra.mrb[62].mxu0 %vm159_vm1, %v57_v18 }
  0x83   :  { %4822 = vmatmul.mubr.msk.f32.gmra.mrb[64].mxu1 %vm159_vm1, %v121_v19  ;;  %4632 = vmatprep.mubr.msk.f32.mxu0 %vm5714_vm2, %v5713_v0 }
  0x84   :  { %4824 = vmatprep.mubr.msk.f32.mxu1 %vm5714_vm2, %v5713_v0 }
  0x86   :  { %4633 = vmatmul.mubr.msk.f32.gmra.mrb[64].mxu0 %vm159_vm1, %v58_v20 }
  0x87   :  { %4825 = vmatmul.mubr.msk.f32.gmra.mrb[66].mxu1 %vm159_vm1, %v122_v21  ;;  %4635 = vmatprep.mubr.msk.f32.mxu0 %vm5714_vm2, %v5713_v0 }
  0x88   :  { %4827 = vmatprep.mubr.msk.f32.mxu1 %vm5714_vm2, %v5713_v0 }
  0x8a   :  { %4636 = vmatmul.mubr.msk.f32.gmra.mrb[66].mxu0 %vm159_vm1, %v59_v22  ;;  %v82_v22 = vld [vmem:[%s8449_s0 + $0x1c0] sm:$0xff] }
  0x8b   :  { %4828 = vmatmul.mubr.msk.f32.gmra.mrb[68].mxu1 %vm159_vm1, %v123_v23  ;;  %4638 = vmatprep.mubr.msk.f32.mxu0 %vm5714_vm2, %v5713_v0  ;;  %v146_v23 = vld [vmem:[%s8449_s0 + $0x3c0] sm:$0xff] }
  0x8c   :  { %4830 = vmatprep.mubr.msk.f32.mxu1 %vm5714_vm2, %v5713_v0 }
  0x8e   :  { %4639 = vmatmul.mubr.msk.f32.gmra.mrb[68].mxu0 %vm159_vm1, %v60_v24 }
  0x8f   :  { %4831 = vmatmul.mubr.msk.f32.gmra.mrb[70].mxu1 %vm159_vm1, %v124_v25  ;;  %4641 = vmatprep.mubr.msk.f32.mxu0 %vm5714_vm2, %v5713_v0 }
  0x90   :  { %4833 = vmatprep.mubr.msk.f32.mxu1 %vm5714_vm2, %v5713_v0 }
  0x92   :  { %4642 = vmatmul.mubr.msk.f32.gmra.mrb[70].mxu0 %vm159_vm1, %v61_v26 }
  0x93   :  { %4834 = vmatmul.mubr.msk.f32.gmra.mrb[72].mxu1 %vm159_vm1, %v125_v27  ;;  %4644 = vmatprep.mubr.msk.f32.mxu0 %vm5714_vm2, %v5713_v0 }
  0x94   :  { %4836 = vmatprep.mubr.msk.f32.mxu1 %vm5714_vm2, %v5713_v0 }
  0x96   :  { %4645 = vmatmul.mubr.msk.f32.gmra.mrb[72].mxu0 %vm159_vm1, %v62_v28  ;;  %v83_v28 = vld [vmem:[%s8449_s0 + $0x1c8] sm:$0xff] }
  0x97   :  { %4837 = vmatmul.mubr.msk.f32.gmra.mrb[74].mxu1 %vm159_vm1, %v126_v29  ;;  %4647 = vmatprep.mubr.msk.f32.mxu0 %vm5714_vm2, %v5713_v0  ;;  %v147_v29 = vld [vmem:[%s8449_s0 + $0x3c8] sm:$0xff] }
  0x98   :  { %4839 = vmatprep.mubr.msk.f32.mxu1 %vm5714_vm2, %v5713_v0 }
  0x9a   :  { %4648 = vmatmul.mubr.msk.f32.gmra.mrb[74].mxu0 %vm159_vm1, %v63_v30 }
  0x9b   :  { %4840 = vmatmul.mubr.msk.f32.gmra.mrb[76].mxu1 %vm159_vm1, %v127_v31  ;;  %4650 = vmatprep.mubr.msk.f32.mxu0 %vm5714_vm2, %v5713_v0 }
  0x9c   :  { %4842 = vmatprep.mubr.msk.f32.mxu1 %vm5714_vm2, %v5713_v0 }
  0x9e   :  { %4651 = vmatmul.mubr.msk.f32.gmra.mrb[76].mxu0 %vm159_vm1, %v64_v32 }
  0x9f   :  { %4843 = vmatmul.mubr.msk.f32.gmra.mrb[78].mxu1 %vm159_vm1, %v128_v33  ;;  %4653 = vmatprep.mubr.msk.f32.mxu0 %vm5714_vm2, %v5713_v0 }
  0xa0   :  { %4845 = vmatprep.mubr.msk.f32.mxu1 %vm5714_vm2, %v5713_v0 }
  0xa2   :  { %4654 = vmatmul.mubr.msk.f32.gmra.mrb[78].mxu0 %vm159_vm1, %v65_v34  ;;  %v84_v34 = vld [vmem:[%s8449_s0 + $0x1d0] sm:$0xff] }
  0xa3   :  { %4846 = vmatmul.mubr.msk.f32.gmra.mrb[80].mxu1 %vm159_vm1, %v129_v35  ;;  %4656 = vmatprep.mubr.msk.f32.mxu0 %vm5714_vm2, %v5713_v0  ;;  %v148_v35 = vld [vmem:[%s8449_s0 + $0x3d0] sm:$0xff] }
  0xa4   :  { %4848 = vmatprep.mubr.msk.f32.mxu1 %vm5714_vm2, %v5713_v0 }
  0xa6   :  { %4657 = vmatmul.mubr.msk.f32.gmra.mrb[80].mxu0 %vm159_vm1, %v66_v36 }
  0xa7   :  { %4849 = vmatmul.mubr.msk.f32.gmra.mrb[82].mxu1 %vm159_vm1, %v130_v37  ;;  %4659 = vmatprep.mubr.msk.f32.mxu0 %vm5714_vm2, %v5713_v0 }
  0xa8   :  { %4851 = vmatprep.mubr.msk.f32.mxu1 %vm5714_vm2, %v5713_v0 }
  0xaa   :  { %4660 = vmatmul.mubr.msk.f32.gmra.mrb[82].mxu0 %vm159_vm1, %v67_v38 }
  0xab   :  { %4852 = vmatmul.mubr.msk.f32.gmra.mrb[84].mxu1 %vm159_vm1, %v131_v39  ;;  %4662 = vmatprep.mubr.msk.f32.mxu0 %vm5714_vm2, %v5713_v0 }
  0xac   :  { %4854 = vmatprep.mubr.msk.f32.mxu1 %vm5714_vm2, %v5713_v0 }
  0xae   :  { %4663 = vmatmul.mubr.msk.f32.gmra.mrb[84].mxu0 %vm159_vm1, %v68_v40  ;;  %v85_v40 = vld [vmem:[%s8449_s0 + $0x1d8] sm:$0xff] }
  0xaf   :  { %4855 = vmatmul.mubr.msk.f32.gmra.mrb[86].mxu1 %vm159_vm1, %v132_v41  ;;  %4665 = vmatprep.mubr.msk.f32.mxu0 %vm5714_vm2, %v5713_v0  ;;  %v149_v41 = vld [vmem:[%s8449_s0 + $0x3d8] sm:$0xff] }
  0xb0   :  { %4857 = vmatprep.mubr.msk.f32.mxu1 %vm5714_vm2, %v5713_v0 }
  0xb2   :  { %4666 = vmatmul.mubr.msk.f32.gmra.mrb[86].mxu0 %vm159_vm1, %v69_v42 }
  0xb3   :  { %4858 = vmatmul.mubr.msk.f32.gmra.mrb[88].mxu1 %vm159_vm1, %v133_v43  ;;  %4668 = vmatprep.mubr.msk.f32.mxu0 %vm5714_vm2, %v5713_v0  ;;  %v6560_v43 = vld [vmem:[%s8452_s2] ss:$0 sm:$0xff] }
  0xb4   :  { %4860 = vmatprep.mubr.msk.f32.mxu1 %vm5714_vm2, %v5713_v0 }
  0xb6   :  { %4669 = vmatmul.mubr.msk.f32.gmra.mrb[88].mxu0 %vm159_vm1, %v70_v44 }
  0xb7   :  { %4861 = vmatmul.mubr.msk.f32.gmra.mrb[90].mxu1 %vm159_vm1, %v134_v45  ;;  %4671 = vmatprep.mubr.msk.f32.mxu0 %vm5714_vm2, %v5713_v0 }
  0xb8   :  { %4863 = vmatprep.mubr.msk.f32.mxu1 %vm5714_vm2, %v5713_v0 }
  0xba   :  { %4672 = vmatmul.mubr.msk.f32.gmra.mrb[90].mxu0 %vm159_vm1, %v71_v46 }
  0xbb   :  { %4864 = vmatmul.mubr.msk.f32.gmra.mrb[92].mxu1 %vm159_vm1, %v135_v47  ;;  %4674 = vmatprep.mubr.msk.f32.mxu0 %vm5714_vm2, %v5713_v0 }
  0xbc   :  { %4866 = vmatprep.mubr.msk.f32.mxu1 %vm5714_vm2, %v5713_v0 }
  0xbe   :  { %4675 = vmatmul.mubr.msk.f32.gmra.mrb[92].mxu0 %vm159_vm1, %v72_v48  ;;  %v86_v48 = vld [vmem:[%s8449_s0 + $0x1e0] sm:$0xff] }
  0xbf   :  { %4867 = vmatmul.mubr.msk.f32.gmra.mrb[94].mxu1 %vm159_vm1, %v136_v49  ;;  %4677 = vmatprep.mubr.msk.f32.mxu0 %vm5714_vm2, %v5713_v0  ;;  %v150_v49 = vld [vmem:[%s8449_s0 + $0x3e0] sm:$0xff] }
  0xc0   :  { %4869 = vmatprep.mubr.msk.f32.mxu1 %vm5714_vm2, %v5713_v0 }
  0xc2   :  { %4678 = vmatmul.mubr.msk.f32.gmra.mrb[94].mxu0 %vm159_vm1, %v73_v50 }
  0xc3   :  { %4870 = vmatmul.mubr.msk.f32.gmra.mrb[96].mxu1 %vm159_vm1, %v137_v51  ;;  %4680 = vmatprep.mubr.msk.f32.mxu0 %vm5714_vm2, %v5713_v0 }
  0xc4   :  { %4872 = vmatprep.mubr.msk.f32.mxu1 %vm5714_vm2, %v5713_v0 }
  0xc6   :  { %4681 = vmatmul.mubr.msk.f32.gmra.mrb[96].mxu0 %vm159_vm1, %v74_v52 }
  0xc7   :  { %4873 = vmatmul.mubr.msk.f32.gmra.mrb[98].mxu1 %vm159_vm1, %v138_v53  ;;  %4683 = vmatprep.mubr.msk.f32.mxu0 %vm5714_vm2, %v5713_v0 }
  0xc8   :  { %4875 = vmatprep.mubr.msk.f32.mxu1 %vm5714_vm2, %v5713_v0 }
  0xca   :  { %4684 = vmatmul.mubr.msk.f32.gmra.mrb[98].mxu0 %vm159_vm1, %v75_v54 }
  0xcb   :  { %4876 = vmatmul.mubr.msk.f32.gmra.mrb[100].mxu1 %vm159_vm1, %v139_v55  ;;  %4686 = vmatprep.mubr.msk.f32.mxu0 %vm5714_vm2, %v5713_v0 }
  0xcc   :  { %4878 = vmatprep.mubr.msk.f32.mxu1 %vm5714_vm2, %v5713_v0 }
  0xce   :  { %4687 = vmatmul.mubr.msk.f32.gmra.mrb[100].mxu0 %vm159_vm1, %v76_v56  ;;  %v87_v56 = vld [vmem:[%s8449_s0 + $0x1e8] sm:$0xff] }
  0xcf   :  { %4879 = vmatmul.mubr.msk.f32.gmra.mrb[102].mxu1 %vm159_vm1, %v140_v57  ;;  %4689 = vmatprep.mubr.msk.f32.mxu0 %vm5714_vm2, %v5713_v0 }
  0xd0   :  { %4881 = vmatprep.mubr.msk.f32.mxu1 %vm5714_vm2, %v5713_v0 }
  0xd2   :  { %4690 = vmatmul.mubr.msk.f32.gmra.mrb[102].mxu0 %vm159_vm1, %v77_v58 }
  0xd3   :  { %4882 = vmatmul.mubr.msk.f32.gmra.mrb[104].mxu1 %vm159_vm1, %v141_v59  ;;  %4692 = vmatprep.mubr.msk.f32.mxu0 %vm5714_vm2, %v5713_v0 }
  0xd4   :  { %4884 = vmatprep.mubr.msk.f32.mxu1 %vm5714_vm2, %v5713_v0 }
  0xd6   :  { %v6439_v62 = vpop.f32.mrb[0].mxu1  ;;  %4693 = vmatmul.mubr.msk.f32.gmra.mrb[104].mxu0 %vm159_vm1, %v78_v60 }
  0xd7   :  { %v4727_v63 = vpop.f32.mrb[1].mxu1  ;;  %4885 = vmatmul.mubr.msk.f32.gmra.mrb[106].mxu1 %vm159_vm1, %v142_v61  ;;  %4695 = vmatprep.mubr.msk.f32.mxu0 %vm5714_vm2, %v5713_v0 }
  0xd8   :  { %4887 = vmatprep.mubr.msk.f32.mxu1 %vm5714_vm2, %v5713_v0 }
  0xd9   :  { %v6453_v3 = vpop.f32.mrb[0].mxu0 }
  0xda   :  { %v6461_v6 = vpop.f32.mrb[2].mxu1  ;;  %v4538_v7 = vpop.f32.mrb[1].mxu0  ;;  %4696 = vmatmul.mubr.msk.f32.gmra.mrb[106].mxu0 %vm159_vm1, %v79_v1  ;;  %v606_v47 = vadd.f32 %v6560_v43, %v6453_v3  ;;  %v88_v1 = vld [vmem:[%s8449_s0 + $0x1f0] sm:$0xff] }
  0xdb   :  { %v4730_v9 = vpop.f32.mrb[3].mxu1  ;;  %4888 = vmatmul.mubr.msk.f32.gmra.mrb[108].mxu1 %vm159_vm1, %v143_v2  ;;  %4698 = vmatprep.mubr.msk.f32.mxu0 %vm5714_vm2, %v5713_v0 }
  0xdc   :  { %4890 = vmatprep.mubr.msk.f32.mxu1 %vm5714_vm2, %v5713_v0  ;;  %v1229_v53 = vmax.f32 %v606_v47, 0.0 }
  0xdd   :  { %v6475_v12 = vpop.f32.mrb[2].mxu0 }
  0xde   :  { %v6477_v13 = vpop.f32.mrb[4].mxu1  ;;  %v4541_v14 = vpop.f32.mrb[3].mxu0  ;;  %4699 = vmatmul.mubr.msk.f32.gmra.mrb[108].mxu0 %vm159_vm1, %v80_v10  ;;  %v611_v55 = vadd.f32 %v6560_v43, %v6475_v12 }
  0xdf   :  { %v4733_v15 = vpop.f32.mrb[5].mxu1  ;;  %4891 = vmatmul.mubr.msk.f32.gmra.mrb[110].mxu1 %vm159_vm1, %v144_v11  ;;  %4701 = vmatprep.mubr.msk.f32.mxu0 %vm5714_vm2, %v5713_v0 }
  0xe0   :  { %4893 = vmatprep.mubr.msk.f32.mxu1 %vm5714_vm2, %v5713_v0  ;;  %v1230_v60 = vmax.f32 %v611_v55, 0.0 }
  0xe1   :  { %v6491_v18 = vpop.f32.mrb[4].mxu0 }
  0xe2   :  { %v6493_v19 = vpop.f32.mrb[6].mxu1  ;;  %v4544_v20 = vpop.f32.mrb[5].mxu0  ;;  %4702 = vmatmul.mubr.msk.f32.gmra.mrb[110].mxu0 %vm159_vm1, %v81_v16  ;;  %v616_v63 = vadd.f32 %v6560_v43, %v6491_v18 }
  0xe3   :  { %v4736_v21 = vpop.f32.mrb[7].mxu1  ;;  %4894 = vmatmul.mubr.msk.f32.gmra.mrb[112].mxu1 %vm159_vm1, %v145_v17  ;;  %4704 = vmatprep.mubr.msk.f32.mxu0 %vm5714_vm2, %v5713_v0 }
  0xe4   :  { %4896 = vmatprep.mubr.msk.f32.mxu1 %vm5714_vm2, %v5713_v0  ;;  %v1231_v5 = vmax.f32 %v616_v63, 0.0 }
  0xe5   :  { %v6507_v24 = vpop.f32.mrb[6].mxu0 }
  0xe6   :  { %v6509_v25 = vpop.f32.mrb[8].mxu1  ;;  %v4547_v26 = vpop.f32.mrb[7].mxu0  ;;  %4705 = vmatmul.mubr.msk.f32.gmra.mrb[112].mxu0 %vm159_vm1, %v82_v22  ;;  %v621_v8 = vadd.f32 %v6560_v43, %v6507_v24 }
  0xe7   :  { %v4739_v27 = vpop.f32.mrb[9].mxu1  ;;  %4897 = vmatmul.mubr.msk.f32.gmra.mrb[114].mxu1 %vm159_vm1, %v146_v23  ;;  %4707 = vmatprep.mubr.msk.f32.mxu0 %vm5714_vm2, %v5713_v0 }
  0xe8   :  { %4899 = vmatprep.mubr.msk.f32.mxu1 %vm5714_vm2, %v5713_v0  ;;  %v1232_v12 = vmax.f32 %v621_v8, 0.0 }
  0xe9   :  { %v6523_v30 = vpop.f32.mrb[8].mxu0 }
  0xea   :  { %v6525_v31 = vpop.f32.mrb[10].mxu1  ;;  %v4550_v32 = vpop.f32.mrb[9].mxu0  ;;  %4708 = vmatmul.mubr.msk.f32.gmra.mrb[114].mxu0 %vm159_vm1, %v83_v28  ;;  %v626_v15 = vadd.f32 %v6560_v43, %v6523_v30 }
  0xeb   :  { %v4742_v33 = vpop.f32.mrb[11].mxu1  ;;  %4900 = vmatmul.mubr.msk.f32.gmra.mrb[116].mxu1 %vm159_vm1, %v147_v29  ;;  %4710 = vmatprep.mubr.msk.f32.mxu0 %vm5714_vm2, %v5713_v0 }
  0xec   :  { %4902 = vmatprep.mubr.msk.f32.mxu1 %vm5714_vm2, %v5713_v0  ;;  %v1233_v20 = vmax.f32 %v626_v15, 0.0 }
  0xed   :  { %v6539_v36 = vpop.f32.mrb[10].mxu0 }
  0xee   :  { %v6541_v37 = vpop.f32.mrb[12].mxu1  ;;  %v4553_v38 = vpop.f32.mrb[11].mxu0  ;;  %4711 = vmatmul.mubr.msk.f32.gmra.mrb[116].mxu0 %vm159_vm1, %v84_v34  ;;  %v631_v22 = vadd.f32 %v6560_v43, %v6539_v36 }
  0xef   :  { %v4745_v39 = vpop.f32.mrb[13].mxu1  ;;  %4903 = vmatmul.mubr.msk.f32.gmra.mrb[118].mxu1 %vm159_vm1, %v148_v35  ;;  %4713 = vmatprep.mubr.msk.f32.mxu0 %vm5714_vm2, %v5713_v0 }
  0xf0   :  { %4905 = vmatprep.mubr.msk.f32.mxu1 %vm5714_vm2, %v5713_v0  ;;  %v1234_v27 = vmax.f32 %v631_v22, 0.0 }
  0xf1   :  { %v6555_v42 = vpop.f32.mrb[12].mxu0 }
  0xf2   :  { %v6562_v44 = vpop.f32.mrb[14].mxu1  ;;  %v4556_v45 = vpop.f32.mrb[13].mxu0  ;;  %4714 = vmatmul.mubr.msk.f32.gmra.mrb[118].mxu0 %vm159_vm1, %v85_v40  ;;  %v636_v29 = vadd.f32 %v6560_v43, %v6555_v42 }
  0xf3   :  { %v4748_v46 = vpop.f32.mrb[15].mxu1  ;;  %4906 = vmatmul.mubr.msk.f32.gmra.mrb[120].mxu1 %vm159_vm1, %v149_v41  ;;  %4716 = vmatprep.mubr.msk.f32.mxu0 %vm5714_vm2, %v5713_v0 }
  0xf4   :  { %4908 = vmatprep.mubr.msk.f32.mxu1 %vm5714_vm2, %v5713_v0  ;;  %v1235_v34 = vmax.f32 %v636_v29, 0.0 }
  0xf5   :  { %v6578_v50 = vpop.f32.mrb[14].mxu0 }
  0xf6   :  { %v6580_v51 = vpop.f32.mrb[16].mxu1  ;;  %v4559_v52 = vpop.f32.mrb[15].mxu0  ;;  %4717 = vmatmul.mubr.msk.f32.gmra.mrb[120].mxu0 %vm159_vm1, %v86_v48  ;;  %v641_v36 = vadd.f32 %v6560_v43, %v6578_v50 }
  0xf7   :  { %v4751_v54 = vpop.f32.mrb[17].mxu1  ;;  %4909 = vmatmul.mubr.msk.f32.gmra.mrb[122].mxu1 %vm159_vm1, %v150_v49  ;;  %4719 = vmatprep.mubr.msk.f32.mxu0 %vm5714_vm2, %v5713_v0 }
  0xf8   :  { %4927 = vmatprep.mubr.msk.f32.mxu1 %vm5714_vm2, %v5713_v0  ;;  %v1236_v41 = vmax.f32 %v641_v36, 0.0 }
  0xf9   :  { %v645_v57 = vpop.f32.mrb[16].mxu0 }
  0xfa   :  { %v6593_v58 = vpop.f32.mrb[18].mxu1  ;;  %v4562_v59 = vpop.f32.mrb[17].mxu0  ;;  %4720 = vmatmul.mubr.msk.f32.gmra.mrb[122].mxu0 %vm159_vm1, %v87_v56  ;;  %v646_v45 = vadd.f32 %v6560_v43, %v645_v57 }
  0xfb   :  { %v4754_v61 = vpop.f32.mrb[19].mxu1  ;;  %4928 = vmatmul.mubr.msk.f32.vlgmr.msra.gmra.mrb[124].mxu1 %vm1369_vm3, %v1229_v53  ;;  %4722 = vmatprep.mubr.msk.f32.mxu0 %vm5714_vm2, %v5713_v0 }
  0xfc   :  { %4930 = vmatprep.mubr.msk.f32.mxu1 %vm5714_vm2, %v5713_v0  ;;  %v1237_v49 = vmax.f32 %v646_v45, 0.0 }
  0xfd   :  { %v650_v2 = vpop.f32.mrb[18].mxu0 }
  0xfe   :  { %v6606_v3 = vpop.f32.mrb[20].mxu1  ;;  %v4565_v4 = vpop.f32.mrb[19].mxu0  ;;  %4723 = vmatmul.mubr.msk.f32.gmra.mrb[124].mxu0 %vm159_vm1, %v88_v1  ;;  %v651_v52 = vadd.f32 %v6560_v43, %v650_v2 }
  0xff   :  { %v4757_v7 = vpop.f32.mrb[21].mxu1  ;;  %4931 = vmatmul.mubr.msk.f32.gmra.mrb[126].mxu1 %vm1369_vm3, %v1230_v60  ;;  %5310 = vmatprep.mubr.msk.f32.mxu0 %vm5714_vm2, %v5713_v0 }
 0x100   :  { %4933 = vmatprep.mubr.msk.f32.mxu1 %vm5714_vm2, %v5713_v0  ;;  %v1238_v56 = vmax.f32 %v651_v52, 0.0 }
 0x101   :  { %v655_v9 = vpop.f32.mrb[20].mxu0 }
 0x102   :  { %v6616_v10 = vpop.f32.mrb[22].mxu1  ;;  %v4568_v11 = vpop.f32.mrb[21].mxu0  ;;  %v656_v59 = vadd.f32 %v6560_v43, %v655_v9 }
 0x103   :  { %v4760_v14 = vpop.f32.mrb[23].mxu1  ;;  %4934 = vmatmul.mubr.msk.f32.gmra.mrb[128].mxu1 %vm1369_vm3, %v1231_v5 }
 0x104   :  { %4936 = vmatprep.mubr.msk.f32.mxu1 %vm5714_vm2, %v5713_v0  ;;  %v1239_v1 = vmax.f32 %v656_v59, 0.0 }
 0x105   :  { %v660_v16 = vpop.f32.mrb[22].mxu0 }
 0x106   :  { %v6623_v17 = vpop.f32.mrb[24].mxu1  ;;  %v4571_v18 = vpop.f32.mrb[23].mxu0  ;;  %v661_v4 = vadd.f32 %v6560_v43, %v660_v16 }
 0x107   :  { %v4763_v21 = vpop.f32.mrb[25].mxu1  ;;  %4937 = vmatmul.mubr.msk.f32.gmra.mrb[130].mxu1 %vm1369_vm3, %v1232_v12 }
 0x108   :  { %4939 = vmatprep.mubr.msk.f32.mxu1 %vm5714_vm2, %v5713_v0  ;;  %v1240_v9 = vmax.f32 %v661_v4, 0.0 }
 0x109   :  { %v665_v23 = vpop.f32.mrb[24].mxu0 }
 0x10a   :  { %v6630_v24 = vpop.f32.mrb[26].mxu1  ;;  %v4574_v26 = vpop.f32.mrb[25].mxu0  ;;  %v666_v12 = vadd.f32 %v6560_v43, %v665_v23 }
 0x10b   :  { %v4766_v28 = vpop.f32.mrb[27].mxu1  ;;  %4940 = vmatmul.mubr.msk.f32.gmra.mrb[132].mxu1 %vm1369_vm3, %v1233_v20 }
 0x10c   :  { %4942 = vmatprep.mubr.msk.f32.mxu1 %vm5714_vm2, %v5713_v0  ;;  %v1241_v18 = vmax.f32 %v666_v12, 0.0 }
 0x10d   :  { %v670_v30 = vpop.f32.mrb[26].mxu0 }
 0x10e   :  { %v6637_v32 = vpop.f32.mrb[28].mxu1  ;;  %v4577_v33 = vpop.f32.mrb[27].mxu0  ;;  %v671_v21 = vadd.f32 %v6560_v43, %v670_v30 }
 0x10f   :  { %v4769_v35 = vpop.f32.mrb[29].mxu1  ;;  %4943 = vmatmul.mubr.msk.f32.gmra.mrb[134].mxu1 %vm1369_vm3, %v1234_v27 }
 0x110   :  { %4945 = vmatprep.mubr.msk.f32.mxu1 %vm5714_vm2, %v5713_v0  ;;  %v1242_v27 = vmax.f32 %v671_v21, 0.0 }
 0x111   :  { %v675_v38 = vpop.f32.mrb[28].mxu0 }
 0x112   :  { %v6644_v39 = vpop.f32.mrb[30].mxu1  ;;  %v4580_v40 = vpop.f32.mrb[29].mxu0  ;;  %v676_v29 = vadd.f32 %v6560_v43, %v675_v38 }
 0x113   :  { %v4772_v42 = vpop.f32.mrb[31].mxu1  ;;  %4946 = vmatmul.mubr.msk.f32.gmra.mrb[136].mxu1 %vm1369_vm3, %v1235_v34 }
 0x114   :  { %4948 = vmatprep.mubr.msk.f32.mxu1 %vm5714_vm2, %v5713_v0  ;;  %v1243_v35 = vmax.f32 %v676_v29, 0.0 }
 0x115   :  { %v680_v46 = vpop.f32.mrb[30].mxu0 }
 0x116   :  { %v6650_v47 = vpop.f32.mrb[32].mxu1  ;;  %v4583_v48 = vpop.f32.mrb[31].mxu0  ;;  %v681_v40 = vadd.f32 %v6560_v43, %v680_v46 }
 0x117   :  { %v4775_v50 = vpop.f32.mrb[33].mxu1  ;;  %4949 = vmatmul.mubr.msk.f32.gmra.mrb[138].mxu1 %vm1369_vm3, %v1236_v41 }
 0x118   :  { %4951 = vmatprep.mubr.msk.f32.mxu1 %vm5714_vm2, %v5713_v0  ;;  %v1244_v45 = vmax.f32 %v681_v40, 0.0 }
 0x119   :  { %v685_v53 = vpop.f32.mrb[32].mxu0 }
 0x11a   :  { %v6656_v54 = vpop.f32.mrb[34].mxu1  ;;  %v4586_v55 = vpop.f32.mrb[33].mxu0 }
 0x11b   :  { %v4778_v57 = vpop.f32.mrb[35].mxu1  ;;  %4952 = vmatmul.mubr.msk.f32.gmra.mrb[140].mxu1 %vm1369_vm3, %v1237_v49  ;;  %v686_v49 = vadd.f32 %v6560_v43, %v685_v53 }
 0x11c   :  { %4954 = vmatprep.mubr.msk.f32.mxu1 %vm5714_vm2, %v5713_v0 }
 0x11d   :  { %v690_v60 = vpop.f32.mrb[34].mxu0  ;;  %v1245_v55 = vmax.f32 %v686_v49, 0.0 }
 0x11e   :  { %v6662_v61 = vpop.f32.mrb[36].mxu1  ;;  %v4589_v63 = vpop.f32.mrb[35].mxu0  ;;  %v691_v57 = vadd.f32 %v6560_v43, %v690_v60 }
 0x11f   :  { %v4781_v2 = vpop.f32.mrb[37].mxu1  ;;  %4955 = vmatmul.mubr.msk.f32.gmra.mrb[142].mxu1 %vm1369_vm3, %v1238_v56 }
 0x120   :  { %4957 = vmatprep.mubr.msk.f32.mxu1 %vm5714_vm2, %v5713_v0 }
 0x121   :  { %v695_v5 = vpop.f32.mrb[36].mxu0 }
 0x122   :  { %v6668_v7 = vpop.f32.mrb[38].mxu1  ;;  %v4592_v8 = vpop.f32.mrb[37].mxu0  ;;  %v696_v4 = vadd.f32 %v6560_v43, %v695_v5 }
 0x123   :  { %v4784_v11 = vpop.f32.mrb[39].mxu1  ;;  %4958 = vmatmul.mubr.msk.f32.gmra.mrb[144].mxu1 %vm1369_vm3, %v1239_v1  ;;  %v1246_v1 = vmax.f32 %v691_v57, 0.0 }
 0x124   :  { %4960 = vmatprep.mubr.msk.f32.mxu1 %vm5714_vm2, %v5713_v0  ;;  %v1247_v11 = vmax.f32 %v696_v4, 0.0 }
 0x125   :  { %v700_v14 = vpop.f32.mrb[38].mxu0 }
 0x126   :  { %v6674_v15 = vpop.f32.mrb[40].mxu1  ;;  %v4595_v16 = vpop.f32.mrb[39].mxu0 }
 0x127   :  { %v4787_v20 = vpop.f32.mrb[41].mxu1  ;;  %4961 = vmatmul.mubr.msk.f32.gmra.mrb[146].mxu1 %vm1369_vm3, %v1240_v9  ;;  %v701_v16 = vadd.f32 %v6560_v43, %v700_v14 }
 0x128   :  { %4963 = vmatprep.mubr.msk.f32.mxu1 %vm5714_vm2, %v5713_v0 }
 0x129   :  { %v705_v22 = vpop.f32.mrb[40].mxu0  ;;  %v1248_v21 = vmax.f32 %v701_v16, 0.0 }
 0x12a   :  { %v6680_v26 = vpop.f32.mrb[42].mxu1  ;;  %v4598_v23 = vpop.f32.mrb[41].mxu0 }
 0x12b   :  { %v4790_v28 = vpop.f32.mrb[43].mxu1  ;;  %4964 = vmatmul.mubr.msk.f32.gmra.mrb[148].mxu1 %vm1369_vm3, %v1241_v18 }
 0x12c   :  { %4966 = vmatprep.mubr.msk.f32.mxu1 %vm5714_vm2, %v5713_v0 }
 0x12d   :  { %v710_v33 = vpop.f32.mrb[42].mxu0 }
 0x12e   :  { %v6686_v34 = vpop.f32.mrb[44].mxu1  ;;  %v4601_v30 = vpop.f32.mrb[43].mxu0 }
 0x12f   :  { %v4793_v36 = vpop.f32.mrb[45].mxu1  ;;  %4967 = vmatmul.mubr.msk.f32.gmra.mrb[150].mxu1 %vm1369_vm3, %v1242_v27  ;;  %v706_v27 = vadd.f32 %v6560_v43, %v705_v22 }
 0x130   :  { %4969 = vmatprep.mubr.msk.f32.mxu1 %vm5714_vm2, %v5713_v0  ;;  %v711_v36 = vadd.f32 %v6560_v43, %v710_v33 }
 0x131   :  { %v715_v41 = vpop.f32.mrb[44].mxu0  ;;  %v1249_v30 = vmax.f32 %v706_v27, 0.0 }
 0x132   :  { %v6692_v42 = vpop.f32.mrb[46].mxu1  ;;  %v4604_v38 = vpop.f32.mrb[45].mxu0  ;;  %v716_v49 = vadd.f32 %v6560_v43, %v715_v41 }
 0x133   :  { %v4796_v48 = vpop.f32.mrb[47].mxu1  ;;  %4970 = vmatmul.mubr.msk.f32.gmra.mrb[152].mxu1 %vm1369_vm3, %v1243_v35 }
 0x134   :  { %4972 = vmatprep.mubr.msk.f32.mxu1 %vm5714_vm2, %v5713_v0 }
 0x135   :  { %v720_v50 = vpop.f32.mrb[46].mxu0 }
 0x136   :  { %v6698_v52 = vpop.f32.mrb[48].mxu1  ;;  %v4607_v46 = vpop.f32.mrb[47].mxu0 }
 0x137   :  { %v4799_v56 = vpop.f32.mrb[49].mxu1  ;;  %4973 = vmatmul.mubr.msk.f32.gmra.mrb[154].mxu1 %vm1369_vm3, %v1244_v45  ;;  %v1250_v45 = vmax.f32 %v711_v36, 0.0 }
 0x138   :  { %4975 = vmatprep.mubr.msk.f32.mxu1 %vm5714_vm2, %v5713_v0  ;;  %v1251_v56 = vmax.f32 %v716_v49, 0.0 }
 0x139   :  { %v725_v59 = vpop.f32.mrb[48].mxu0 }
 0x13a   :  { %v6704_v63 = vpop.f32.mrb[50].mxu1  ;;  %v4610_v53 = vpop.f32.mrb[49].mxu0 }
 0x13b   :  { %v4802_v2 = vpop.f32.mrb[51].mxu1  ;;  %4976 = vmatmul.mubr.msk.f32.gmra.mrb[156].mxu1 %vm1369_vm3, %v1245_v55  ;;  %v721_v53 = vadd.f32 %v6560_v43, %v720_v50 }
 0x13c   :  { %4978 = vmatprep.mubr.msk.f32.mxu1 %vm5714_vm2, %v5713_v0 }
 0x13d   :  { %v730_v8 = vpop.f32.mrb[50].mxu0  ;;  %v1252_v4 = vmax.f32 %v721_v53, 0.0 }
 0x13e   :  { %v6710_v9 = vpop.f32.mrb[52].mxu1  ;;  %v4613_v60 = vpop.f32.mrb[51].mxu0 }
 0x13f   :  { %v4805_v12 = vpop.f32.mrb[53].mxu1  ;;  %4979 = vmatmul.mubr.msk.f32.gmra.mrb[158].mxu1 %vm1369_vm3, %v1246_v1 }
 0x140   :  { %4981 = vmatprep.mubr.msk.f32.mxu1 %vm5714_vm2, %v5713_v0 }
 0x141   :  { %v735_v18 = vpop.f32.mrb[52].mxu0 }
 0x142   :  { %v6716_v20 = vpop.f32.mrb[54].mxu1  ;;  %v4616_v5 = vpop.f32.mrb[53].mxu0  ;;  %v736_v36 = vadd.f32 %v6560_v43, %v735_v18 }
 0x143   :  { %v4808_v23 = vpop.f32.mrb[55].mxu1  ;;  %4982 = vmatmul.mubr.msk.f32.gmra.mrb[160].mxu1 %vm1369_vm3, %v1247_v11  ;;  %v726_v11 = vadd.f32 %v6560_v43, %v725_v59 }
 0x144   :  { %4984 = vmatprep.mubr.msk.f32.mxu1 %vm5714_vm2, %v5713_v0  ;;  %v731_v23 = vadd.f32 %v6560_v43, %v730_v8 }
 0x145   :  { %v740_v28 = vpop.f32.mrb[54].mxu0  ;;  %v1253_v5 = vmax.f32 %v726_v11, 0.0 }
 0x146   :  { %v6722_v29 = vpop.f32.mrb[56].mxu1  ;;  %v4619_v14 = vpop.f32.mrb[55].mxu0 }
 0x147   :  { %v4811_v35 = vpop.f32.mrb[57].mxu1  ;;  %4985 = vmatmul.mubr.msk.f32.gmra.mrb[162].mxu1 %vm1369_vm3, %v1248_v21 }
 0x148   :  { %4987 = vmatprep.mubr.msk.f32.mxu1 %vm5714_vm2, %v5713_v0 }
 0x149   :  { %v745_v40 = vpop.f32.mrb[56].mxu0 }
 0x14a   :  { %v6728_v38 = vpop.f32.mrb[58].mxu1  ;;  %v4622_v22 = vpop.f32.mrb[57].mxu0 }
 0x14b   :  { %v4814_v48 = vpop.f32.mrb[59].mxu1  ;;  %4988 = vmatmul.mubr.msk.f32.gmra.mrb[164].mxu1 %vm1369_vm3, %v1249_v30  ;;  %v1254_v30 = vmax.f32 %v731_v23, 0.0 }
 0x14c   :  { %4990 = vmatprep.mubr.msk.f32.mxu1 %vm5714_vm2, %v5713_v0  ;;  %v1255_v48 = vmax.f32 %v736_v36, 0.0 }
 0x14d   :  { %v750_v46 = vpop.f32.mrb[58].mxu0 }
 0x14e   :  { %v6734_v55 = vpop.f32.mrb[60].mxu1  ;;  %v4625_v33 = vpop.f32.mrb[59].mxu0 }
 0x14f   :  { %v4817_v57 = vpop.f32.mrb[61].mxu1  ;;  %4991 = vmatmul.mubr.msk.f32.gmra.mrb[166].mxu1 %vm1369_vm3, %v1250_v45  ;;  %v741_v33 = vadd.f32 %v6560_v43, %v740_v28 }
 0x150   :  { %4993 = vmatprep.mubr.msk.f32.mxu1 %vm5714_vm2, %v5713_v0 }
 0x151   :  { %v755_v1 = vpop.f32.mrb[60].mxu0  ;;  %v1256_v53 = vmax.f32 %v741_v33, 0.0 }
 0x152   :  { %v6740_v2 = vpop.f32.mrb[62].mxu1  ;;  %v4628_v41 = vpop.f32.mrb[61].mxu0  ;;  %v756_v36 = vadd.f32 %v6560_v43, %v755_v1 }
 0x153   :  { %v4820_v60 = vpop.f32.mrb[63].mxu1  ;;  %4994 = vmatmul.mubr.msk.f32.gmra.mrb[168].mxu1 %vm1369_vm3, %v1251_v56 }
 0x154   :  { %4996 = vmatprep.mubr.msk.f32.mxu1 %vm5714_vm2, %v5713_v0 }
 0x155   :  { %v760_v12 = vpop.f32.mrb[62].mxu0 }
 0x156   :  { %v6746_v16 = vpop.f32.mrb[64].mxu1  ;;  %v4631_v50 = vpop.f32.mrb[63].mxu0 }
 0x157   :  { %v4823_v21 = vpop.f32.mrb[65].mxu1  ;;  %4997 = vmatmul.mubr.msk.f32.gmra.mrb[170].mxu1 %vm1369_vm3, %v1252_v4  ;;  %v746_v4 = vadd.f32 %v6560_v43, %v745_v40 }
 0x158   :  { %4999 = vmatprep.mubr.msk.f32.mxu1 %vm5714_vm2, %v5713_v0  ;;  %v751_v21 = vadd.f32 %v6560_v43, %v750_v46 }
 0x159   :  { %v765_v27 = vpop.f32.mrb[64].mxu0  ;;  %v1257_v50 = vmax.f32 %v746_v4, 0.0 }
 0x15a   :  { %v6752_v14 = vpop.f32.mrb[66].mxu1  ;;  %v4634_v59 = vpop.f32.mrb[65].mxu0 }
 0x15b   :  { %v4826_v35 = vpop.f32.mrb[67].mxu1  ;;  %5000 = vmatmul.mubr.msk.f32.gmra.mrb[172].mxu1 %vm1369_vm3, %v1253_v5 }
 0x15c   :  { %5002 = vmatprep.mubr.msk.f32.mxu1 %vm5714_vm2, %v5713_v0 }
 0x15d   :  { %v770_v22 = vpop.f32.mrb[66].mxu0 }
 0x15e   :  { %v6758_v45 = vpop.f32.mrb[68].mxu1  ;;  %v4637_v8 = vpop.f32.mrb[67].mxu0 }
 0x15f   :  { %v4829_v49 = vpop.f32.mrb[69].mxu1  ;;  %5003 = vmatmul.mubr.msk.f32.gmra.mrb[174].mxu1 %vm1369_vm3, %v1254_v30  ;;  %v1258_v30 = vmax.f32 %v751_v21, 0.0 }
 0x160   :  { %5005 = vmatprep.mubr.msk.f32.mxu1 %vm5714_vm2, %v5713_v0  ;;  %v1259_v49 = vmax.f32 %v756_v36, 0.0 }
 0x161   :  { %v775_v56 = vpop.f32.mrb[68].mxu0 }
 0x162   :  { %v6764_v57 = vpop.f32.mrb[70].mxu1  ;;  %v4640_v18 = vpop.f32.mrb[69].mxu0 }
 0x163   :  { %v4832_v41 = vpop.f32.mrb[71].mxu1  ;;  %5006 = vmatmul.mubr.msk.f32.gmra.mrb[176].mxu1 %vm1369_vm3, %v1255_v48  ;;  %v761_v18 = vadd.f32 %v6560_v43, %v760_v12 }
 0x164   :  { %5008 = vmatprep.mubr.msk.f32.mxu1 %vm5714_vm2, %v5713_v0 }
 0x165   :  { %v780_v60 = vpop.f32.mrb[70].mxu0  ;;  %v1260_v4 = vmax.f32 %v761_v18, 0.0  ;;  %v776_v18 = vadd.f32 %v6560_v43, %v775_v56 }
 0x166   :  { %v6770_v11 = vpop.f32.mrb[72].mxu1  ;;  %v4643_v28 = vpop.f32.mrb[71].mxu0 }
 0x167   :  { %v4835_v5 = vpop.f32.mrb[73].mxu1  ;;  %5009 = vmatmul.mubr.msk.f32.gmra.mrb[178].mxu1 %vm1369_vm3, %v1256_v53 }
 0x168   :  { %5011 = vmatprep.mubr.msk.f32.mxu1 %vm5714_vm2, %v5713_v0 }
 0x169   :  { %v785_v23 = vpop.f32.mrb[72].mxu0 }
 0x16a   :  { %v6776_v59 = vpop.f32.mrb[74].mxu1  ;;  %v4646_v40 = vpop.f32.mrb[73].mxu0 }
 0x16b   :  { %v4838_v35 = vpop.f32.mrb[75].mxu1  ;;  %5012 = vmatmul.mubr.msk.f32.gmra.mrb[180].mxu1 %vm1369_vm3, %v1257_v50  ;;  %v766_v50 = vadd.f32 %v6560_v43, %v765_v27 }
 0x16c   :  { %5014 = vmatprep.mubr.msk.f32.mxu1 %vm5714_vm2, %v5713_v0  ;;  %v771_v35 = vadd.f32 %v6560_v43, %v770_v22 }
 0x16d   :  { %v790_v8 = vpop.f32.mrb[74].mxu0  ;;  %v1261_v40 = vmax.f32 %v766_v50, 0.0 }
 0x16e   :  { %v6782_v48 = vpop.f32.mrb[76].mxu1  ;;  %v4649_v46 = vpop.f32.mrb[75].mxu0 }
 0x16f   :  { %v4841_v33 = vpop.f32.mrb[77].mxu1  ;;  %5015 = vmatmul.mubr.msk.f32.gmra.mrb[182].mxu1 %vm1369_vm3, %v1258_v30 }
 0x170   :  { %5017 = vmatprep.mubr.msk.f32.mxu1 %vm5714_vm2, %v5713_v0 }
 0x171   :  { %v795_v53 = vpop.f32.mrb[76].mxu0 }
 0x172   :  { %v6788_v41 = vpop.f32.mrb[78].mxu1  ;;  %v4652_v1 = vpop.f32.mrb[77].mxu0 }
 0x173   :  { %v4844_v28 = vpop.f32.mrb[79].mxu1  ;;  %5018 = vmatmul.mubr.msk.f32.gmra.mrb[184].mxu1 %vm1369_vm3, %v1259_v49  ;;  %v1262_v49 = vmax.f32 %v771_v35, 0.0 }
 0x174   :  { %5020 = vmatprep.mubr.msk.f32.mxu1 %vm5714_vm2, %v5713_v0  ;;  %v1263_v28 = vmax.f32 %v776_v18, 0.0 }
 0x175   :  { %v800_v5 = vpop.f32.mrb[78].mxu0 }
 0x176   :  { %v6794_v21 = vpop.f32.mrb[80].mxu1  ;;  %v4655_v12 = vpop.f32.mrb[79].mxu0 }
 0x177   :  { %v4847_v30 = vpop.f32.mrb[81].mxu1  ;;  %5021 = vmatmul.mubr.msk.f32.gmra.mrb[186].mxu1 %vm1369_vm3, %v1260_v4  ;;  %v781_v12 = vadd.f32 %v6560_v43, %v780_v60 }
 0x178   :  { %5023 = vmatprep.mubr.msk.f32.mxu1 %vm5714_vm2, %v5713_v0 }
 0x179   :  { %v805_v36 = vpop.f32.mrb[80].mxu0  ;;  %v1264_v35 = vmax.f32 %v781_v12, 0.0 }
 0x17a   :  { %v6800_v46 = vpop.f32.mrb[82].mxu1  ;;  %v4658_v27 = vpop.f32.mrb[81].mxu0 }
 0x17b   :  { %8456 = vst [vmem:[#allocation2_spill] sm:$0xff] %v6800_v46  ;;  %v4850_v33 = vpop.f32.mrb[83].mxu1  ;;  %5024 = vmatmul.mubr.msk.f32.gmra.mrb[188].mxu1 %vm1369_vm3, %v1261_v40 }
 0x17c   :  { %5026 = vmatprep.mubr.msk.f32.mxu1 %vm5714_vm2, %v5713_v0  ;;  %v786_v33 = vadd.f32 %v6560_v43, %v785_v23 }
 0x17d   :  { %v810_v1 = vpop.f32.mrb[82].mxu0 }
 0x17e   :  { %v6806_v4 = vpop.f32.mrb[84].mxu1  ;;  %v4661_v22 = vpop.f32.mrb[83].mxu0 }
 0x17f   :  { %8457 = vst [vmem:[#allocation3_spill] sm:$0xff] %v6806_v4  ;;  %v4853_v50 = vpop.f32.mrb[85].mxu1  ;;  %5027 = vmatmul.mubr.msk.f32.gmra.mrb[190].mxu1 %vm1369_vm3, %v1262_v49  ;;  %v1265_v22 = vmax.f32 %v786_v33, 0.0 }
 0x180   :  { %5029 = vmatprep.mubr.msk.f32.mxu1 %vm5714_vm2, %v5713_v0 }
 0x181   :  { %v815_v30 = vpop.f32.mrb[84].mxu0 }
 0x182   :  { %v6812_v40 = vpop.f32.mrb[86].mxu1  ;;  %v4664_v56 = vpop.f32.mrb[85].mxu0 }
 0x183   :  { %8458 = vst [vmem:[#allocation4_spill] sm:$0xff] %v6812_v40  ;;  %v4856_v27 = vpop.f32.mrb[87].mxu1  ;;  %5030 = vmatmul.mubr.msk.f32.gmra.mrb[192].mxu1 %vm1369_vm3, %v1263_v28  ;;  %v791_v40 = vadd.f32 %v6560_v43, %v790_v8 }
 0x184   :  { %5032 = vmatprep.mubr.msk.f32.mxu1 %vm5714_vm2, %v5713_v0 }
 0x185   :  { %v820_v18 = vpop.f32.mrb[86].mxu0  ;;  %v1266_v56 = vmax.f32 %v791_v40, 0.0 }
 0x186   :  { %v6818_v49 = vpop.f32.mrb[88].mxu1  ;;  %v4667_v60 = vpop.f32.mrb[87].mxu0 }
 0x187   :  { %8459 = vst [vmem:[#allocation5_spill] sm:$0xff] %v6818_v49  ;;  %v4859_v50 = vpop.f32.mrb[89].mxu1  ;;  %5033 = vmatmul.mubr.msk.f32.gmra.mrb[194].mxu1 %vm1369_vm3, %v1264_v35  ;;  %v796_v49 = vadd.f32 %v6560_v43, %v795_v53 }
 0x188   :  { %5035 = vmatprep.mubr.msk.f32.mxu1 %vm5714_vm2, %v5713_v0 }
 0x189   :  { %v825_v12 = vpop.f32.mrb[88].mxu0  ;;  %v1267_v60 = vmax.f32 %v796_v49, 0.0 }
 0x18a   :  { %v6824_v28 = vpop.f32.mrb[90].mxu1  ;;  %v4670_v23 = vpop.f32.mrb[89].mxu0 }
 0x18b   :  { %8460 = vst [vmem:[#allocation6_spill] sm:$0xff] %v6824_v28  ;;  %v4862_v27 = vpop.f32.mrb[91].mxu1  ;;  %5036 = vmatmul.mubr.msk.f32.gmra.mrb[196].mxu1 %vm1369_vm3, %v1265_v22  ;;  %v801_v28 = vadd.f32 %v6560_v43, %v800_v5 }
 0x18c   :  { %5038 = vmatprep.mubr.msk.f32.mxu1 %vm5714_vm2, %v5713_v0 }
 0x18d   :  { %v830_v33 = vpop.f32.mrb[90].mxu0  ;;  %v1268_v23 = vmax.f32 %v801_v28, 0.0 }
 0x18e   :  { %v6830_v35 = vpop.f32.mrb[92].mxu1  ;;  %v4673_v8 = vpop.f32.mrb[91].mxu0 }
 0x18f   :  { %8461 = vst [vmem:[#allocation7_spill] sm:$0xff] %v6830_v35  ;;  %v4865_v50 = vpop.f32.mrb[93].mxu1  ;;  %5039 = vmatmul.mubr.msk.f32.gmra.mrb[198].mxu1 %vm1369_vm3, %v1266_v56  ;;  %v806_v35 = vadd.f32 %v6560_v43, %v805_v36 }
 0x190   :  { %5041 = vmatprep.mubr.msk.f32.mxu1 %vm5714_vm2, %v5713_v0 }
 0x191   :  { %v835_v40 = vpop.f32.mrb[92].mxu0  ;;  %v1269_v8 = vmax.f32 %v806_v35, 0.0 }
 0x192   :  { %v6836_v22 = vpop.f32.mrb[94].mxu1  ;;  %v4676_v53 = vpop.f32.mrb[93].mxu0 }
 0x193   :  { %8462 = vst [vmem:[#allocation8_spill] sm:$0xff] %v6836_v22  ;;  %v4868_v27 = vpop.f32.mrb[95].mxu1  ;;  %5042 = vmatmul.mubr.msk.f32.gmra.mrb[200].mxu1 %vm1369_vm3, %v1267_v60  ;;  %v811_v22 = vadd.f32 %v6560_v43, %v810_v1 }
 0x194   :  { %5044 = vmatprep.mubr.msk.f32.mxu1 %vm5714_vm2, %v5713_v0 }
 0x195   :  { %v840_v49 = vpop.f32.mrb[94].mxu0  ;;  %v1270_v53 = vmax.f32 %v811_v22, 0.0 }
 0x196   :  { %v6842_v56 = vpop.f32.mrb[96].mxu1  ;;  %v4679_v5 = vpop.f32.mrb[95].mxu0 }
 0x197   :  { %8463 = vst [vmem:[#allocation9_spill] sm:$0xff] %v6842_v56  ;;  %v4871_v50 = vpop.f32.mrb[97].mxu1  ;;  %5045 = vmatmul.mubr.msk.f32.gmra.mrb[202].mxu1 %vm1369_vm3, %v1268_v23  ;;  %v816_v56 = vadd.f32 %v6560_v43, %v815_v30 }
 0x198   :  { %5047 = vmatprep.mubr.msk.f32.mxu1 %vm5714_vm2, %v5713_v0 }
 0x199   :  { %v845_v28 = vpop.f32.mrb[96].mxu0  ;;  %v1271_v5 = vmax.f32 %v816_v56, 0.0 }
 0x19a   :  { %v6848_v60 = vpop.f32.mrb[98].mxu1  ;;  %v4682_v36 = vpop.f32.mrb[97].mxu0 }
 0x19b   :  { %8464 = vst [vmem:[#allocation10_spill] sm:$0xff] %v6848_v60  ;;  %v4874_v27 = vpop.f32.mrb[99].mxu1  ;;  %5048 = vmatmul.mubr.msk.f32.gmra.mrb[204].mxu1 %vm1369_vm3, %v1269_v8  ;;  %v821_v60 = vadd.f32 %v6560_v43, %v820_v18 }
 0x19c   :  { %5050 = vmatprep.mubr.msk.f32.mxu1 %vm5714_vm2, %v5713_v0 }
 0x19d   :  { %v850_v35 = vpop.f32.mrb[98].mxu0  ;;  %v1272_v36 = vmax.f32 %v821_v60, 0.0 }
 0x19e   :  { %v6854_v23 = vpop.f32.mrb[100].mxu1  ;;  %v4685_v1 = vpop.f32.mrb[99].mxu0 }
 0x19f   :  { %8465 = vst [vmem:[#allocation11_spill] sm:$0xff] %v6854_v23  ;;  %v4877_v50 = vpop.f32.mrb[101].mxu1  ;;  %5051 = vmatmul.mubr.msk.f32.gmra.mrb[206].mxu1 %vm1369_vm3, %v1270_v53  ;;  %v826_v23 = vadd.f32 %v6560_v43, %v825_v12 }
 0x1a0   :  { %5053 = vmatprep.mubr.msk.f32.mxu1 %vm5714_vm2, %v5713_v0 }
 0x1a1   :  { %v855_v22 = vpop.f32.mrb[100].mxu0  ;;  %v1273_v1 = vmax.f32 %v826_v23, 0.0 }
 0x1a2   :  { %v6860_v8 = vpop.f32.mrb[102].mxu1  ;;  %v4688_v30 = vpop.f32.mrb[101].mxu0 }
 0x1a3   :  { %8466 = vst [vmem:[#allocation12_spill] sm:$0xff] %v6860_v8  ;;  %v4880_v27 = vpop.f32.mrb[103].mxu1  ;;  %5054 = vmatmul.mubr.msk.f32.gmra.mrb[208].mxu1 %vm1369_vm3, %v1271_v5  ;;  %v831_v8 = vadd.f32 %v6560_v43, %v830_v33 }
 0x1a4   :  { %5056 = vmatprep.mubr.msk.f32.mxu1 %vm5714_vm2, %v5713_v0 }
 0x1a5   :  { %v860_v56 = vpop.f32.mrb[102].mxu0  ;;  %v1274_v30 = vmax.f32 %v831_v8, 0.0 }
 0x1a6   :  { %v6866_v53 = vpop.f32.mrb[104].mxu1  ;;  %v4691_v18 = vpop.f32.mrb[103].mxu0 }
 0x1a7   :  { %8467 = vst [vmem:[#allocation13_spill] sm:$0xff] %v6866_v53  ;;  %v4883_v50 = vpop.f32.mrb[105].mxu1  ;;  %5057 = vmatmul.mubr.msk.f32.gmra.mrb[210].mxu1 %vm1369_vm3, %v1272_v36  ;;  %v836_v53 = vadd.f32 %v6560_v43, %v835_v40 }
 0x1a8   :  { %5059 = vmatprep.mubr.msk.f32.mxu1 %vm5714_vm2, %v5713_v0 }
 0x1a9   :  { %v865_v60 = vpop.f32.mrb[104].mxu0  ;;  %v1275_v18 = vmax.f32 %v836_v53, 0.0 }
 0x1aa   :  { %v6872_v5 = vpop.f32.mrb[106].mxu1  ;;  %v4694_v12 = vpop.f32.mrb[105].mxu0 }
 0x1ab   :  { %8468 = vst [vmem:[#allocation14_spill] sm:$0xff] %v6872_v5  ;;  %v4886_v27 = vpop.f32.mrb[107].mxu1  ;;  %5060 = vmatmul.mubr.msk.f32.gmra.mrb[212].mxu1 %vm1369_vm3, %v1273_v1  ;;  %v841_v5 = vadd.f32 %v6560_v43, %v840_v49 }
 0x1ac   :  { %5062 = vmatprep.mubr.msk.f32.mxu1 %vm5714_vm2, %v5713_v0 }
 0x1ad   :  { %v870_v23 = vpop.f32.mrb[106].mxu0  ;;  %v1276_v12 = vmax.f32 %v841_v5, 0.0 }
 0x1ae   :  { %v6878_v36 = vpop.f32.mrb[108].mxu1  ;;  %v4697_v33 = vpop.f32.mrb[107].mxu0 }
 0x1af   :  { %8469 = vst [vmem:[#allocation15_spill] sm:$0xff] %v6878_v36  ;;  %v4889_v50 = vpop.f32.mrb[109].mxu1  ;;  %5063 = vmatmul.mubr.msk.f32.gmra.mrb[214].mxu1 %vm1369_vm3, %v1274_v30  ;;  %v846_v36 = vadd.f32 %v6560_v43, %v845_v28 }
 0x1b0   :  { %5065 = vmatprep.mubr.msk.f32.mxu1 %vm5714_vm2, %v5713_v0 }
 0x1b1   :  { %v875_v8 = vpop.f32.mrb[108].mxu0  ;;  %v1277_v33 = vmax.f32 %v846_v36, 0.0 }
 0x1b2   :  { %v6884_v1 = vpop.f32.mrb[110].mxu1  ;;  %v4700_v40 = vpop.f32.mrb[109].mxu0 }
 0x1b3   :  { %8470 = vst [vmem:[#allocation16_spill] sm:$0xff] %v6884_v1  ;;  %v4892_v27 = vpop.f32.mrb[111].mxu1  ;;  %5066 = vmatmul.mubr.msk.f32.gmra.mrb[216].mxu1 %vm1369_vm3, %v1275_v18  ;;  %v851_v1 = vadd.f32 %v6560_v43, %v850_v35 }
 0x1b4   :  { %5068 = vmatprep.mubr.msk.f32.mxu1 %vm5714_vm2, %v5713_v0 }
 0x1b5   :  { %v880_v53 = vpop.f32.mrb[110].mxu0  ;;  %v1278_v40 = vmax.f32 %v851_v1, 0.0 }
 0x1b6   :  { %v6890_v30 = vpop.f32.mrb[112].mxu1  ;;  %v4703_v49 = vpop.f32.mrb[111].mxu0 }
 0x1b7   :  { %8471 = vst [vmem:[#allocation17_spill] sm:$0xff] %v6890_v30  ;;  %v4895_v50 = vpop.f32.mrb[113].mxu1  ;;  %5069 = vmatmul.mubr.msk.f32.gmra.mrb[218].mxu1 %vm1369_vm3, %v1276_v12  ;;  %v856_v30 = vadd.f32 %v6560_v43, %v855_v22 }
 0x1b8   :  { %5071 = vmatprep.mubr.msk.f32.mxu1 %vm5714_vm2, %v5713_v0 }
 0x1b9   :  { %v885_v5 = vpop.f32.mrb[112].mxu0  ;;  %v1279_v49 = vmax.f32 %v856_v30, 0.0 }
 0x1ba   :  { %v6896_v18 = vpop.f32.mrb[114].mxu1  ;;  %v4706_v28 = vpop.f32.mrb[113].mxu0 }
 0x1bb   :  { %8472 = vst [vmem:[#allocation18_spill] sm:$0xff] %v6896_v18  ;;  %v4898_v27 = vpop.f32.mrb[115].mxu1  ;;  %5072 = vmatmul.mubr.msk.f32.gmra.mrb[220].mxu1 %vm1369_vm3, %v1277_v33  ;;  %v861_v28 = vadd.f32 %v6560_v43, %v860_v56 }
 0x1bc   :  { %5074 = vmatprep.mubr.msk.f32.mxu1 %vm5714_vm2, %v5713_v0 }
 0x1bd   :  { %v6902_v36 = vpop.f32.mrb[114].mxu0  ;;  %v1280_v27 = vmax.f32 %v861_v28, 0.0 }
 0x1be   :  { %v6904_v12 = vpop.f32.mrb[116].mxu1  ;;  %v4709_v35 = vpop.f32.mrb[115].mxu0 }
 0x1bf   :  { %8473 = vst [vmem:[#allocation19_spill] sm:$0xff] %v6904_v12  ;;  %v4901_v50 = vpop.f32.mrb[117].mxu1  ;;  %5075 = vmatmul.mubr.msk.f32.gmra.mrb[222].mxu1 %vm1369_vm3, %v1278_v40  ;;  %v866_v35 = vadd.f32 %v6560_v43, %v865_v60 }
 0x1c0   :  { %5077 = vmatprep.mubr.msk.f32.mxu1 %vm5714_vm2, %v5713_v0 }
 0x1c1   :  { %v6910_v1 = vpop.f32.mrb[116].mxu0  ;;  %v1281_v50 = vmax.f32 %v866_v35, 0.0 }
 0x1c2   :  { %v6912_v22 = vpop.f32.mrb[118].mxu1  ;;  %v4712_v33 = vpop.f32.mrb[117].mxu0 }
 0x1c3   :  { %8474 = vst [vmem:[#allocation20_spill] sm:$0xff] %v6912_v22  ;;  %v4904_v18 = vpop.f32.mrb[119].mxu1  ;;  %5078 = vmatmul.mubr.msk.f32.gmra.mrb[224].mxu1 %vm1369_vm3, %v1279_v49  ;;  %v871_v33 = vadd.f32 %v6560_v43, %v870_v23 }
 0x1c4   :  { %5080 = vmatprep.mubr.msk.f32.mxu1 %vm5714_vm2, %v5713_v0 }
 0x1c5   :  { %v6918_v30 = vpop.f32.mrb[118].mxu0  ;;  %v1282_v28 = vmax.f32 %v871_v33, 0.0 }
 0x1c6   :  { %v6920_v56 = vpop.f32.mrb[120].mxu1  ;;  %v4715_v40 = vpop.f32.mrb[119].mxu0 }
 0x1c7   :  { %8475 = vst [vmem:[#allocation21_spill] sm:$0xff] %v6920_v56  ;;  %v4907_v12 = vpop.f32.mrb[121].mxu1  ;;  %5081 = vmatmul.mubr.msk.f32.gmra.mrb[226].mxu1 %vm1369_vm3, %v1280_v27  ;;  %v876_v40 = vadd.f32 %v6560_v43, %v875_v8  ;;  %v881_v8 = vadd.f32 %v6560_v43, %v880_v53 }
 0x1c8   :  { %5083 = vmatprep.mubr.msk.f32.mxu1 %vm5714_vm2, %v5713_v0  ;;  %v6935_v12 = vld [vmem:[%s8453_s4] ss:$0 sm:$0xff] }
 0x1c9   :  { %v6926_v18 = vpop.f32.mrb[120].mxu0  ;;  %v1284_v46 = vmax.f32 %v881_v8, 0.0 }
 0x1ca   :  { %v6928_v60 = vpop.f32.mrb[122].mxu1  ;;  %v4718_v49 = vpop.f32.mrb[121].mxu0 }
 0x1cb   :  { %8476 = vst [vmem:[#allocation22_spill] sm:$0xff] %v6928_v60  ;;  %v4910_v22 = vpop.f32.mrb[123].mxu1  ;;  %5084 = vmatmul.mubr.msk.f32.gmra.mrb[228].mxu1 %vm1369_vm3, %v1281_v50  ;;  %v1283_v60 = vmax.f32 %v876_v40, 0.0 }
 0x1cc   :  { %5086 = vmatprep.mubr.msk.f32.mxu1 %vm5714_vm2, %v5713_v0 }
 0x1cd   :  { %v6939_v23 = vpop.f32.mrb[122].mxu0 }
 0x1ce   :  { %v1811_v27 = vpop.f32.mrb[124].mxu1  ;;  %v4721_v35 = vpop.f32.mrb[123].mxu0 }
 0x1cf   :  { %v1812_v33 = vadd.f32 %v6935_v12, %v1811_v27  ;;  %v4929_v22 = vpop.f32.mrb[125].mxu1  ;;  %5087 = vmatmul.mubr.msk.f32.gmra.mrb[230].mxu1 %vm1369_vm3, %v1282_v28  ;;  %v886_v28 = vadd.f32 %v6560_v43, %v885_v5 }
 0x1d0   :  { %5089 = vmatprep.mubr.msk.f32.mxu1 %vm5714_vm2, %v5713_v0 }
 0x1d1   :  { %v2435_v50 = vmax.f32 %v1812_v33, 0.0  ;;  %v6946_v49 = vpop.f32.mrb[124].mxu0  ;;  %v1285_v33 = vmax.f32 %v886_v28, 0.0 }
 0x1d2   :  { %v1816_v56 = vpop.f32.mrb[126].mxu1  ;;  %v4724_v4 = vpop.f32.mrb[125].mxu0 }
 0x1d3   :  { %v1817_v35 = vadd.f32 %v6935_v12, %v1816_v56  ;;  %v4932_v40 = vpop.f32.mrb[127].mxu1  ;;  %5090 = vmatmul.mubr.msk.f32.gmra.mrb[232].mxu1 %vm1369_vm3, %v1283_v60  ;;  %5311 = vmatmul.mubr.msk.f32.vlgmr.msra.gmra.mrb[126].mxu0 %vm2571_vm4, %v2435_v50  ;;  %v891_v56 = vadd.f32 %v6560_v43, %v6902_v36 }
 0x1d4   :  { %5092 = vmatprep.mubr.msk.f32.mxu1 %vm5714_vm2, %v5713_v0  ;;  %5313 = vmatprep.mubr.msk.f32.mxu0 %vm5714_vm2, %v5713_v0 }
 0x1d5   :  { %v2436_v53 = vmax.f32 %v1817_v35, 0.0  ;;  %v1286_v8 = vmax.f32 %v891_v56, 0.0 }
 0x1d6   :  { %v1821_v27 = vpop.f32.mrb[128].mxu1 }
 0x1d7   :  { %v1822_v4 = vadd.f32 %v6935_v12, %v1821_v27  ;;  %v4935_v22 = vpop.f32.mrb[129].mxu1  ;;  %5093 = vmatmul.mubr.msk.f32.gmra.mrb[234].mxu1 %vm1369_vm3, %v1284_v46  ;;  %5314 = vmatmul.mubr.msk.f32.gmra.mrb[128].mxu0 %vm2571_vm4, %v2436_v53  ;;  %v896_v46 = vadd.f32 %v6560_v43, %v6910_v1 }
 0x1d8   :  { %5095 = vmatprep.mubr.msk.f32.mxu1 %vm5714_vm2, %v5713_v0  ;;  %5316 = vmatprep.mubr.msk.f32.mxu0 %vm5714_vm2, %v5713_v0 }
 0x1d9   :  { %v2437_v5 = vmax.f32 %v1822_v4, 0.0  ;;  %v1287_v28 = vmax.f32 %v896_v46, 0.0 }
 0x1da   :  { %v1826_v60 = vpop.f32.mrb[130].mxu1 }
 0x1db   :  { %v1827_v50 = vadd.f32 %v6935_v12, %v1826_v60  ;;  %v4938_v35 = vpop.f32.mrb[131].mxu1  ;;  %5096 = vmatmul.mubr.msk.f32.gmra.mrb[236].mxu1 %vm1369_vm3, %v1285_v33  ;;  %5317 = vmatmul.mubr.msk.f32.gmra.mrb[130].mxu0 %vm2571_vm4, %v2437_v5  ;;  %v901_v33 = vadd.f32 %v6560_v43, %v6918_v30  ;;  %v6989_v43 = vld [vmem:[%s8452_s2] ss:$0 sm:$0xff] }
 0x1dc   :  { %5098 = vmatprep.mubr.msk.f32.mxu1 %vm5714_vm2, %v5713_v0  ;;  %5319 = vmatprep.mubr.msk.f32.mxu0 %vm5714_vm2, %v5713_v0  ;;  %v906_v30 = vadd.f32 %v6989_v43, %v6926_v18 }
 0x1dd   :  { %v2438_v36 = vmax.f32 %v1827_v50, 0.0  ;;  %v1288_v22 = vmax.f32 %v901_v33, 0.0  ;;  %v916_v33 = vadd.f32 %v6989_v43, %v6946_v49  ;;  %v921_v49 = vadd.f32 %v6989_v43, %v6439_v62 }
 0x1de   :  { %v1831_v40 = vpop.f32.mrb[132].mxu1  ;;  %v1289_v50 = vmax.f32 %v906_v30, 0.0 }
 0x1df   :  { %v1832_v53 = vadd.f32 %v6935_v12, %v1831_v40  ;;  %v4941_v27 = vpop.f32.mrb[133].mxu1  ;;  %5099 = vmatmul.mubr.msk.f32.gmra.mrb[238].mxu1 %vm1369_vm3, %v1286_v8  ;;  %5320 = vmatmul.mubr.msk.f32.gmra.mrb[132].mxu0 %vm2571_vm4, %v2438_v36  ;;  %v911_v36 = vadd.f32 %v6989_v43, %v6939_v23 }
 0x1e0   :  { %5101 = vmatprep.mubr.msk.f32.mxu1 %vm5714_vm2, %v5713_v0  ;;  %5322 = vmatprep.mubr.msk.f32.mxu0 %vm5714_vm2, %v5713_v0 }
 0x1e1   :  { %v2439_v1 = vmax.f32 %v1832_v53, 0.0 }
 0x1e2   :  { %v1836_v4 = vpop.f32.mrb[134].mxu1 }
 0x1e3   :  { %v1837_v56 = vadd.f32 %v6935_v12, %v1836_v4  ;;  %v4944_v5 = vpop.f32.mrb[135].mxu1  ;;  %5102 = vmatmul.mubr.msk.f32.gmra.mrb[240].mxu1 %vm1369_vm3, %v1287_v28  ;;  %5323 = vmatmul.mubr.msk.f32.gmra.mrb[134].mxu0 %vm2571_vm4, %v2439_v1  ;;  %v1290_v28 = vmax.f32 %v911_v36, 0.0  ;;  %v1291_v4 = vmax.f32 %v916_v33, 0.0 }
 0x1e4   :  { %5104 = vmatprep.mubr.msk.f32.mxu1 %vm5714_vm2, %v5713_v0  ;;  %5325 = vmatprep.mubr.msk.f32.mxu0 %vm5714_vm2, %v5713_v0 }
 0x1e5   :  { %v2440_v60 = vmax.f32 %v1837_v56, 0.0 }
 0x1e6   :  { %v1841_v8 = vpop.f32.mrb[136].mxu1 }
 0x1e7   :  { %v1842_v35 = vadd.f32 %v6935_v12, %v1841_v8  ;;  %v4947_v46 = vpop.f32.mrb[137].mxu1  ;;  %5105 = vmatmul.mubr.msk.f32.gmra.mrb[242].mxu1 %vm1369_vm3, %v1288_v22  ;;  %5326 = vmatmul.mubr.msk.f32.gmra.mrb[136].mxu0 %vm2571_vm4, %v2440_v60 }
 0x1e8   :  { %5107 = vmatprep.mubr.msk.f32.mxu1 %vm5714_vm2, %v5713_v0  ;;  %5328 = vmatprep.mubr.msk.f32.mxu0 %vm5714_vm2, %v5713_v0 }
 0x1e9   :  { %v2441_v18 = vmax.f32 %v1842_v35, 0.0  ;;  %v926_v35 = vadd.f32 %v6989_v43, %v6461_v6 }
 0x1ea   :  { %v1846_v40 = vpop.f32.mrb[138].mxu1 }
 0x1eb   :  { %v1847_v53 = vadd.f32 %v6935_v12, %v1846_v40  ;;  %v4950_v27 = vpop.f32.mrb[139].mxu1  ;;  %5108 = vmatmul.mubr.msk.f32.gmra.mrb[244].mxu1 %vm1369_vm3, %v1289_v50  ;;  %5329 = vmatmul.mubr.msk.f32.gmra.mrb[138].mxu0 %vm2571_vm4, %v2441_v18  ;;  %v1292_v50 = vmax.f32 %v921_v49, 0.0  ;;  %v1293_v40 = vmax.f32 %v926_v35, 0.0  ;;  %v946_v35 = vadd.f32 %v6989_v43, %v6525_v31 }
 0x1ec   :  { %5110 = vmatprep.mubr.msk.f32.mxu1 %vm5714_vm2, %v5713_v0  ;;  %5331 = vmatprep.mubr.msk.f32.mxu0 %vm5714_vm2, %v5713_v0 }
 0x1ed   :  { %v2442_v23 = vmax.f32 %v1847_v53, 0.0 }
 0x1ee   :  { %v1851_v1 = vpop.f32.mrb[140].mxu1 }
 0x1ef   :  { %v1852_v22 = vadd.f32 %v6935_v12, %v1851_v1  ;;  %v4953_v56 = vpop.f32.mrb[141].mxu1  ;;  %5111 = vmatmul.mubr.msk.f32.gmra.mrb[246].mxu1 %vm1369_vm3, %v1290_v28  ;;  %5332 = vmatmul.mubr.msk.f32.gmra.mrb[140].mxu0 %vm2571_vm4, %v2442_v23  ;;  %v931_v28 = vadd.f32 %v6989_v43, %v6477_v13  ;;  %v936_v1 = vadd.f32 %v6989_v43, %v6493_v19 }
 0x1f0   :  { %5113 = vmatprep.mubr.msk.f32.mxu1 %vm5714_vm2, %v5713_v0  ;;  %5334 = vmatprep.mubr.msk.f32.mxu0 %vm5714_vm2, %v5713_v0 }
 0x1f1   :  { %v2443_v5 = vmax.f32 %v1852_v22, 0.0  ;;  %v1294_v23 = vmax.f32 %v931_v28, 0.0  ;;  %v1295_v49 = vmax.f32 %v936_v1, 0.0 }
 0x1f2   :  { %v1856_v30 = vpop.f32.mrb[142].mxu1 }
 0x1f3   :  { %v1857_v60 = vadd.f32 %v6935_v12, %v1856_v30  ;;  %v4956_v8 = vpop.f32.mrb[143].mxu1  ;;  %5114 = vmatmul.mubr.msk.f32.gmra.mrb[248].mxu1 %vm1369_vm3, %v1291_v4  ;;  %5335 = vmatmul.mubr.msk.f32.gmra.mrb[142].mxu0 %vm2571_vm4, %v2443_v5  ;;  %v941_v5 = vadd.f32 %v6989_v43, %v6509_v25 }
 0x1f4   :  { %5116 = vmatprep.mubr.msk.f32.mxu1 %vm5714_vm2, %v5713_v0  ;;  %5337 = vmatprep.mubr.msk.f32.mxu0 %vm5714_vm2, %v5713_v0 }
 0x1f5   :  { %v2444_v62 = vmax.f32 %v1857_v60, 0.0 }
 0x1f6   :  { %v1861_v46 = vpop.f32.mrb[144].mxu1 }
 0x1f7   :  { %v1862_v36 = vadd.f32 %v6935_v12, %v1861_v46  ;;  %v4959_v18 = vpop.f32.mrb[145].mxu1  ;;  %5117 = vmatmul.mubr.msk.f32.gmra.mrb[250].mxu1 %vm1369_vm3, %v1292_v50  ;;  %5338 = vmatmul.mubr.msk.f32.gmra.mrb[144].mxu0 %vm2571_vm4, %v2444_v62  ;;  %v1296_v50 = vmax.f32 %v941_v5, 0.0 }
 0x1f8   :  { %5119 = vmatprep.mubr.msk.f32.mxu1 %vm5714_vm2, %v5713_v0  ;;  %5340 = vmatprep.mubr.msk.f32.mxu0 %vm5714_vm2, %v5713_v0  ;;  %v1297_v18 = vmax.f32 %v946_v35, 0.0 }
 0x1f9   :  { %v2445_v6 = vmax.f32 %v1862_v36, 0.0 }
 0x1fa   :  { %v1866_v53 = vpop.f32.mrb[146].mxu1 }
 0x1fb   :  { %v1867_v27 = vadd.f32 %v6935_v12, %v1866_v53  ;;  %v4962_v33 = vpop.f32.mrb[147].mxu1  ;;  %5120 = vmatmul.mubr.msk.f32.gmra.mrb[252].mxu1 %vm1369_vm3, %v1293_v40  ;;  %5341 = vmatmul.mubr.msk.f32.gmra.mrb[146].mxu0 %vm2571_vm4, %v2445_v6  ;;  %v951_v40 = vadd.f32 %v6989_v43, %v6541_v37 }
 0x1fc   :  { %5122 = vmatprep.mubr.msk.f32.mxu1 %vm5714_vm2, %v5713_v0  ;;  %5343 = vmatprep.mubr.msk.f32.mxu0 %vm5714_vm2, %v5713_v0  ;;  %v956_v33 = vadd.f32 %v6989_v43, %v6562_v44 }
 0x1fd   :  { %v2446_v13 = vmax.f32 %v1867_v27, 0.0  ;;  %v1298_v27 = vmax.f32 %v951_v40, 0.0  ;;  %v976_v40 = vadd.f32 %v6989_v43, %v6616_v10 }
 0x1fe   :  { %v1871_v4 = vpop.f32.mrb[148].mxu1 }
 0x1ff   :  { %v1872_v22 = vadd.f32 %v6935_v12, %v1871_v4  ;;  %v4965_v56 = vpop.f32.mrb[149].mxu1  ;;  %5123 = vmatmul.mubr.msk.f32.gmra.mrb[254].mxu1 %vm1369_vm3, %v1294_v23  ;;  %5344 = vmatmul.mubr.msk.f32.gmra.mrb[148].mxu0 %vm2571_vm4, %v2446_v13  ;;  %v1299_v4 = vmax.f32 %v956_v33, 0.0 }
 0x200   :  { %5125 = vmatprep.mubr.msk.f32.mxu1 %vm5714_vm2, %v5713_v0  ;;  %5346 = vmatprep.mubr.msk.f32.mxu0 %vm5714_vm2, %v5713_v0 }
 0x201   :  { %v2447_v19 = vmax.f32 %v1872_v22, 0.0  ;;  %v961_v22 = vadd.f32 %v6989_v43, %v6580_v51 }
 0x202   :  { %v1876_v30 = vpop.f32.mrb[150].mxu1 }
 0x203   :  { %v1877_v60 = vadd.f32 %v6935_v12, %v1876_v30  ;;  %v4968_v8 = vpop.f32.mrb[151].mxu1  ;;  %5126 = vmatmul.mubr.msk.f32.gmra.mrb[0].mxu1 %vm1369_vm3, %v1295_v49  ;;  %5347 = vmatmul.mubr.msk.f32.gmra.mrb[150].mxu0 %vm2571_vm4, %v2447_v19  ;;  %v1300_v19 = vmax.f32 %v961_v22, 0.0  ;;  %v966_v30 = vadd.f32 %v6989_v43, %v6593_v58 }
 0x204   :  { %5128 = vmatprep.mubr.msk.f32.mxu1 %vm5714_vm2, %v5713_v0  ;;  %5349 = vmatprep.mubr.msk.f32.mxu0 %vm5714_vm2, %v5713_v0 }
 0x205   :  { %v2448_v25 = vmax.f32 %v1877_v60, 0.0  ;;  %v1301_v35 = vmax.f32 %v966_v30, 0.0 }
 0x206   :  { %v1881_v62 = vpop.f32.mrb[152].mxu1 }
 0x207   :  { %v1882_v46 = vadd.f32 %v6935_v12, %v1881_v62  ;;  %v4971_v36 = vpop.f32.mrb[153].mxu1  ;;  %5129 = vmatmul.mubr.msk.f32.gmra.mrb[2].mxu1 %vm1369_vm3, %v1296_v50  ;;  %5350 = vmatmul.mubr.msk.f32.gmra.mrb[152].mxu0 %vm2571_vm4, %v2448_v25  ;;  %v971_v25 = vadd.f32 %v6989_v43, %v6606_v3 }
 0x208   :  { %5131 = vmatprep.mubr.msk.f32.mxu1 %vm5714_vm2, %v5713_v0  ;;  %5352 = vmatprep.mubr.msk.f32.mxu0 %vm5714_vm2, %v5713_v0 }
 0x209   :  { %v2449_v31 = vmax.f32 %v1882_v46, 0.0 }
 0x20a   :  { %v1886_v28 = vpop.f32.mrb[154].mxu1 }
 0x20b   :  { %v1887_v6 = vadd.f32 %v6935_v12, %v1886_v28  ;;  %v4974_v53 = vpop.f32.mrb[155].mxu1  ;;  %5132 = vmatmul.mubr.msk.f32.gmra.mrb[4].mxu1 %vm1369_vm3, %v1297_v18  ;;  %5353 = vmatmul.mubr.msk.f32.gmra.mrb[154].mxu0 %vm2571_vm4, %v2449_v31  ;;  %v1302_v18 = vmax.f32 %v971_v25, 0.0 }
 0x20c   :  { %5134 = vmatprep.mubr.msk.f32.mxu1 %vm5714_vm2, %v5713_v0  ;;  %5355 = vmatprep.mubr.msk.f32.mxu0 %vm5714_vm2, %v5713_v0  ;;  %v1303_v53 = vmax.f32 %v976_v40, 0.0  ;;  %v1006_v40 = vadd.f32 %v6989_v43, %v6656_v54 }
 0x20d   :  { %v2450_v37 = vmax.f32 %v1887_v6, 0.0 }
 0x20e   :  { %v1891_v23 = vpop.f32.mrb[156].mxu1 }
 0x20f   :  { %v1892_v1 = vadd.f32 %v6935_v12, %v1891_v23  ;;  %v4977_v13 = vpop.f32.mrb[157].mxu1  ;;  %5135 = vmatmul.mubr.msk.f32.gmra.mrb[6].mxu1 %vm1369_vm3, %v1298_v27  ;;  %5356 = vmatmul.mubr.msk.f32.gmra.mrb[156].mxu0 %vm2571_vm4, %v2450_v37  ;;  %v981_v27 = vadd.f32 %v6989_v43, %v6623_v17 }
 0x210   :  { %5137 = vmatprep.mubr.msk.f32.mxu1 %vm5714_vm2, %v5713_v0  ;;  %5358 = vmatprep.mubr.msk.f32.mxu0 %vm5714_vm2, %v5713_v0  ;;  %v986_v13 = vadd.f32 %v6989_v43, %v6630_v24 }
 0x211   :  { %v2451_v44 = vmax.f32 %v1892_v1, 0.0  ;;  %v1304_v1 = vmax.f32 %v981_v27, 0.0 }
 0x212   :  { %v1896_v56 = vpop.f32.mrb[158].mxu1 }
 0x213   :  { %v1897_v49 = vadd.f32 %v6935_v12, %v1896_v56  ;;  %v4980_v5 = vpop.f32.mrb[159].mxu1  ;;  %5138 = vmatmul.mubr.msk.f32.gmra.mrb[8].mxu1 %vm1369_vm3, %v1299_v4  ;;  %5359 = vmatmul.mubr.msk.f32.gmra.mrb[158].mxu0 %vm2571_vm4, %v2451_v44  ;;  %v1305_v56 = vmax.f32 %v986_v13, 0.0 }
 0x214   :  { %5140 = vmatprep.mubr.msk.f32.mxu1 %vm5714_vm2, %v5713_v0  ;;  %5361 = vmatprep.mubr.msk.f32.mxu0 %vm5714_vm2, %v5713_v0 }
 0x215   :  { %v2452_v51 = vmax.f32 %v1897_v49, 0.0  ;;  %v991_v49 = vadd.f32 %v6989_v43, %v6637_v32 }
 0x216   :  { %v1901_v60 = vpop.f32.mrb[160].mxu1 }
 0x217   :  { %v1902_v8 = vadd.f32 %v6935_v12, %v1901_v60  ;;  %v4983_v50 = vpop.f32.mrb[161].mxu1  ;;  %5141 = vmatmul.mubr.msk.f32.gmra.mrb[10].mxu1 %vm1369_vm3, %v1300_v19  ;;  %5362 = vmatmul.mubr.msk.f32.gmra.mrb[160].mxu0 %vm2571_vm4, %v2452_v51  ;;  %v1306_v51 = vmax.f32 %v991_v49, 0.0  ;;  %v996_v60 = vadd.f32 %v6989_v43, %v6644_v39 }
 0x218   :  { %5143 = vmatprep.mubr.msk.f32.mxu1 %vm5714_vm2, %v5713_v0  ;;  %5364 = vmatprep.mubr.msk.f32.mxu0 %vm5714_vm2, %v5713_v0 }
 0x219   :  { %v2453_v58 = vmax.f32 %v1902_v8, 0.0  ;;  %v1307_v25 = vmax.f32 %v996_v60, 0.0 }
 0x21a   :  { %v1906_v62 = vpop.f32.mrb[162].mxu1 }
 0x21b   :  { %v1907_v46 = vadd.f32 %v6935_v12, %v1906_v62  ;;  %v4986_v36 = vpop.f32.mrb[163].mxu1  ;;  %5144 = vmatmul.mubr.msk.f32.gmra.mrb[12].mxu1 %vm1369_vm3, %v1301_v35  ;;  %5365 = vmatmul.mubr.msk.f32.gmra.mrb[162].mxu0 %vm2571_vm4, %v2453_v58  ;;  %v1001_v58 = vadd.f32 %v6989_v43, %v6650_v47 }
 0x21c   :  { %5146 = vmatprep.mubr.msk.f32.mxu1 %vm5714_vm2, %v5713_v0  ;;  %5367 = vmatprep.mubr.msk.f32.mxu0 %vm5714_vm2, %v5713_v0 }
 0x21d   :  { %v2454_v3 = vmax.f32 %v1907_v46, 0.0 }
 0x21e   :  { %v1911_v31 = vpop.f32.mrb[164].mxu1 }
 0x21f   :  { %v1912_v28 = vadd.f32 %v6935_v12, %v1911_v31  ;;  %v4989_v6 = vpop.f32.mrb[165].mxu1  ;;  %5147 = vmatmul.mubr.msk.f32.gmra.mrb[14].mxu1 %vm1369_vm3, %v1302_v18  ;;  %5368 = vmatmul.mubr.msk.f32.gmra.mrb[164].mxu0 %vm2571_vm4, %v2454_v3  ;;  %v1308_v18 = vmax.f32 %v1001_v58, 0.0  ;;  %v1036_v58 = vadd.f32 %v6989_v43, %v6692_v42 }
 0x220   :  { %5149 = vmatprep.mubr.msk.f32.mxu1 %vm5714_vm2, %v5713_v0  ;;  %5370 = vmatprep.mubr.msk.f32.mxu0 %vm5714_vm2, %v5713_v0  ;;  %v1309_v6 = vmax.f32 %v1006_v40, 0.0 }
 0x221   :  { %v2455_v10 = vmax.f32 %v1912_v28, 0.0 }
 0x222   :  { %v1916_v33 = vpop.f32.mrb[166].mxu1 }
 0x223   :  { %v1917_v37 = vadd.f32 %v6935_v12, %v1916_v33  ;;  %v4992_v23 = vpop.f32.mrb[167].mxu1  ;;  %5150 = vmatmul.mubr.msk.f32.gmra.mrb[16].mxu1 %vm1369_vm3, %v1303_v53  ;;  %5371 = vmatmul.mubr.msk.f32.gmra.mrb[166].mxu0 %vm2571_vm4, %v2455_v10  ;;  %v1011_v53 = vadd.f32 %v6989_v43, %v6662_v61 }
 0x224   :  { %5152 = vmatprep.mubr.msk.f32.mxu1 %vm5714_vm2, %v5713_v0  ;;  %5373 = vmatprep.mubr.msk.f32.mxu0 %vm5714_vm2, %v5713_v0  ;;  %v1016_v23 = vadd.f32 %v6989_v43, %v6668_v7 }
 0x225   :  { %v2456_v17 = vmax.f32 %v1917_v37, 0.0  ;;  %v1310_v37 = vmax.f32 %v1011_v53, 0.0 }
 0x226   :  { %v1921_v4 = vpop.f32.mrb[168].mxu1 }
 0x227   :  { %v1922_v22 = vadd.f32 %v6935_v12, %v1921_v4  ;;  %v4995_v44 = vpop.f32.mrb[169].mxu1  ;;  %5153 = vmatmul.mubr.msk.f32.gmra.mrb[18].mxu1 %vm1369_vm3, %v1304_v1  ;;  %5374 = vmatmul.mubr.msk.f32.gmra.mrb[168].mxu0 %vm2571_vm4, %v2456_v17  ;;  %v1311_v4 = vmax.f32 %v1016_v23, 0.0 }
 0x228   :  { %5155 = vmatprep.mubr.msk.f32.mxu1 %vm5714_vm2, %v5713_v0  ;;  %5376 = vmatprep.mubr.msk.f32.mxu0 %vm5714_vm2, %v5713_v0 }
 0x229   :  { %v2457_v24 = vmax.f32 %v1922_v22, 0.0  ;;  %v1021_v22 = vadd.f32 %v6989_v43, %v6674_v15 }
 0x22a   :  { %v1926_v5 = vpop.f32.mrb[170].mxu1 }
 0x22b   :  { %v1927_v19 = vadd.f32 %v6935_v12, %v1926_v5  ;;  %v4998_v30 = vpop.f32.mrb[171].mxu1  ;;  %5156 = vmatmul.mubr.msk.f32.gmra.mrb[20].mxu1 %vm1369_vm3, %v1305_v56  ;;  %5377 = vmatmul.mubr.msk.f32.gmra.mrb[170].mxu0 %vm2571_vm4, %v2457_v24  ;;  %v1312_v24 = vmax.f32 %v1021_v22, 0.0  ;;  %v1026_v5 = vadd.f32 %v6989_v43, %v6680_v26 }
 0x22c   :  { %5158 = vmatprep.mubr.msk.f32.mxu1 %vm5714_vm2, %v5713_v0  ;;  %5379 = vmatprep.mubr.msk.f32.mxu0 %vm5714_vm2, %v5713_v0 }
 0x22d   :  { %v2458_v32 = vmax.f32 %v1927_v19, 0.0  ;;  %v1313_v60 = vmax.f32 %v1026_v5, 0.0  ;;  %v1066_v5 = vadd.f32 %v6989_v43, %v6728_v38 }
 0x22e   :  { %v1931_v8 = vpop.f32.mrb[172].mxu1 }
 0x22f   :  { %v1932_v50 = vadd.f32 %v6935_v12, %v1931_v8  ;;  %v5001_v35 = vpop.f32.mrb[173].mxu1  ;;  %5159 = vmatmul.mubr.msk.f32.gmra.mrb[22].mxu1 %vm1369_vm3, %v1306_v51  ;;  %5380 = vmatmul.mubr.msk.f32.gmra.mrb[172].mxu0 %vm2571_vm4, %v2458_v32  ;;  %v1031_v32 = vadd.f32 %v6989_v43, %v6686_v34 }
 0x230   :  { %5161 = vmatprep.mubr.msk.f32.mxu1 %vm5714_vm2, %v5713_v0  ;;  %5382 = vmatprep.mubr.msk.f32.mxu0 %vm5714_vm2, %v5713_v0 }
 0x231   :  { %v2459_v39 = vmax.f32 %v1932_v50, 0.0 }
 0x232   :  { %v1936_v62 = vpop.f32.mrb[174].mxu1 }
 0x233   :  { %v1937_v46 = vadd.f32 %v6935_v12, %v1936_v62  ;;  %v5004_v36 = vpop.f32.mrb[175].mxu1  ;;  %5162 = vmatmul.mubr.msk.f32.gmra.mrb[24].mxu1 %vm1369_vm3, %v1307_v25  ;;  %5383 = vmatmul.mubr.msk.f32.gmra.mrb[174].mxu0 %vm2571_vm4, %v2459_v39  ;;  %v1314_v25 = vmax.f32 %v1031_v32, 0.0 }
 0x234   :  { %5164 = vmatprep.mubr.msk.f32.mxu1 %vm5714_vm2, %v5713_v0  ;;  %5385 = vmatprep.mubr.msk.f32.mxu0 %vm5714_vm2, %v5713_v0  ;;  %v1315_v36 = vmax.f32 %v1036_v58, 0.0 }
 0x235   :  { %v2460_v47 = vmax.f32 %v1937_v46, 0.0 }
 0x236   :  { %v1941_v3 = vpop.f32.mrb[176].mxu1 }
 0x237   :  { %v1942_v31 = vadd.f32 %v6935_v12, %v1941_v3  ;;  %v5007_v28 = vpop.f32.mrb[177].mxu1  ;;  %5165 = vmatmul.mubr.msk.f32.gmra.mrb[26].mxu1 %vm1369_vm3, %v1308_v18  ;;  %5386 = vmatmul.mubr.msk.f32.gmra.mrb[176].mxu0 %vm2571_vm4, %v2460_v47  ;;  %v1041_v18 = vadd.f32 %v6989_v43, %v6698_v52 }
 0x238   :  { %5167 = vmatprep.mubr.msk.f32.mxu1 %vm5714_vm2, %v5713_v0  ;;  %5388 = vmatprep.mubr.msk.f32.mxu0 %vm5714_vm2, %v5713_v0  ;;  %v1046_v28 = vadd.f32 %v6989_v43, %v6704_v63 }
 0x239   :  { %v2461_v54 = vmax.f32 %v1942_v31, 0.0  ;;  %v1316_v31 = vmax.f32 %v1041_v18, 0.0 }
 0x23a   :  { %v1946_v27 = vpop.f32.mrb[178].mxu1 }
 0x23b   :  { %v1947_v10 = vadd.f32 %v6935_v12, %v1946_v27  ;;  %v5010_v33 = vpop.f32.mrb[179].mxu1  ;;  %5168 = vmatmul.mubr.msk.f32.gmra.mrb[28].mxu1 %vm1369_vm3, %v1309_v6  ;;  %5389 = vmatmul.mubr.msk.f32.gmra.mrb[178].mxu0 %vm2571_vm4, %v2461_v54  ;;  %v1317_v27 = vmax.f32 %v1046_v28, 0.0 }
 0x23c   :  { %5170 = vmatprep.mubr.msk.f32.mxu1 %vm5714_vm2, %v5713_v0  ;;  %5391 = vmatprep.mubr.msk.f32.mxu0 %vm5714_vm2, %v5713_v0 }
 0x23d   :  { %v2462_v61 = vmax.f32 %v1947_v10, 0.0  ;;  %v1051_v10 = vadd.f32 %v6989_v43, %v6710_v9 }
 0x23e   :  { %v1951_v1 = vpop.f32.mrb[180].mxu1 }
 0x23f   :  { %v1952_v13 = vadd.f32 %v6935_v12, %v1951_v1  ;;  %v5013_v17 = vpop.f32.mrb[181].mxu1  ;;  %5171 = vmatmul.mubr.msk.f32.gmra.mrb[30].mxu1 %vm1369_vm3, %v1310_v37  ;;  %5392 = vmatmul.mubr.msk.f32.gmra.mrb[180].mxu0 %vm2571_vm4, %v2462_v61  ;;  %v1318_v61 = vmax.f32 %v1051_v10, 0.0  ;;  %v1056_v1 = vadd.f32 %v6989_v43, %v6716_v20  ;;  %v1096_v10 = vadd.f32 %v6989_v43, %v6764_v57 }
 0x240   :  { %5173 = vmatprep.mubr.msk.f32.mxu1 %vm5714_vm2, %v5713_v0  ;;  %5394 = vmatprep.mubr.msk.f32.mxu0 %vm5714_vm2, %v5713_v0 }
 0x241   :  { %v2463_v7 = vmax.f32 %v1952_v13, 0.0  ;;  %v1319_v22 = vmax.f32 %v1056_v1, 0.0 }
 0x242   :  { %v1956_v44 = vpop.f32.mrb[182].mxu1 }
 0x243   :  { %v1957_v56 = vadd.f32 %v6935_v12, %v1956_v44  ;;  %v5016_v49 = vpop.f32.mrb[183].mxu1  ;;  %5174 = vmatmul.mubr.msk.f32.gmra.mrb[32].mxu1 %vm1369_vm3, %v1311_v4  ;;  %5395 = vmatmul.mubr.msk.f32.gmra.mrb[182].mxu0 %vm2571_vm4, %v2463_v7  ;;  %v1061_v7 = vadd.f32 %v6989_v43, %v6722_v29 }
 0x244   :  { %5176 = vmatprep.mubr.msk.f32.mxu1 %vm5714_vm2, %v5713_v0  ;;  %5397 = vmatprep.mubr.msk.f32.mxu0 %vm5714_vm2, %v5713_v0 }
 0x245   :  { %v2464_v15 = vmax.f32 %v1957_v56, 0.0 }
 0x246   :  { %v1961_v19 = vpop.f32.mrb[184].mxu1 }
 0x247   :  { %v1962_v30 = vadd.f32 %v6935_v12, %v1961_v19  ;;  %v5019_v51 = vpop.f32.mrb[185].mxu1  ;;  %5177 = vmatmul.mubr.msk.f32.gmra.mrb[34].mxu1 %vm1369_vm3, %v1312_v24  ;;  %5398 = vmatmul.mubr.msk.f32.gmra.mrb[184].mxu0 %vm2571_vm4, %v2464_v15  ;;  %v1320_v24 = vmax.f32 %v1061_v7, 0.0 }
 0x248   :  { %5179 = vmatprep.mubr.msk.f32.mxu1 %vm5714_vm2, %v5713_v0  ;;  %5400 = vmatprep.mubr.msk.f32.mxu0 %vm5714_vm2, %v5713_v0  ;;  %v1321_v51 = vmax.f32 %v1066_v5, 0.0 }
 0x249   :  { %v2465_v26 = vmax.f32 %v1962_v30, 0.0 }
 0x24a   :  { %v1966_v8 = vpop.f32.mrb[186].mxu1 }
 0x24b   :  { %v1967_v50 = vadd.f32 %v6935_v12, %v1966_v8  ;;  %v5022_v35 = vpop.f32.mrb[187].mxu1  ;;  %5180 = vmatmul.mubr.msk.f32.gmra.mrb[36].mxu1 %vm1369_vm3, %v1313_v60  ;;  %5401 = vmatmul.mubr.msk.f32.gmra.mrb[186].mxu0 %vm2571_vm4, %v2465_v26  ;;  %v1071_v60 = vadd.f32 %v6989_v43, %v6734_v55 }
 0x24c   :  { %5182 = vmatprep.mubr.msk.f32.mxu1 %vm5714_vm2, %v5713_v0  ;;  %5403 = vmatprep.mubr.msk.f32.mxu0 %vm5714_vm2, %v5713_v0  ;;  %v1076_v35 = vadd.f32 %v6989_v43, %v6740_v2 }
 0x24d   :  { %v2466_v34 = vmax.f32 %v1967_v50, 0.0  ;;  %v1322_v50 = vmax.f32 %v1071_v60, 0.0 }
 0x24e   :  { %v1971_v39 = vpop.f32.mrb[188].mxu1 }
 0x24f   :  { %v1972_v62 = vadd.f32 %v6935_v12, %v1971_v39  ;;  %v5025_v46 = vpop.f32.mrb[189].mxu1  ;;  %5183 = vmatmul.mubr.msk.f32.gmra.mrb[38].mxu1 %vm1369_vm3, %v1314_v25  ;;  %5404 = vmatmul.mubr.msk.f32.gmra.mrb[188].mxu0 %vm2571_vm4, %v2466_v34  ;;  %v1323_v39 = vmax.f32 %v1076_v35, 0.0  ;;  %v8477_v35 = vld [vmem:[#allocation2_spill] sm:$0xff] }
 0x250   :  { %5185 = vmatprep.mubr.msk.f32.mxu1 %vm5714_vm2, %v5713_v0  ;;  %5406 = vmatprep.mubr.msk.f32.mxu0 %vm5714_vm2, %v5713_v0 }
 0x251   :  { %v2467_v42 = vmax.f32 %v1972_v62, 0.0  ;;  %v1081_v62 = vadd.f32 %v6989_v43, %v6746_v16 }
 0x252   :  { %v1976_v40 = vpop.f32.mrb[190].mxu1 }
 0x253   :  { %v1977_v47 = vadd.f32 %v6935_v12, %v1976_v40  ;;  %v5028_v3 = vpop.f32.mrb[191].mxu1  ;;  %5186 = vmatmul.mubr.msk.f32.gmra.mrb[40].mxu1 %vm1369_vm3, %v1315_v36  ;;  %5407 = vmatmul.mubr.msk.f32.gmra.mrb[190].mxu0 %vm2571_vm4, %v2467_v42  ;;  %v1324_v42 = vmax.f32 %v1081_v62, 0.0  ;;  %v1086_v40 = vadd.f32 %v6989_v43, %v6752_v14  ;;  %v8478_v62 = vld [vmem:[#allocation3_spill] sm:$0xff] }
 0x254   :  { %5188 = vmatprep.mubr.msk.f32.mxu1 %vm5714_vm2, %v5713_v0  ;;  %5409 = vmatprep.mubr.msk.f32.mxu0 %vm5714_vm2, %v5713_v0 }
 0x255   :  { %v2468_v52 = vmax.f32 %v1977_v47, 0.0  ;;  %v1325_v28 = vmax.f32 %v1086_v40, 0.0 }
 0x256   :  { %v1981_v6 = vpop.f32.mrb[192].mxu1 }
 0x257   :  { %v1982_v53 = vadd.f32 %v6935_v12, %v1981_v6  ;;  %v5031_v54 = vpop.f32.mrb[193].mxu1  ;;  %5189 = vmatmul.mubr.msk.f32.gmra.mrb[42].mxu1 %vm1369_vm3, %v1316_v31  ;;  %5410 = vmatmul.mubr.msk.f32.gmra.mrb[192].mxu0 %vm2571_vm4, %v2468_v52  ;;  %v1091_v52 = vadd.f32 %v6989_v43, %v6758_v45 }
 0x258   :  { %5191 = vmatprep.mubr.msk.f32.mxu1 %vm5714_vm2, %v5713_v0  ;;  %5412 = vmatprep.mubr.msk.f32.mxu0 %vm5714_vm2, %v5713_v0 }
 0x259   :  { %v2469_v63 = vmax.f32 %v1982_v53, 0.0 }
 0x25a   :  { %v1986_v33 = vpop.f32.mrb[194].mxu1 }
 0x25b   :  { %v1987_v37 = vadd.f32 %v6935_v12, %v1986_v33  ;;  %v5034_v23 = vpop.f32.mrb[195].mxu1  ;;  %5192 = vmatmul.mubr.msk.f32.gmra.mrb[44].mxu1 %vm1369_vm3, %v1317_v27  ;;  %5413 = vmatmul.mubr.msk.f32.gmra.mrb[194].mxu0 %vm2571_vm4, %v2469_v63  ;;  %v1326_v27 = vmax.f32 %v1091_v52, 0.0 }
 0x25c   :  { %5194 = vmatprep.mubr.msk.f32.mxu1 %vm5714_vm2, %v5713_v0  ;;  %5415 = vmatprep.mubr.msk.f32.mxu0 %vm5714_vm2, %v5713_v0  ;;  %v1327_v23 = vmax.f32 %v1096_v10, 0.0 }
 0x25d   :  { %v2470_v9 = vmax.f32 %v1987_v37, 0.0 }
 0x25e   :  { %v1991_v13 = vpop.f32.mrb[196].mxu1 }
 0x25f   :  { %v1992_v17 = vadd.f32 %v6935_v12, %v1991_v13  ;;  %v5037_v4 = vpop.f32.mrb[197].mxu1  ;;  %5195 = vmatmul.mubr.msk.f32.gmra.mrb[46].mxu1 %vm1369_vm3, %v1318_v61  ;;  %5416 = vmatmul.mubr.msk.f32.gmra.mrb[196].mxu0 %vm2571_vm4, %v2470_v9  ;;  %v1101_v61 = vadd.f32 %v6989_v43, %v6770_v11 }
 0x260   :  { %5197 = vmatprep.mubr.msk.f32.mxu1 %vm5714_vm2, %v5713_v0  ;;  %5418 = vmatprep.mubr.msk.f32.mxu0 %vm5714_vm2, %v5713_v0  ;;  %v1106_v4 = vadd.f32 %v6989_v43, %v6776_v59 }
 0x261   :  { %v2471_v20 = vmax.f32 %v1992_v17, 0.0  ;;  %v1328_v17 = vmax.f32 %v1101_v61, 0.0 }
 0x262   :  { %v1996_v44 = vpop.f32.mrb[198].mxu1 }
 0x263   :  { %v1997_v56 = vadd.f32 %v6935_v12, %v1996_v44  ;;  %v5040_v49 = vpop.f32.mrb[199].mxu1  ;;  %5198 = vmatmul.mubr.msk.f32.gmra.mrb[48].mxu1 %vm1369_vm3, %v1319_v22  ;;  %5419 = vmatmul.mubr.msk.f32.gmra.mrb[198].mxu0 %vm2571_vm4, %v2471_v20  ;;  %v1329_v44 = vmax.f32 %v1106_v4, 0.0 }
 0x264   :  { %5200 = vmatprep.mubr.msk.f32.mxu1 %vm5714_vm2, %v5713_v0  ;;  %5421 = vmatprep.mubr.msk.f32.mxu0 %vm5714_vm2, %v5713_v0 }
 0x265   :  { %v2472_v29 = vmax.f32 %v1997_v56, 0.0  ;;  %v1111_v56 = vadd.f32 %v6989_v43, %v6782_v48 }
 0x266   :  { %v2001_v15 = vpop.f32.mrb[200].mxu1 }
 0x267   :  { %v2002_v19 = vadd.f32 %v6935_v12, %v2001_v15  ;;  %v5043_v30 = vpop.f32.mrb[201].mxu1  ;;  %5201 = vmatmul.mubr.msk.f32.gmra.mrb[50].mxu1 %vm1369_vm3, %v1320_v24  ;;  %5422 = vmatmul.mubr.msk.f32.gmra.mrb[200].mxu0 %vm2571_vm4, %v2472_v29  ;;  %v1330_v29 = vmax.f32 %v1111_v56, 0.0  ;;  %v1116_v15 = vadd.f32 %v6989_v43, %v6788_v41 }
 0x268   :  { %5203 = vmatprep.mubr.msk.f32.mxu1 %vm5714_vm2, %v5713_v0  ;;  %5424 = vmatprep.mubr.msk.f32.mxu0 %vm5714_vm2, %v5713_v0 }
 0x269   :  { %v2473_v38 = vmax.f32 %v2002_v19, 0.0  ;;  %v1331_v60 = vmax.f32 %v1116_v15, 0.0  ;;  %v8483_v15 = vld [vmem:[#allocation8_spill] sm:$0xff] }
 0x26a   :  { %v2006_v32 = vpop.f32.mrb[202].mxu1 }
 0x26b   :  { %v2007_v26 = vadd.f32 %v6935_v12, %v2006_v32  ;;  %v5046_v8 = vpop.f32.mrb[203].mxu1  ;;  %5204 = vmatmul.mubr.msk.f32.gmra.mrb[52].mxu1 %vm1369_vm3, %v1321_v51  ;;  %5425 = vmatmul.mubr.msk.f32.gmra.mrb[202].mxu0 %vm2571_vm4, %v2473_v38  ;;  %v1121_v38 = vadd.f32 %v6989_v43, %v6794_v21 }
 0x26c   :  { %5206 = vmatprep.mubr.msk.f32.mxu1 %vm5714_vm2, %v5713_v0  ;;  %5427 = vmatprep.mubr.msk.f32.mxu0 %vm5714_vm2, %v5713_v0 }
 0x26d   :  { %v2474_v55 = vmax.f32 %v2007_v26, 0.0 }
 0x26e   :  { %v2011_v25 = vpop.f32.mrb[204].mxu1 }
 0x26f   :  { %v2012_v58 = vadd.f32 %v6935_v12, %v2011_v25  ;;  %v5049_v34 = vpop.f32.mrb[205].mxu1  ;;  %5207 = vmatmul.mubr.msk.f32.gmra.mrb[54].mxu1 %vm1369_vm3, %v1322_v50  ;;  %5428 = vmatmul.mubr.msk.f32.gmra.mrb[204].mxu0 %vm2571_vm4, %v2474_v55  ;;  %v1332_v50 = vmax.f32 %v1121_v38, 0.0  ;;  %v1126_v55 = vadd.f32 %v6989_v43, %v8477_v35 }
 0x270   :  { %5209 = vmatprep.mubr.msk.f32.mxu1 %vm5714_vm2, %v5713_v0  ;;  %5430 = vmatprep.mubr.msk.f32.mxu0 %vm5714_vm2, %v5713_v0 }
 0x271   :  { %v2475_v2 = vmax.f32 %v2012_v58, 0.0 }
 0x272   :  { %v2016_v46 = vpop.f32.mrb[206].mxu1 }
 0x273   :  { %v2017_v36 = vadd.f32 %v6935_v12, %v2016_v46  ;;  %v5052_v18 = vpop.f32.mrb[207].mxu1  ;;  %5210 = vmatmul.mubr.msk.f32.gmra.mrb[56].mxu1 %vm1369_vm3, %v1323_v39  ;;  %5431 = vmatmul.mubr.msk.f32.gmra.mrb[206].mxu0 %vm2571_vm4, %v2475_v2  ;;  %v1333_v39 = vmax.f32 %v1126_v55, 0.0  ;;  %v1131_v2 = vadd.f32 %v6989_v43, %v8478_v62 }
 0x274   :  { %5212 = vmatprep.mubr.msk.f32.mxu1 %vm5714_vm2, %v5713_v0  ;;  %5433 = vmatprep.mubr.msk.f32.mxu0 %vm5714_vm2, %v5713_v0 }
 0x275   :  { %v2476_v16 = vmax.f32 %v2017_v36, 0.0  ;;  %v1334_v40 = vmax.f32 %v1131_v2, 0.0  ;;  %v8485_v2 = vld [vmem:[#allocation10_spill] sm:$0xff] }
 0x276   :  { %v2021_v47 = vpop.f32.mrb[208].mxu1 }
 0x277   :  { %v2022_v3 = vadd.f32 %v6935_v12, %v2021_v47  ;;  %v5055_v31 = vpop.f32.mrb[209].mxu1  ;;  %5213 = vmatmul.mubr.msk.f32.gmra.mrb[58].mxu1 %vm1369_vm3, %v1324_v42  ;;  %5434 = vmatmul.mubr.msk.f32.gmra.mrb[208].mxu0 %vm2571_vm4, %v2476_v16  ;;  %v8479_v16 = vld [vmem:[#allocation4_spill] sm:$0xff] }
 0x278   :  { %5215 = vmatprep.mubr.msk.f32.mxu1 %vm5714_vm2, %v5713_v0  ;;  %5436 = vmatprep.mubr.msk.f32.mxu0 %vm5714_vm2, %v5713_v0  ;;  %v1136_v47 = vadd.f32 %v6989_v43, %v8479_v16 }
 0x279   :  { %v2477_v14 = vmax.f32 %v2022_v3, 0.0 }
 0x27a   :  { %v2026_v6 = vpop.f32.mrb[210].mxu1 }
 0x27b   :  { %v2027_v53 = vadd.f32 %v6935_v12, %v2026_v6  ;;  %v5058_v54 = vpop.f32.mrb[211].mxu1  ;;  %5216 = vmatmul.mubr.msk.f32.gmra.mrb[60].mxu1 %vm1369_vm3, %v1325_v28  ;;  %5437 = vmatmul.mubr.msk.f32.gmra.mrb[210].mxu0 %vm2571_vm4, %v2477_v14  ;;  %v1335_v14 = vmax.f32 %v1136_v47, 0.0  ;;  %v8480_v6 = vld [vmem:[#allocation5_spill] sm:$0xff] }
 0x27c   :  { %5218 = vmatprep.mubr.msk.f32.mxu1 %vm5714_vm2, %v5713_v0  ;;  %5439 = vmatprep.mubr.msk.f32.mxu0 %vm5714_vm2, %v5713_v0 }
 0x27d   :  { %v2478_v45 = vmax.f32 %v2027_v53, 0.0  ;;  %v1141_v53 = vadd.f32 %v6989_v43, %v8480_v6 }
 0x27e   :  { %v2031_v63 = vpop.f32.mrb[212].mxu1 }
 0x27f   :  { %v2032_v33 = vadd.f32 %v6935_v12, %v2031_v63  ;;  %v5061_v37 = vpop.f32.mrb[213].mxu1  ;;  %5219 = vmatmul.mubr.msk.f32.gmra.mrb[62].mxu1 %vm1369_vm3, %v1326_v27  ;;  %5440 = vmatmul.mubr.msk.f32.gmra.mrb[212].mxu0 %vm2571_vm4, %v2478_v45  ;;  %v7433_v63 = vld [vmem:[%s8454_s6] ss:$0 sm:$0xff] }
 0x280   :  { %5221 = vmatprep.mubr.msk.f32.mxu1 %vm5714_vm2, %v5713_v0  ;;  %5442 = vmatprep.mubr.msk.f32.mxu0 %vm5714_vm2, %v5713_v0  ;;  %v8481_v37 = vld [vmem:[#allocation6_spill] sm:$0xff] }
 0x281   :  { %v2479_v57 = vmax.f32 %v2032_v33, 0.0  ;;  %v1336_v33 = vmax.f32 %v1141_v53, 0.0 }
 0x282   :  { %v2036_v1 = vpop.f32.mrb[214].mxu1 }
 0x283   :  { %v2037_v9 = vadd.f32 %v6935_v12, %v2036_v1  ;;  %v5064_v13 = vpop.f32.mrb[215].mxu1  ;;  %5222 = vmatmul.mubr.msk.f32.gmra.mrb[64].mxu1 %vm1369_vm3, %v1327_v23  ;;  %5443 = vmatmul.mubr.msk.f32.gmra.mrb[214].mxu0 %vm2571_vm4, %v2479_v57  ;;  %v1146_v23 = vadd.f32 %v6989_v43, %v8481_v37  ;;  %v8487_v37 = vld [vmem:[#allocation12_spill] sm:$0xff] }
 0x284   :  { %5224 = vmatprep.mubr.msk.f32.mxu1 %vm5714_vm2, %v5713_v0  ;;  %5445 = vmatprep.mubr.msk.f32.mxu0 %vm5714_vm2, %v5713_v0 }
 0x285   :  { %v2480_v11 = vmax.f32 %v2037_v9, 0.0 }
 0x286   :  { %v2041_v22 = vpop.f32.mrb[216].mxu1 }
 0x287   :  { %v2042_v7 = vadd.f32 %v6935_v12, %v2041_v22  ;;  %v5067_v20 = vpop.f32.mrb[217].mxu1  ;;  %5225 = vmatmul.mubr.msk.f32.gmra.mrb[66].mxu1 %vm1369_vm3, %v1328_v17  ;;  %5446 = vmatmul.mubr.msk.f32.gmra.mrb[216].mxu0 %vm2571_vm4, %v2480_v11  ;;  %v1337_v11 = vmax.f32 %v1146_v23, 0.0  ;;  %v8482_v22 = vld [vmem:[#allocation7_spill] sm:$0xff] }
 0x288   :  { %5227 = vmatprep.mubr.msk.f32.mxu1 %vm5714_vm2, %v5713_v0  ;;  %5448 = vmatprep.mubr.msk.f32.mxu0 %vm5714_vm2, %v5713_v0 }
 0x289   :  { %v2481_v59 = vmax.f32 %v2042_v7, 0.0  ;;  %v1151_v7 = vadd.f32 %v6989_v43, %v8482_v22  ;;  %v8488_v22 = vld [vmem:[#allocation13_spill] sm:$0xff] }
 0x28a   :  { %v2046_v49 = vpop.f32.mrb[218].mxu1 }
 0x28b   :  { %v2047_v24 = vadd.f32 %v6935_v12, %v2046_v49  ;;  %v5070_v5 = vpop.f32.mrb[219].mxu1  ;;  %5228 = vmatmul.mubr.msk.f32.gmra.mrb[68].mxu1 %vm1369_vm3, %v1329_v44  ;;  %5449 = vmatmul.mubr.msk.f32.gmra.mrb[218].mxu0 %vm2571_vm4, %v2481_v59  ;;  %v1338_v43 = vmax.f32 %v1151_v7, 0.0 }
 0x28c   :  { %5230 = vmatprep.mubr.msk.f32.mxu1 %vm5714_vm2, %v5713_v0  ;;  %5451 = vmatprep.mubr.msk.f32.mxu0 %vm5714_vm2, %v5713_v0 }
 0x28d   :  { %v2482_v48 = vmax.f32 %v2047_v24, 0.0 }
 0x28e   :  { %v2051_v19 = vpop.f32.mrb[220].mxu1 }
 0x28f   :  { %v2052_v30 = vadd.f32 %v6935_v12, %v2051_v19  ;;  %v5073_v51 = vpop.f32.mrb[221].mxu1  ;;  %5231 = vmatmul.mubr.msk.f32.gmra.mrb[70].mxu1 %vm1369_vm3, %v1330_v29  ;;  %5452 = vmatmul.mubr.msk.f32.gmra.mrb[220].mxu0 %vm2571_vm4, %v2482_v48  ;;  %v7464_v29 = vld [vmem:[%s8452_s2] ss:$0 sm:$0xff] }
 0x290   :  { %5233 = vmatprep.mubr.msk.f32.mxu1 %vm5714_vm2, %v5713_v0  ;;  %5454 = vmatprep.mubr.msk.f32.mxu0 %vm5714_vm2, %v5713_v0  ;;  %v1156_v48 = vadd.f32 %v7464_v29, %v8483_v15  ;;  %v1176_v23 = vadd.f32 %v7464_v29, %v8487_v37  ;;  %v1181_v7 = vadd.f32 %v7464_v29, %v8488_v22  ;;  %v8489_v15 = vld [vmem:[#allocation14_spill] sm:$0xff]  ;;  %v8494_v22 = vld [vmem:[#allocation19_spill] sm:$0xff] }
 0x291   :  { %v2483_v41 = vmax.f32 %v2052_v30, 0.0  ;;  %v8493_v37 = vld [vmem:[#allocation18_spill] sm:$0xff] }
 0x292   :  { %v2056_v32 = vpop.f32.mrb[222].mxu1 }
 0x293   :  { %v2057_v26 = vadd.f32 %v6935_v12, %v2056_v32  ;;  %v5076_v8 = vpop.f32.mrb[223].mxu1  ;;  %5234 = vmatmul.mubr.msk.f32.gmra.mrb[72].mxu1 %vm1369_vm3, %v1331_v60  ;;  %5455 = vmatmul.mubr.msk.f32.gmra.mrb[222].mxu0 %vm2571_vm4, %v2483_v41 }
 0x294   :  { %5236 = vmatprep.mubr.msk.f32.mxu1 %vm5714_vm2, %v5713_v0  ;;  %5457 = vmatprep.mubr.msk.f32.mxu0 %vm5714_vm2, %v5713_v0  ;;  %v8484_v8 = vld [vmem:[#allocation9_spill] sm:$0xff] }
 0x295   :  { %v2484_v21 = vmax.f32 %v2057_v26, 0.0  ;;  %v1339_v26 = vmax.f32 %v1156_v48, 0.0  ;;  %v1186_v48 = vadd.f32 %v7464_v29, %v8489_v15  ;;  %v8495_v15 = vld [vmem:[#allocation20_spill] sm:$0xff] }
 0x296   :  { %v2061_v25 = vpop.f32.mrb[224].mxu1 }
 0x297   :  { %v2062_v58 = vadd.f32 %v6935_v12, %v2061_v25  ;;  %v5079_v34 = vpop.f32.mrb[225].mxu1  ;;  %5237 = vmatmul.mubr.msk.f32.gmra.mrb[74].mxu1 %vm1369_vm3, %v1332_v50  ;;  %5458 = vmatmul.mubr.msk.f32.gmra.mrb[224].mxu0 %vm2571_vm4, %v2484_v21  ;;  %v7405_v12 = vld [vmem:[%s8453_s4] ss:$0 sm:$0xff]  ;;  %v1161_v50 = vadd.f32 %v7464_v29, %v8484_v8  ;;  %v8490_v8 = vld [vmem:[#allocation15_spill] sm:$0xff] }
 0x298   :  { %5239 = vmatprep.mubr.msk.f32.mxu1 %vm5714_vm2, %v5713_v0  ;;  %5460 = vmatprep.mubr.msk.f32.mxu0 %vm5714_vm2, %v5713_v0 }
 0x299   :  { %v2485_v46 = vmax.f32 %v2062_v58, 0.0  ;;  %v1340_v62 = vmax.f32 %v1161_v50, 0.0  ;;  %v1191_v50 = vadd.f32 %v7464_v29, %v8490_v8  ;;  %v8496_v8 = vld [vmem:[#allocation21_spill] sm:$0xff] }
 0x29a   :  { %v2066_v36 = vpop.f32.mrb[226].mxu1 }
 0x29b   :  { %v2067_v18 = vadd.f32 %v7405_v12, %v2066_v36  ;;  %v5082_v42 = vpop.f32.mrb[227].mxu1  ;;  %5240 = vmatmul.mubr.msk.f32.gmra.mrb[76].mxu1 %vm1369_vm3, %v1333_v39  ;;  %5461 = vmatmul.mubr.msk.f32.gmra.mrb[226].mxu0 %vm2571_vm4, %v2485_v46  ;;  %v1166_v46 = vadd.f32 %v7464_v29, %v8485_v2  ;;  %v8491_v2 = vld [vmem:[#allocation16_spill] sm:$0xff] }
 0x29c   :  { %5242 = vmatprep.mubr.msk.f32.mxu1 %vm5714_vm2, %v5713_v0  ;;  %5463 = vmatprep.mubr.msk.f32.mxu0 %vm5714_vm2, %v5713_v0 }
 0x29d   :  { %v2486_v3 = vmax.f32 %v2067_v18, 0.0 }
 0x29e   :  { %v2071_v31 = vpop.f32.mrb[228].mxu1 }
 0x29f   :  { %v2072_v28 = vadd.f32 %v7405_v12, %v2071_v31  ;;  %v5085_v52 = vpop.f32.mrb[229].mxu1  ;;  %5243 = vmatmul.mubr.msk.f32.gmra.mrb[78].mxu1 %vm1369_vm3, %v1334_v40  ;;  %5464 = vmatmul.mubr.msk.f32.gmra.mrb[228].mxu0 %vm2571_vm4, %v2486_v3  ;;  %v1341_v31 = vmax.f32 %v1166_v46, 0.0  ;;  %v1196_v46 = vadd.f32 %v7464_v29, %v8491_v2  ;;  %v8497_v2 = vld [vmem:[#allocation22_spill] sm:$0xff] }
 0x2a0   :  { %5245 = vmatprep.mubr.msk.f32.mxu1 %vm5714_vm2, %v5713_v0  ;;  %5466 = vmatprep.mubr.msk.f32.mxu0 %vm5714_vm2, %v5713_v0 }
 0x2a1   :  { %v2487_v54 = vmax.f32 %v2072_v28, 0.0  ;;  %v8486_v28 = vld [vmem:[#allocation11_spill] sm:$0xff] }
 0x2a2   :  { %v2076_v27 = vpop.f32.mrb[230].mxu1  ;;  %v1171_v52 = vadd.f32 %v7464_v29, %v8486_v28  ;;  %v8492_v28 = vld [vmem:[#allocation17_spill] sm:$0xff] }
 0x2a3   :  { %v2077_v10 = vadd.f32 %v7405_v12, %v2076_v27  ;;  %v5088_v45 = vpop.f32.mrb[231].mxu1  ;;  %5246 = vmatmul.mubr.msk.f32.gmra.mrb[80].mxu1 %vm1369_vm3, %v1335_v14  ;;  %5467 = vmatmul.mubr.msk.f32.gmra.mrb[230].mxu0 %vm2571_vm4, %v2487_v54 }
 0x2a4   :  { %5248 = vmatprep.mubr.msk.f32.mxu1 %vm5714_vm2, %v5713_v0  ;;  %5469 = vmatprep.mubr.msk.f32.mxu0 %vm5714_vm2, %v5713_v0 }
 0x2a5   :  { %v2488_v61 = vmax.f32 %v2077_v10, 0.0 }
 0x2a6   :  { %v2081_v57 = vpop.f32.mrb[232].mxu1  ;;  %v3013_v1 = vpop.f32.mrb[126].mxu0 }
 0x2a7   :  { %v2082_v9 = vadd.f32 %v7405_v12, %v2081_v57  ;;  %v3014_v13 = vadd.f32 %v7433_v63, %v3013_v1  ;;  %v5091_v17 = vpop.f32.mrb[233].mxu1  ;;  %5249 = vmatmul.mubr.msk.f32.gmra.mrb[82].mxu1 %vm1369_vm3, %v1336_v33  ;;  %v5312_v4 = vpop.f32.mrb[127].mxu0  ;;  %5470 = vmatmul.mubr.msk.f32.gmra.mrb[232].mxu0 %vm2571_vm4, %v2488_v61  ;;  %v1342_v33 = vmax.f32 %v1171_v52, 0.0  ;;  %v1201_v52 = vadd.f32 %v7464_v29, %v8492_v28 }
 0x2a8   :  { %5251 = vmatprep.mubr.msk.f32.mxu1 %vm5714_vm2, %v5713_v0  ;;  %5472 = vmatprep.mubr.msk.f32.mxu0 %vm5714_vm2, %v5713_v0 }
 0x2a9   :  { %v2489_v20 = vmax.f32 %v2082_v9, 0.0  ;;  %3638 = vst.msk [vmem:[%s8455_s7] sm:$0xff] %vm3637_vm5, %v3014_v13 }
 0x2aa   :  { %v2086_v44 = vpop.f32.mrb[234].mxu1  ;;  %v3018_v56 = vpop.f32.mrb[128].mxu0 }
 0x2ab   :  { %v2087_v59 = vadd.f32 %v7405_v12, %v2086_v44  ;;  %v3019_v49 = vadd.f32 %v7433_v63, %v3018_v56  ;;  %v5094_v24 = vpop.f32.mrb[235].mxu1  ;;  %5252 = vmatmul.mubr.msk.f32.gmra.mrb[84].mxu1 %vm1369_vm3, %v1337_v11  ;;  %v5315_v5 = vpop.f32.mrb[129].mxu0  ;;  %5473 = vmatmul.mubr.msk.f32.gmra.mrb[234].mxu0 %vm2571_vm4, %v2489_v20  ;;  %v1343_v11 = vmax.f32 %v1176_v23, 0.0  ;;  %v1206_v23 = vadd.f32 %v7464_v29, %v8493_v37 }
 0x2ac   :  { %5254 = vmatprep.mubr.msk.f32.mxu1 %vm5714_vm2, %v5713_v0  ;;  %5475 = vmatprep.mubr.msk.f32.mxu0 %vm5714_vm2, %v5713_v0 }
 0x2ad   :  { %v2490_v19 = vmax.f32 %v2087_v59, 0.0  ;;  %3639 = vst.msk [vmem:[%s8455_s7 + $0x8] sm:$0xff] %vm3637_vm5, %v3019_v49 }
 0x2ae   :  { %v2091_v30 = vpop.f32.mrb[236].mxu1  ;;  %v3023_v51 = vpop.f32.mrb[130].mxu0 }
 0x2af   :  { %v2092_v60 = vadd.f32 %v7405_v12, %v2091_v30  ;;  %v3024_v38 = vadd.f32 %v7433_v63, %v3023_v51  ;;  %v5097_v41 = vpop.f32.mrb[237].mxu1  ;;  %5255 = vmatmul.mubr.msk.f32.gmra.mrb[86].mxu1 %vm1369_vm3, %v1338_v43  ;;  %v5318_v32 = vpop.f32.mrb[131].mxu0  ;;  %5476 = vmatmul.mubr.msk.f32.gmra.mrb[236].mxu0 %vm2571_vm4, %v2490_v19  ;;  %v1344_v43 = vmax.f32 %v1181_v7, 0.0  ;;  %v1211_v7 = vadd.f32 %v7464_v29, %v8494_v22 }
 0x2b0   :  { %5257 = vmatprep.mubr.msk.f32.mxu1 %vm5714_vm2, %v5713_v0  ;;  %5478 = vmatprep.mubr.msk.f32.mxu0 %vm5714_vm2, %v5713_v0 }
 0x2b1   :  { %v2491_v35 = vmax.f32 %v2092_v60, 0.0  ;;  %3640 = vst.msk [vmem:[%s8455_s7 + $0x10] sm:$0xff] %vm3637_vm5, %v3024_v38 }
 0x2b2   :  { %v2096_v55 = vpop.f32.mrb[238].mxu1  ;;  %v3028_v21 = vpop.f32.mrb[132].mxu0 }
 0x2b3   :  { %v2097_v25 = vadd.f32 %v7405_v12, %v2096_v55  ;;  %v3029_v58 = vadd.f32 %v7433_v63, %v3028_v21  ;;  %v5100_v34 = vpop.f32.mrb[239].mxu1  ;;  %5258 = vmatmul.mubr.msk.f32.gmra.mrb[88].mxu1 %vm1369_vm3, %v1339_v26  ;;  %v5321_v39 = vpop.f32.mrb[133].mxu0  ;;  %5479 = vmatmul.mubr.msk.f32.gmra.mrb[238].mxu0 %vm2571_vm4, %v2491_v35  ;;  %v1345_v26 = vmax.f32 %v1186_v48, 0.0  ;;  %v1216_v48 = vadd.f32 %v7464_v29, %v8495_v15 }
 0x2b4   :  { %5260 = vmatprep.mubr.msk.f32.mxu1 %vm5714_vm2, %v5713_v0  ;;  %5481 = vmatprep.mubr.msk.f32.mxu0 %vm5714_vm2, %v5713_v0 }
 0x2b5   :  { %v2492_v36 = vmax.f32 %v2097_v25, 0.0  ;;  %3641 = vst.msk [vmem:[%s8455_s7 + $0x18] sm:$0xff] %vm3637_vm5, %v3029_v58 }
 0x2b6   :  { %v2101_v18 = vpop.f32.mrb[240].mxu1  ;;  %v3033_v42 = vpop.f32.mrb[134].mxu0 }
 0x2b7   :  { %v2102_v40 = vadd.f32 %v7405_v12, %v2101_v18  ;;  %v3034_v16 = vadd.f32 %v7433_v63, %v3033_v42  ;;  %v5103_v47 = vpop.f32.mrb[241].mxu1  ;;  %5261 = vmatmul.mubr.msk.f32.gmra.mrb[90].mxu1 %vm1369_vm3, %v1340_v62  ;;  %v5324_v3 = vpop.f32.mrb[135].mxu0  ;;  %5482 = vmatmul.mubr.msk.f32.gmra.mrb[240].mxu0 %vm2571_vm4, %v2492_v36  ;;  %v1346_v62 = vmax.f32 %v1191_v50, 0.0  ;;  %v1221_v50 = vadd.f32 %v7464_v29, %v8496_v8 }
 0x2b8   :  { %5263 = vmatprep.mubr.msk.f32.mxu1 %vm5714_vm2, %v5713_v0  ;;  %5484 = vmatprep.mubr.msk.f32.mxu0 %vm5714_vm2, %v5713_v0 }
 0x2b9   :  { %v2493_v14 = vmax.f32 %v2102_v40, 0.0  ;;  %3642 = vst.msk [vmem:[%s8455_s7 + $0x20] sm:$0xff] %vm3637_vm5, %v3034_v16 }
 0x2ba   :  { %v2106_v6 = vpop.f32.mrb[242].mxu1  ;;  %v3038_v53 = vpop.f32.mrb[136].mxu0 }
 0x2bb   :  { %v2107_v54 = vadd.f32 %v7405_v12, %v2106_v6  ;;  %v3039_v27 = vadd.f32 %v7433_v63, %v3038_v53  ;;  %v5106_v10 = vpop.f32.mrb[243].mxu1  ;;  %5264 = vmatmul.mubr.msk.f32.gmra.mrb[92].mxu1 %vm1369_vm3, %v1341_v31  ;;  %v5327_v45 = vpop.f32.mrb[137].mxu0  ;;  %5485 = vmatmul.mubr.msk.f32.gmra.mrb[242].mxu0 %vm2571_vm4, %v2493_v14  ;;  %v1347_v31 = vmax.f32 %v1196_v46, 0.0  ;;  %v1226_v46 = vadd.f32 %v7464_v29, %v8497_v2 }
 0x2bc   :  { %5266 = vmatprep.mubr.msk.f32.mxu1 %vm5714_vm2, %v5713_v0  ;;  %5487 = vmatprep.mubr.msk.f32.mxu0 %vm5714_vm2, %v5713_v0 }
 0x2bd   :  { %v2494_v61 = vmax.f32 %v2107_v54, 0.0  ;;  %3643 = vst.msk [vmem:[%s8455_s7 + $0x28] sm:$0xff] %vm3637_vm5, %v3039_v27  ;;  %v1353_v29 = vmax.f32 %v1226_v46, 0.0 }
 0x2be   :  { %v2111_v57 = vpop.f32.mrb[244].mxu1  ;;  %v3043_v1 = vpop.f32.mrb[138].mxu0 }
 0x2bf   :  { %v2112_v9 = vadd.f32 %v7405_v12, %v2111_v57  ;;  %v3044_v13 = vadd.f32 %v7433_v63, %v3043_v1  ;;  %v5109_v17 = vpop.f32.mrb[245].mxu1  ;;  %5267 = vmatmul.mubr.msk.f32.gmra.mrb[94].mxu1 %vm1369_vm3, %v1342_v33  ;;  %v5330_v4 = vpop.f32.mrb[139].mxu0  ;;  %5488 = vmatmul.mubr.msk.f32.gmra.mrb[244].mxu0 %vm2571_vm4, %v2494_v61  ;;  %v1348_v33 = vmax.f32 %v1201_v52, 0.0 }
 0x2c0   :  { %5269 = vmatprep.mubr.msk.f32.mxu1 %vm5714_vm2, %v5713_v0  ;;  %5490 = vmatprep.mubr.msk.f32.mxu0 %vm5714_vm2, %v5713_v0 }
 0x2c1   :  { %v2495_v20 = vmax.f32 %v2112_v9, 0.0  ;;  %3644 = vst.msk [vmem:[%s8455_s7 + $0x30] sm:$0xff] %vm3637_vm5, %v3044_v13 }
 0x2c2   :  { %v2116_v44 = vpop.f32.mrb[246].mxu1  ;;  %v3048_v56 = vpop.f32.mrb[140].mxu0 }
 0x2c3   :  { %v2117_v59 = vadd.f32 %v7405_v12, %v2116_v44  ;;  %v3049_v49 = vadd.f32 %v7433_v63, %v3048_v56  ;;  %v5112_v24 = vpop.f32.mrb[247].mxu1  ;;  %5270 = vmatmul.mubr.msk.f32.gmra.mrb[96].mxu1 %vm1369_vm3, %v1343_v11  ;;  %v5333_v5 = vpop.f32.mrb[141].mxu0  ;;  %5491 = vmatmul.mubr.msk.f32.gmra.mrb[246].mxu0 %vm2571_vm4, %v2495_v20  ;;  %v1349_v11 = vmax.f32 %v1206_v23, 0.0 }
 0x2c4   :  { %5272 = vmatprep.mubr.msk.f32.mxu1 %vm5714_vm2, %v5713_v0  ;;  %5493 = vmatprep.mubr.msk.f32.mxu0 %vm5714_vm2, %v5713_v0 }
 0x2c5   :  { %v2496_v19 = vmax.f32 %v2117_v59, 0.0  ;;  %3645 = vst.msk [vmem:[%s8455_s7 + $0x38] sm:$0xff] %vm3637_vm5, %v3049_v49 }
 0x2c6   :  { %v2121_v30 = vpop.f32.mrb[248].mxu1  ;;  %v3053_v51 = vpop.f32.mrb[142].mxu0 }
 0x2c7   :  { %v2122_v60 = vadd.f32 %v7405_v12, %v2121_v30  ;;  %v3054_v38 = vadd.f32 %v7433_v63, %v3053_v51  ;;  %v5115_v41 = vpop.f32.mrb[249].mxu1  ;;  %5273 = vmatmul.mubr.msk.f32.gmra.mrb[98].mxu1 %vm1369_vm3, %v1344_v43  ;;  %v5336_v32 = vpop.f32.mrb[143].mxu0  ;;  %5494 = vmatmul.mubr.msk.f32.gmra.mrb[248].mxu0 %vm2571_vm4, %v2496_v19  ;;  %v1350_v43 = vmax.f32 %v1211_v7, 0.0 }
 0x2c8   :  { %5275 = vmatprep.mubr.msk.f32.mxu1 %vm5714_vm2, %v5713_v0  ;;  %5496 = vmatprep.mubr.msk.f32.mxu0 %vm5714_vm2, %v5713_v0 }
 0x2c9   :  { %v2497_v35 = vmax.f32 %v2122_v60, 0.0  ;;  %3646 = vst.msk [vmem:[%s8455_s7 + $0x40] sm:$0xff] %vm3637_vm5, %v3054_v38 }
 0x2ca   :  { %v2126_v55 = vpop.f32.mrb[250].mxu1  ;;  %v3058_v21 = vpop.f32.mrb[144].mxu0 }
 0x2cb   :  { %v2127_v25 = vadd.f32 %v7405_v12, %v2126_v55  ;;  %v3059_v58 = vadd.f32 %v7433_v63, %v3058_v21  ;;  %v5118_v34 = vpop.f32.mrb[251].mxu1  ;;  %5276 = vmatmul.mubr.msk.f32.gmra.mrb[100].mxu1 %vm1369_vm3, %v1345_v26  ;;  %v5339_v39 = vpop.f32.mrb[145].mxu0  ;;  %5497 = vmatmul.mubr.msk.f32.gmra.mrb[250].mxu0 %vm2571_vm4, %v2497_v35  ;;  %v1351_v26 = vmax.f32 %v1216_v48, 0.0 }
 0x2cc   :  { %5278 = vmatprep.mubr.msk.f32.mxu1 %vm5714_vm2, %v5713_v0  ;;  %5499 = vmatprep.mubr.msk.f32.mxu0 %vm5714_vm2, %v5713_v0 }
 0x2cd   :  { %v2498_v36 = vmax.f32 %v2127_v25, 0.0  ;;  %3647 = vst.msk [vmem:[%s8455_s7 + $0x48] sm:$0xff] %vm3637_vm5, %v3059_v58 }
 0x2ce   :  { %v2131_v18 = vpop.f32.mrb[252].mxu1  ;;  %v3063_v42 = vpop.f32.mrb[146].mxu0 }
 0x2cf   :  { %v2132_v40 = vadd.f32 %v7405_v12, %v2131_v18  ;;  %v3064_v16 = vadd.f32 %v7433_v63, %v3063_v42  ;;  %v5121_v47 = vpop.f32.mrb[253].mxu1  ;;  %5279 = vmatmul.mubr.msk.f32.gmra.mrb[102].mxu1 %vm1369_vm3, %v1346_v62  ;;  %v5342_v3 = vpop.f32.mrb[147].mxu0  ;;  %5500 = vmatmul.mubr.msk.f32.gmra.mrb[252].mxu0 %vm2571_vm4, %v2498_v36  ;;  %v1352_v62 = vmax.f32 %v1221_v50, 0.0 }
 0x2d0   :  { %5281 = vmatprep.mubr.msk.f32.mxu1 %vm5714_vm2, %v5713_v0  ;;  %5502 = vmatprep.mubr.msk.f32.mxu0 %vm5714_vm2, %v5713_v0 }
 0x2d1   :  { %v2499_v14 = vmax.f32 %v2132_v40, 0.0  ;;  %3648 = vst.msk [vmem:[%s8455_s7 + $0x50] sm:$0xff] %vm3637_vm5, %v3064_v16 }
 0x2d2   :  { %v2136_v6 = vpop.f32.mrb[254].mxu1  ;;  %v3068_v53 = vpop.f32.mrb[148].mxu0 }
 0x2d3   :  { %v2137_v54 = vadd.f32 %v7405_v12, %v2136_v6  ;;  %v3069_v27 = vadd.f32 %v7433_v63, %v3068_v53  ;;  %v5124_v10 = vpop.f32.mrb[255].mxu1  ;;  %5282 = vmatmul.mubr.msk.f32.gmra.mrb[104].mxu1 %vm1369_vm3, %v1347_v31  ;;  %v5345_v45 = vpop.f32.mrb[149].mxu0  ;;  %5503 = vmatmul.mubr.msk.f32.gmra.mrb[254].mxu0 %vm2571_vm4, %v2499_v14 }
 0x2d4   :  { %5284 = vmatprep.mubr.msk.f32.mxu1 %vm5714_vm2, %v5713_v0  ;;  %5505 = vmatprep.mubr.msk.f32.mxu0 %vm5714_vm2, %v5713_v0 }
 0x2d5   :  { %v2500_v61 = vmax.f32 %v2137_v54, 0.0  ;;  %3649 = vst.msk [vmem:[%s8455_s7 + $0x58] sm:$0xff] %vm3637_vm5, %v3069_v27 }
 0x2d6   :  { %v2141_v57 = vpop.f32.mrb[0].mxu1  ;;  %v3073_v1 = vpop.f32.mrb[150].mxu0 }
 0x2d7   :  { %v2142_v9 = vadd.f32 %v7405_v12, %v2141_v57  ;;  %v3074_v13 = vadd.f32 %v7433_v63, %v3073_v1  ;;  %v5127_v17 = vpop.f32.mrb[1].mxu1  ;;  %5285 = vmatmul.mubr.msk.f32.gmra.mrb[106].mxu1 %vm1369_vm3, %v1348_v33  ;;  %v5348_v4 = vpop.f32.mrb[151].mxu0  ;;  %5506 = vmatmul.mubr.msk.f32.gmra.mrb[0].mxu0 %vm2571_vm4, %v2500_v61 }
 0x2d8   :  { %5287 = vmatprep.mubr.msk.f32.mxu1 %vm5714_vm2, %v5713_v0  ;;  %5508 = vmatprep.mubr.msk.f32.mxu0 %vm5714_vm2, %v5713_v0 }
 0x2d9   :  { %v2501_v20 = vmax.f32 %v2142_v9, 0.0  ;;  %3650 = vst.msk [vmem:[%s8455_s7 + $0x60] sm:$0xff] %vm3637_vm5, %v3074_v13 }
 0x2da   :  { %v2146_v44 = vpop.f32.mrb[2].mxu1  ;;  %v3078_v56 = vpop.f32.mrb[152].mxu0 }
 0x2db   :  { %v2147_v59 = vadd.f32 %v7405_v12, %v2146_v44  ;;  %v3079_v49 = vadd.f32 %v7433_v63, %v3078_v56  ;;  %v5130_v24 = vpop.f32.mrb[3].mxu1  ;;  %5288 = vmatmul.mubr.msk.f32.gmra.mrb[108].mxu1 %vm1369_vm3, %v1349_v11  ;;  %v5351_v5 = vpop.f32.mrb[153].mxu0  ;;  %5509 = vmatmul.mubr.msk.f32.gmra.mrb[2].mxu0 %vm2571_vm4, %v2501_v20 }
 0x2dc   :  { %5290 = vmatprep.mubr.msk.f32.mxu1 %vm5714_vm2, %v5713_v0  ;;  %5511 = vmatprep.mubr.msk.f32.mxu0 %vm5714_vm2, %v5713_v0 }
 0x2dd   :  { %v2502_v19 = vmax.f32 %v2147_v59, 0.0  ;;  %3651 = vst.msk [vmem:[%s8455_s7 + $0x68] sm:$0xff] %vm3637_vm5, %v3079_v49 }
 0x2de   :  { %v2151_v30 = vpop.f32.mrb[4].mxu1  ;;  %v3083_v51 = vpop.f32.mrb[154].mxu0 }
 0x2df   :  { %v2152_v60 = vadd.f32 %v7405_v12, %v2151_v30  ;;  %v3084_v38 = vadd.f32 %v7433_v63, %v3083_v51  ;;  %v5133_v41 = vpop.f32.mrb[5].mxu1  ;;  %5291 = vmatmul.mubr.msk.f32.gmra.mrb[110].mxu1 %vm1369_vm3, %v1350_v43  ;;  %v5354_v32 = vpop.f32.mrb[155].mxu0  ;;  %5512 = vmatmul.mubr.msk.f32.gmra.mrb[4].mxu0 %vm2571_vm4, %v2502_v19 }
 0x2e0   :  { %5293 = vmatprep.mubr.msk.f32.mxu1 %vm5714_vm2, %v5713_v0  ;;  %5514 = vmatprep.mubr.msk.f32.mxu0 %vm5714_vm2, %v5713_v0 }
 0x2e1   :  { %v2503_v35 = vmax.f32 %v2152_v60, 0.0  ;;  %3652 = vst.msk [vmem:[%s8455_s7 + $0x70] sm:$0xff] %vm3637_vm5, %v3084_v38 }
 0x2e2   :  { %v2156_v55 = vpop.f32.mrb[6].mxu1  ;;  %v3088_v21 = vpop.f32.mrb[156].mxu0 }
 0x2e3   :  { %v2157_v25 = vadd.f32 %v7405_v12, %v2156_v55  ;;  %v3089_v58 = vadd.f32 %v7433_v63, %v3088_v21  ;;  %v5136_v34 = vpop.f32.mrb[7].mxu1  ;;  %5294 = vmatmul.mubr.msk.f32.gmra.mrb[112].mxu1 %vm1369_vm3, %v1351_v26  ;;  %v5357_v39 = vpop.f32.mrb[157].mxu0  ;;  %5515 = vmatmul.mubr.msk.f32.gmra.mrb[6].mxu0 %vm2571_vm4, %v2503_v35 }
 0x2e4   :  { %5296 = vmatprep.mubr.msk.f32.mxu1 %vm5714_vm2, %v5713_v0  ;;  %5517 = vmatprep.mubr.msk.f32.mxu0 %vm5714_vm2, %v5713_v0 }
 0x2e5   :  { %v2504_v36 = vmax.f32 %v2157_v25, 0.0  ;;  %3653 = vst.msk [vmem:[%s8455_s7 + $0x78] sm:$0xff] %vm3637_vm5, %v3089_v58 }
 0x2e6   :  { %v2161_v18 = vpop.f32.mrb[8].mxu1  ;;  %v3093_v42 = vpop.f32.mrb[158].mxu0 }
 0x2e7   :  { %v2162_v40 = vadd.f32 %v7405_v12, %v2161_v18  ;;  %v3094_v16 = vadd.f32 %v7433_v63, %v3093_v42  ;;  %v5139_v47 = vpop.f32.mrb[9].mxu1  ;;  %5297 = vmatmul.mubr.msk.f32.gmra.mrb[114].mxu1 %vm1369_vm3, %v1352_v62  ;;  %v5360_v3 = vpop.f32.mrb[159].mxu0  ;;  %5518 = vmatmul.mubr.msk.f32.gmra.mrb[8].mxu0 %vm2571_vm4, %v2504_v36 }
 0x2e8   :  { %5299 = vmatprep.mubr.msk.f32.mxu1 %vm5714_vm2, %v5713_v0  ;;  %5520 = vmatprep.mubr.msk.f32.mxu0 %vm5714_vm2, %v5713_v0 }
 0x2e9   :  { %v2505_v31 = vmax.f32 %v2162_v40, 0.0  ;;  %3654 = vst.msk [vmem:[%s8455_s7 + $0x80] sm:$0xff] %vm3637_vm5, %v3094_v16 }
 0x2ea   :  { %v2166_v28 = vpop.f32.mrb[10].mxu1  ;;  %v3098_v52 = vpop.f32.mrb[160].mxu0 }
 0x2eb   :  { %v2167_v14 = vadd.f32 %v7405_v12, %v2166_v28  ;;  %v3099_v6 = vadd.f32 %v7433_v63, %v3098_v52  ;;  %v5142_v53 = vpop.f32.mrb[11].mxu1  ;;  %5300 = vmatmul.mubr.msk.f32.gmra.mrb[116].mxu1 %vm1369_vm3, %v1353_v29  ;;  %v5363_v54 = vpop.f32.mrb[161].mxu0  ;;  %5521 = vmatmul.mubr.msk.f32.gmra.mrb[10].mxu0 %vm2571_vm4, %v2505_v31 }
 0x2ec   :  { %5523 = vmatprep.mubr.msk.f32.mxu0 %vm5714_vm2, %v5713_v0 }
 0x2ed   :  { %v2506_v27 = vmax.f32 %v2167_v14, 0.0  ;;  %3655 = vst.msk [vmem:[%s8455_s7 + $0x88] sm:$0xff] %vm3637_vm5, %v3099_v6 }
 0x2ee   :  { %v2171_v10 = vpop.f32.mrb[12].mxu1  ;;  %v3103_v45 = vpop.f32.mrb[162].mxu0 }
 0x2ef   :  { %v2172_v33 = vadd.f32 %v7405_v12, %v2171_v10  ;;  %v3104_v37 = vadd.f32 %v7433_v63, %v3103_v45  ;;  %v5145_v23 = vpop.f32.mrb[13].mxu1  ;;  %v5366_v61 = vpop.f32.mrb[163].mxu0  ;;  %5524 = vmatmul.mubr.msk.f32.gmra.mrb[12].mxu0 %vm2571_vm4, %v2506_v27 }
 0x2f0   :  { %5526 = vmatprep.mubr.msk.f32.mxu0 %vm5714_vm2, %v5713_v0 }
 0x2f1   :  { %v2507_v57 = vmax.f32 %v2172_v33, 0.0  ;;  %3656 = vst.msk [vmem:[%s8455_s7 + $0x90] sm:$0xff] %vm3637_vm5, %v3104_v37 }
 0x2f2   :  { %v2176_v1 = vpop.f32.mrb[14].mxu1  ;;  %v3108_v9 = vpop.f32.mrb[164].mxu0 }
 0x2f3   :  { %v2177_v13 = vadd.f32 %v7405_v12, %v2176_v1  ;;  %v3109_v17 = vadd.f32 %v7433_v63, %v3108_v9  ;;  %v5148_v4 = vpop.f32.mrb[15].mxu1  ;;  %v5369_v11 = vpop.f32.mrb[165].mxu0  ;;  %5527 = vmatmul.mubr.msk.f32.gmra.mrb[14].mxu0 %vm2571_vm4, %v2507_v57 }
 0x2f4   :  { %5529 = vmatprep.mubr.msk.f32.mxu0 %vm5714_vm2, %v5713_v0 }
 0x2f5   :  { %v2508_v22 = vmax.f32 %v2177_v13, 0.0  ;;  %3657 = vst.msk [vmem:[%s8455_s7 + $0x98] sm:$0xff] %vm3637_vm5, %v3109_v17 }
 0x2f6   :  { %v2181_v7 = vpop.f32.mrb[16].mxu1  ;;  %v3113_v20 = vpop.f32.mrb[166].mxu0 }
 0x2f7   :  { %v2182_v44 = vadd.f32 %v7405_v12, %v2181_v7  ;;  %v3114_v56 = vadd.f32 %v7433_v63, %v3113_v20  ;;  %v5151_v59 = vpop.f32.mrb[17].mxu1  ;;  %v5372_v49 = vpop.f32.mrb[167].mxu0  ;;  %5530 = vmatmul.mubr.msk.f32.gmra.mrb[16].mxu0 %vm2571_vm4, %v2508_v22 }
 0x2f8   :  { %5532 = vmatprep.mubr.msk.f32.mxu0 %vm5714_vm2, %v5713_v0 }
 0x2f9   :  { %v2509_v24 = vmax.f32 %v2182_v44, 0.0  ;;  %3658 = vst.msk [vmem:[%s8455_s7 + $0xa0] sm:$0xff] %vm3637_vm5, %v3114_v56 }
 0x2fa   :  { %v2186_v5 = vpop.f32.mrb[18].mxu1  ;;  %v3118_v43 = vpop.f32.mrb[168].mxu0 }
 0x2fb   :  { %v2187_v15 = vadd.f32 %v7405_v12, %v2186_v5  ;;  %v3119_v48 = vadd.f32 %v7433_v63, %v3118_v43  ;;  %v5154_v19 = vpop.f32.mrb[19].mxu1  ;;  %v5375_v30 = vpop.f32.mrb[169].mxu0  ;;  %5533 = vmatmul.mubr.msk.f32.gmra.mrb[18].mxu0 %vm2571_vm4, %v2509_v24 }
 0x2fc   :  { %5535 = vmatprep.mubr.msk.f32.mxu0 %vm5714_vm2, %v5713_v0 }
 0x2fd   :  { %v2510_v51 = vmax.f32 %v2187_v15, 0.0  ;;  %3659 = vst.msk [vmem:[%s8455_s7 + $0xa8] sm:$0xff] %vm3637_vm5, %v3119_v48 }
 0x2fe   :  { %v2191_v60 = vpop.f32.mrb[20].mxu1  ;;  %v3123_v38 = vpop.f32.mrb[170].mxu0 }
 0x2ff   :  { %v2192_v41 = vadd.f32 %v7405_v12, %v2191_v60  ;;  %v3124_v32 = vadd.f32 %v7433_v63, %v3123_v38  ;;  %v5157_v26 = vpop.f32.mrb[21].mxu1  ;;  %v5378_v8 = vpop.f32.mrb[171].mxu0  ;;  %5536 = vmatmul.mubr.msk.f32.gmra.mrb[20].mxu0 %vm2571_vm4, %v2510_v51 }
 0x300   :  { %5538 = vmatprep.mubr.msk.f32.mxu0 %vm5714_vm2, %v5713_v0 }
 0x301   :  { %v2511_v50 = vmax.f32 %v2192_v41, 0.0  ;;  %3660 = vst.msk [vmem:[%s8455_s7 + $0xb0] sm:$0xff] %vm3637_vm5, %v3124_v32 }
 0x302   :  { %v2196_v35 = vpop.f32.mrb[22].mxu1  ;;  %v3128_v55 = vpop.f32.mrb[172].mxu0 }
 0x303   :  { %v2197_v21 = vadd.f32 %v7405_v12, %v2196_v35  ;;  %v3129_v25 = vadd.f32 %v7433_v63, %v3128_v55  ;;  %v5160_v58 = vpop.f32.mrb[23].mxu1  ;;  %v5381_v34 = vpop.f32.mrb[173].mxu0  ;;  %5539 = vmatmul.mubr.msk.f32.gmra.mrb[22].mxu0 %vm2571_vm4, %v2511_v50 }
 0x304   :  { %5541 = vmatprep.mubr.msk.f32.mxu0 %vm5714_vm2, %v5713_v0 }
 0x305   :  { %v2512_v39 = vmax.f32 %v2197_v21, 0.0  ;;  %3661 = vst.msk [vmem:[%s8455_s7 + $0xb8] sm:$0xff] %vm3637_vm5, %v3129_v25 }
 0x306   :  { %v2201_v62 = vpop.f32.mrb[24].mxu1  ;;  %v3133_v2 = vpop.f32.mrb[174].mxu0 }
 0x307   :  { %v2202_v46 = vadd.f32 %v7405_v12, %v2201_v62  ;;  %v3134_v36 = vadd.f32 %v7433_v63, %v3133_v2  ;;  %v5163_v18 = vpop.f32.mrb[25].mxu1  ;;  %v5384_v42 = vpop.f32.mrb[175].mxu0  ;;  %5542 = vmatmul.mubr.msk.f32.gmra.mrb[24].mxu0 %vm2571_vm4, %v2512_v39 }
 0x308   :  { %5544 = vmatprep.mubr.msk.f32.mxu0 %vm5714_vm2, %v5713_v0 }
 0x309   :  { %v2513_v40 = vmax.f32 %v2202_v46, 0.0  ;;  %3662 = vst.msk [vmem:[%s8455_s7 + $0xc0] sm:$0xff] %vm3637_vm5, %v3134_v36 }
 0x30a   :  { %v2206_v16 = vpop.f32.mrb[26].mxu1  ;;  %v3138_v47 = vpop.f32.mrb[176].mxu0 }
 0x30b   :  { %v2207_v3 = vadd.f32 %v7405_v12, %v2206_v16  ;;  %v3139_v29 = vadd.f32 %v7433_v63, %v3138_v47  ;;  %v5166_v31 = vpop.f32.mrb[27].mxu1  ;;  %v5387_v28 = vpop.f32.mrb[177].mxu0  ;;  %5545 = vmatmul.mubr.msk.f32.gmra.mrb[26].mxu0 %vm2571_vm4, %v2513_v40 }
 0x30c   :  { %5547 = vmatprep.mubr.msk.f32.mxu0 %vm5714_vm2, %v5713_v0 }
 0x30d   :  { %v2514_v52 = vmax.f32 %v2207_v3, 0.0  ;;  %3663 = vst.msk [vmem:[%s8455_s7 + $0xc8] sm:$0xff] %vm3637_vm5, %v3139_v29 }
 0x30e   :  { %v2211_v14 = vpop.f32.mrb[28].mxu1  ;;  %v3143_v6 = vpop.f32.mrb[178].mxu0 }
 0x30f   :  { %v2212_v53 = vadd.f32 %v7405_v12, %v2211_v14  ;;  %v3144_v54 = vadd.f32 %v7433_v63, %v3143_v6  ;;  %v5169_v27 = vpop.f32.mrb[29].mxu1  ;;  %v5390_v10 = vpop.f32.mrb[179].mxu0  ;;  %5548 = vmatmul.mubr.msk.f32.gmra.mrb[28].mxu0 %vm2571_vm4, %v2514_v52 }
 0x310   :  { %5550 = vmatprep.mubr.msk.f32.mxu0 %vm5714_vm2, %v5713_v0 }
 0x311   :  { %v2515_v45 = vmax.f32 %v2212_v53, 0.0  ;;  %3664 = vst.msk [vmem:[%s8455_s7 + $0xd0] sm:$0xff] %vm3637_vm5, %v3144_v54 }
 0x312   :  { %v2216_v33 = vpop.f32.mrb[30].mxu1  ;;  %v3148_v37 = vpop.f32.mrb[180].mxu0 }
 0x313   :  { %v2217_v23 = vadd.f32 %v7405_v12, %v2216_v33  ;;  %v3149_v61 = vadd.f32 %v7433_v63, %v3148_v37  ;;  %v5172_v57 = vpop.f32.mrb[31].mxu1  ;;  %v5393_v1 = vpop.f32.mrb[181].mxu0  ;;  %5551 = vmatmul.mubr.msk.f32.gmra.mrb[30].mxu0 %vm2571_vm4, %v2515_v45 }
 0x314   :  { %5553 = vmatprep.mubr.msk.f32.mxu0 %vm5714_vm2, %v5713_v0 }
 0x315   :  { %v2516_v9 = vmax.f32 %v2217_v23, 0.0  ;;  %3665 = vst.msk [vmem:[%s8455_s7 + $0xd8] sm:$0xff] %vm3637_vm5, %v3149_v61 }
 0x316   :  { %v2221_v13 = vpop.f32.mrb[32].mxu1  ;;  %v3153_v17 = vpop.f32.mrb[182].mxu0 }
 0x317   :  { %v2222_v4 = vadd.f32 %v7405_v12, %v2221_v13  ;;  %v3154_v11 = vadd.f32 %v7433_v63, %v3153_v17  ;;  %v5175_v22 = vpop.f32.mrb[33].mxu1  ;;  %v5396_v7 = vpop.f32.mrb[183].mxu0  ;;  %5554 = vmatmul.mubr.msk.f32.gmra.mrb[32].mxu0 %vm2571_vm4, %v2516_v9 }
 0x318   :  { %5556 = vmatprep.mubr.msk.f32.mxu0 %vm5714_vm2, %v5713_v0 }
 0x319   :  { %v2517_v20 = vmax.f32 %v2222_v4, 0.0  ;;  %3666 = vst.msk [vmem:[%s8455_s7 + $0xe0] sm:$0xff] %vm3637_vm5, %v3154_v11 }
 0x31a   :  { %v2226_v44 = vpop.f32.mrb[34].mxu1  ;;  %v3158_v56 = vpop.f32.mrb[184].mxu0 }
 0x31b   :  { %v2227_v59 = vadd.f32 %v7405_v12, %v2226_v44  ;;  %v3159_v49 = vadd.f32 %v7433_v63, %v3158_v56  ;;  %v5178_v24 = vpop.f32.mrb[35].mxu1  ;;  %v5399_v5 = vpop.f32.mrb[185].mxu0  ;;  %5557 = vmatmul.mubr.msk.f32.gmra.mrb[34].mxu0 %vm2571_vm4, %v2517_v20 }
 0x31c   :  { %5559 = vmatprep.mubr.msk.f32.mxu0 %vm5714_vm2, %v5713_v0 }
 0x31d   :  { %v2518_v43 = vmax.f32 %v2227_v59, 0.0  ;;  %3667 = vst.msk [vmem:[%s8455_s7 + $0xe8] sm:$0xff] %vm3637_vm5, %v3159_v49 }
 0x31e   :  { %v2231_v15 = vpop.f32.mrb[36].mxu1  ;;  %v3163_v48 = vpop.f32.mrb[186].mxu0 }
 0x31f   :  { %v2232_v19 = vadd.f32 %v7405_v12, %v2231_v15  ;;  %v3164_v30 = vadd.f32 %v7433_v63, %v3163_v48  ;;  %v5181_v51 = vpop.f32.mrb[37].mxu1  ;;  %v5402_v60 = vpop.f32.mrb[187].mxu0  ;;  %5560 = vmatmul.mubr.msk.f32.gmra.mrb[36].mxu0 %vm2571_vm4, %v2518_v43 }
 0x320   :  { %5562 = vmatprep.mubr.msk.f32.mxu0 %vm5714_vm2, %v5713_v0 }
 0x321   :  { %v2519_v38 = vmax.f32 %v2232_v19, 0.0  ;;  %3668 = vst.msk [vmem:[%s8455_s7 + $0xf0] sm:$0xff] %vm3637_vm5, %v3164_v30 }
 0x322   :  { %v2236_v41 = vpop.f32.mrb[38].mxu1  ;;  %v3168_v32 = vpop.f32.mrb[188].mxu0 }
 0x323   :  { %v2237_v26 = vadd.f32 %v7405_v12, %v2236_v41  ;;  %v3169_v8 = vadd.f32 %v7433_v63, %v3168_v32  ;;  %v5184_v50 = vpop.f32.mrb[39].mxu1  ;;  %v5405_v35 = vpop.f32.mrb[189].mxu0  ;;  %5563 = vmatmul.mubr.msk.f32.gmra.mrb[38].mxu0 %vm2571_vm4, %v2519_v38 }
 0x324   :  { %5565 = vmatprep.mubr.msk.f32.mxu0 %vm5714_vm2, %v5713_v0 }
 0x325   :  { %v2520_v55 = vmax.f32 %v2237_v26, 0.0  ;;  %3669 = vst.msk [vmem:[%s8455_s7 + $0xf8] sm:$0xff] %vm3637_vm5, %v3169_v8 }
 0x326   :  { %v2241_v21 = vpop.f32.mrb[40].mxu1  ;;  %v3173_v25 = vpop.f32.mrb[190].mxu0 }
 0x327   :  { %v2242_v58 = vadd.f32 %v7405_v12, %v2241_v21  ;;  %v3174_v34 = vadd.f32 %v7433_v63, %v3173_v25  ;;  %v5187_v39 = vpop.f32.mrb[41].mxu1  ;;  %v5408_v62 = vpop.f32.mrb[191].mxu0  ;;  %5566 = vmatmul.mubr.msk.f32.gmra.mrb[40].mxu0 %vm2571_vm4, %v2520_v55 }
 0x328   :  { %5568 = vmatprep.mubr.msk.f32.mxu0 %vm5714_vm2, %v5713_v0 }
 0x329   :  { %v2521_v2 = vmax.f32 %v2242_v58, 0.0  ;;  %3670 = vst.msk [vmem:[%s8455_s7 + $0x100] sm:$0xff] %vm3637_vm5, %v3174_v34 }
 0x32a   :  { %v2246_v46 = vpop.f32.mrb[42].mxu1  ;;  %v3178_v36 = vpop.f32.mrb[192].mxu0 }
 0x32b   :  { %v2247_v18 = vadd.f32 %v7405_v12, %v2246_v46  ;;  %v3179_v42 = vadd.f32 %v7433_v63, %v3178_v36  ;;  %v5190_v40 = vpop.f32.mrb[43].mxu1  ;;  %v5411_v16 = vpop.f32.mrb[193].mxu0  ;;  %5569 = vmatmul.mubr.msk.f32.gmra.mrb[42].mxu0 %vm2571_vm4, %v2521_v2 }
 0x32c   :  { %5571 = vmatprep.mubr.msk.f32.mxu0 %vm5714_vm2, %v5713_v0 }
 0x32d   :  { %v2522_v47 = vmax.f32 %v2247_v18, 0.0  ;;  %3671 = vst.msk [vmem:[%s8455_s7 + $0x108] sm:$0xff] %vm3637_vm5, %v3179_v42 }
 0x32e   :  { %v2251_v3 = vpop.f32.mrb[44].mxu1  ;;  %v3183_v29 = vpop.f32.mrb[194].mxu0 }
 0x32f   :  { %v2252_v31 = vadd.f32 %v7405_v12, %v2251_v3  ;;  %v3184_v28 = vadd.f32 %v7433_v63, %v3183_v29  ;;  %v5193_v52 = vpop.f32.mrb[45].mxu1  ;;  %v5414_v14 = vpop.f32.mrb[195].mxu0  ;;  %5572 = vmatmul.mubr.msk.f32.gmra.mrb[44].mxu0 %vm2571_vm4, %v2522_v47 }
 0x330   :  { %5574 = vmatprep.mubr.msk.f32.mxu0 %vm5714_vm2, %v5713_v0 }
 0x331   :  { %v2523_v6 = vmax.f32 %v2252_v31, 0.0  ;;  %3672 = vst.msk [vmem:[%s8455_s7 + $0x110] sm:$0xff] %vm3637_vm5, %v3184_v28 }
 0x332   :  { %v2256_v53 = vpop.f32.mrb[46].mxu1  ;;  %v3188_v54 = vpop.f32.mrb[196].mxu0 }
 0x333   :  { %v2257_v27 = vadd.f32 %v7405_v12, %v2256_v53  ;;  %v3189_v10 = vadd.f32 %v7433_v63, %v3188_v54  ;;  %v5196_v45 = vpop.f32.mrb[47].mxu1  ;;  %v5417_v33 = vpop.f32.mrb[197].mxu0  ;;  %5575 = vmatmul.mubr.msk.f32.gmra.mrb[46].mxu0 %vm2571_vm4, %v2523_v6 }
 0x334   :  { %5577 = vmatprep.mubr.msk.f32.mxu0 %vm5714_vm2, %v5713_v0 }
 0x335   :  { %v2524_v37 = vmax.f32 %v2257_v27, 0.0  ;;  %3673 = vst.msk [vmem:[%s8455_s7 + $0x118] sm:$0xff] %vm3637_vm5, %v3189_v10 }
 0x336   :  { %v2261_v23 = vpop.f32.mrb[48].mxu1  ;;  %v3193_v61 = vpop.f32.mrb[198].mxu0 }
 0x337   :  { %v2262_v57 = vadd.f32 %v7405_v12, %v2261_v23  ;;  %v3194_v1 = vadd.f32 %v7433_v63, %v3193_v61  ;;  %v5199_v9 = vpop.f32.mrb[49].mxu1  ;;  %v5420_v13 = vpop.f32.mrb[199].mxu0  ;;  %5578 = vmatmul.mubr.msk.f32.gmra.mrb[48].mxu0 %vm2571_vm4, %v2524_v37 }
 0x338   :  { %5580 = vmatprep.mubr.msk.f32.mxu0 %vm5714_vm2, %v5713_v0 }
 0x339   :  { %v2525_v17 = vmax.f32 %v2262_v57, 0.0  ;;  %3674 = vst.msk [vmem:[%s8455_s7 + $0x120] sm:$0xff] %vm3637_vm5, %v3194_v1 }
 0x33a   :  { %v2266_v4 = vpop.f32.mrb[50].mxu1  ;;  %v3198_v11 = vpop.f32.mrb[200].mxu0 }
 0x33b   :  { %v2267_v22 = vadd.f32 %v7405_v12, %v2266_v4  ;;  %v3199_v7 = vadd.f32 %v7433_v63, %v3198_v11  ;;  %v5202_v20 = vpop.f32.mrb[51].mxu1  ;;  %v5423_v44 = vpop.f32.mrb[201].mxu0  ;;  %5581 = vmatmul.mubr.msk.f32.gmra.mrb[50].mxu0 %vm2571_vm4, %v2525_v17 }
 0x33c   :  { %5583 = vmatprep.mubr.msk.f32.mxu0 %vm5714_vm2, %v5713_v0 }
 0x33d   :  { %v2526_v56 = vmax.f32 %v2267_v22, 0.0  ;;  %3675 = vst.msk [vmem:[%s8455_s7 + $0x128] sm:$0xff] %vm3637_vm5, %v3199_v7 }
 0x33e   :  { %v2271_v59 = vpop.f32.mrb[52].mxu1  ;;  %v3203_v49 = vpop.f32.mrb[202].mxu0 }
 0x33f   :  { %v2272_v24 = vadd.f32 %v7405_v12, %v2271_v59  ;;  %v3204_v5 = vadd.f32 %v7433_v63, %v3203_v49  ;;  %v5205_v43 = vpop.f32.mrb[53].mxu1  ;;  %v5426_v15 = vpop.f32.mrb[203].mxu0  ;;  %5584 = vmatmul.mubr.msk.f32.gmra.mrb[52].mxu0 %vm2571_vm4, %v2526_v56 }
 0x340   :  { %5586 = vmatprep.mubr.msk.f32.mxu0 %vm5714_vm2, %v5713_v0 }
 0x341   :  { %v2527_v48 = vmax.f32 %v2272_v24, 0.0  ;;  %3676 = vst.msk [vmem:[%s8455_s7 + $0x130] sm:$0xff] %vm3637_vm5, %v3204_v5 }
 0x342   :  { %v2276_v19 = vpop.f32.mrb[54].mxu1  ;;  %v3208_v30 = vpop.f32.mrb[204].mxu0 }
 0x343   :  { %v2277_v51 = vadd.f32 %v7405_v12, %v2276_v19  ;;  %v3209_v60 = vadd.f32 %v7433_v63, %v3208_v30  ;;  %v5208_v38 = vpop.f32.mrb[55].mxu1  ;;  %v5429_v41 = vpop.f32.mrb[205].mxu0  ;;  %5587 = vmatmul.mubr.msk.f32.gmra.mrb[54].mxu0 %vm2571_vm4, %v2527_v48 }
 0x344   :  { %5589 = vmatprep.mubr.msk.f32.mxu0 %vm5714_vm2, %v5713_v0 }
 0x345   :  { %v2528_v32 = vmax.f32 %v2277_v51, 0.0  ;;  %3677 = vst.msk [vmem:[%s8455_s7 + $0x138] sm:$0xff] %vm3637_vm5, %v3209_v60 }
 0x346   :  { %v2281_v26 = vpop.f32.mrb[56].mxu1  ;;  %v3213_v8 = vpop.f32.mrb[206].mxu0 }
 0x347   :  { %v2282_v50 = vadd.f32 %v7405_v12, %v2281_v26  ;;  %v3214_v35 = vadd.f32 %v7433_v63, %v3213_v8  ;;  %v5211_v55 = vpop.f32.mrb[57].mxu1  ;;  %v5432_v21 = vpop.f32.mrb[207].mxu0  ;;  %5590 = vmatmul.mubr.msk.f32.gmra.mrb[56].mxu0 %vm2571_vm4, %v2528_v32  ;;  %v7900_v12 = vld [vmem:[%s8453_s4] ss:$0 sm:$0xff] }
 0x348   :  { %5592 = vmatprep.mubr.msk.f32.mxu0 %vm5714_vm2, %v5713_v0 }
 0x349   :  { %v2529_v25 = vmax.f32 %v2282_v50, 0.0  ;;  %3678 = vst.msk [vmem:[%s8455_s7 + $0x140] sm:$0xff] %vm3637_vm5, %v3214_v35 }
 0x34a   :  { %v2286_v58 = vpop.f32.mrb[58].mxu1  ;;  %v3218_v34 = vpop.f32.mrb[208].mxu0 }
 0x34b   :  { %v2287_v39 = vadd.f32 %v7900_v12, %v2286_v58  ;;  %v3219_v62 = vadd.f32 %v7433_v63, %v3218_v34  ;;  %v5214_v2 = vpop.f32.mrb[59].mxu1  ;;  %v5435_v46 = vpop.f32.mrb[209].mxu0  ;;  %5593 = vmatmul.mubr.msk.f32.gmra.mrb[58].mxu0 %vm2571_vm4, %v2529_v25 }
 0x34c   :  { %5595 = vmatprep.mubr.msk.f32.mxu0 %vm5714_vm2, %v5713_v0 }
 0x34d   :  { %v2530_v36 = vmax.f32 %v2287_v39, 0.0  ;;  %3679 = vst.msk [vmem:[%s8455_s7 + $0x148] sm:$0xff] %vm3637_vm5, %v3219_v62 }
 0x34e   :  { %v2291_v18 = vpop.f32.mrb[60].mxu1  ;;  %v3223_v42 = vpop.f32.mrb[210].mxu0 }
 0x34f   :  { %v2292_v40 = vadd.f32 %v7900_v12, %v2291_v18  ;;  %v3224_v16 = vadd.f32 %v7433_v63, %v3223_v42  ;;  %v5217_v47 = vpop.f32.mrb[61].mxu1  ;;  %v5438_v3 = vpop.f32.mrb[211].mxu0  ;;  %5596 = vmatmul.mubr.msk.f32.gmra.mrb[60].mxu0 %vm2571_vm4, %v2530_v36 }
 0x350   :  { %5598 = vmatprep.mubr.msk.f32.mxu0 %vm5714_vm2, %v5713_v0 }
 0x351   :  { %v2531_v29 = vmax.f32 %v2292_v40, 0.0  ;;  %3680 = vst.msk [vmem:[%s8455_s7 + $0x150] sm:$0xff] %vm3637_vm5, %v3224_v16 }
 0x352   :  { %v2296_v31 = vpop.f32.mrb[62].mxu1  ;;  %v3228_v28 = vpop.f32.mrb[212].mxu0 }
 0x353   :  { %v2297_v52 = vadd.f32 %v7900_v12, %v2296_v31  ;;  %v3229_v14 = vadd.f32 %v7433_v63, %v3228_v28  ;;  %v5220_v6 = vpop.f32.mrb[63].mxu1  ;;  %v5441_v53 = vpop.f32.mrb[213].mxu0  ;;  %5599 = vmatmul.mubr.msk.f32.gmra.mrb[62].mxu0 %vm2571_vm4, %v2531_v29  ;;  %v7933_v63 = vld [vmem:[%s8454_s6] ss:$0 sm:$0xff] }
 0x354   :  { %5601 = vmatprep.mubr.msk.f32.mxu0 %vm5714_vm2, %v5713_v0 }
 0x355   :  { %v2532_v54 = vmax.f32 %v2297_v52, 0.0  ;;  %3681 = vst.msk [vmem:[%s8455_s7 + $0x158] sm:$0xff] %vm3637_vm5, %v3229_v14 }
 0x356   :  { %v2301_v27 = vpop.f32.mrb[64].mxu1  ;;  %v3233_v10 = vpop.f32.mrb[214].mxu0 }
 0x357   :  { %v2302_v45 = vadd.f32 %v7900_v12, %v2301_v27  ;;  %v3234_v33 = vadd.f32 %v7933_v63, %v3233_v10  ;;  %v5223_v37 = vpop.f32.mrb[65].mxu1  ;;  %v5444_v23 = vpop.f32.mrb[215].mxu0  ;;  %5602 = vmatmul.mubr.msk.f32.gmra.mrb[64].mxu0 %vm2571_vm4, %v2532_v54 }
 0x358   :  { %5604 = vmatprep.mubr.msk.f32.mxu0 %vm5714_vm2, %v5713_v0 }
 0x359   :  { %v2533_v61 = vmax.f32 %v2302_v45, 0.0  ;;  %3682 = vst.msk [vmem:[%s8455_s7 + $0x160] sm:$0xff] %vm3637_vm5, %v3234_v33 }
 0x35a   :  { %v2306_v57 = vpop.f32.mrb[66].mxu1  ;;  %v3238_v1 = vpop.f32.mrb[216].mxu0 }
 0x35b   :  { %v2307_v9 = vadd.f32 %v7900_v12, %v2306_v57  ;;  %v3239_v13 = vadd.f32 %v7933_v63, %v3238_v1  ;;  %v5226_v17 = vpop.f32.mrb[67].mxu1  ;;  %v5447_v4 = vpop.f32.mrb[217].mxu0  ;;  %5605 = vmatmul.mubr.msk.f32.gmra.mrb[66].mxu0 %vm2571_vm4, %v2533_v61 }
 0x35c   :  { %5607 = vmatprep.mubr.msk.f32.mxu0 %vm5714_vm2, %v5713_v0 }
 0x35d   :  { %v2534_v11 = vmax.f32 %v2307_v9, 0.0  ;;  %3683 = vst.msk [vmem:[%s8455_s7 + $0x168] sm:$0xff] %vm3637_vm5, %v3239_v13 }
 0x35e   :  { %v2311_v22 = vpop.f32.mrb[68].mxu1  ;;  %v3243_v7 = vpop.f32.mrb[218].mxu0 }
 0x35f   :  { %v2312_v20 = vadd.f32 %v7900_v12, %v2311_v22  ;;  %v3244_v44 = vadd.f32 %v7933_v63, %v3243_v7  ;;  %v5229_v56 = vpop.f32.mrb[69].mxu1  ;;  %v5450_v59 = vpop.f32.mrb[219].mxu0  ;;  %5608 = vmatmul.mubr.msk.f32.gmra.mrb[68].mxu0 %vm2571_vm4, %v2534_v11 }
 0x360   :  { %5610 = vmatprep.mubr.msk.f32.mxu0 %vm5714_vm2, %v5713_v0 }
 0x361   :  { %v2535_v49 = vmax.f32 %v2312_v20, 0.0  ;;  %3684 = vst.msk [vmem:[%s8455_s7 + $0x170] sm:$0xff] %vm3637_vm5, %v3244_v44 }
 0x362   :  { %v2316_v24 = vpop.f32.mrb[70].mxu1  ;;  %v3248_v5 = vpop.f32.mrb[220].mxu0 }
 0x363   :  { %v2317_v43 = vadd.f32 %v7900_v12, %v2316_v24  ;;  %v3249_v15 = vadd.f32 %v7933_v63, %v3248_v5  ;;  %v5232_v48 = vpop.f32.mrb[71].mxu1  ;;  %v5453_v19 = vpop.f32.mrb[221].mxu0  ;;  %5611 = vmatmul.mubr.msk.f32.gmra.mrb[70].mxu0 %vm2571_vm4, %v2535_v49 }
 0x364   :  { %5613 = vmatprep.mubr.msk.f32.mxu0 %vm5714_vm2, %v5713_v0 }
 0x365   :  { %v2536_v30 = vmax.f32 %v2317_v43, 0.0  ;;  %3685 = vst.msk [vmem:[%s8455_s7 + $0x178] sm:$0xff] %vm3637_vm5, %v3249_v15 }
 0x366   :  { %v2321_v51 = vpop.f32.mrb[72].mxu1  ;;  %v3253_v60 = vpop.f32.mrb[222].mxu0 }
 0x367   :  { %v2322_v38 = vadd.f32 %v7900_v12, %v2321_v51  ;;  %v3254_v41 = vadd.f32 %v7933_v63, %v3253_v60  ;;  %v5235_v32 = vpop.f32.mrb[73].mxu1  ;;  %v5456_v26 = vpop.f32.mrb[223].mxu0  ;;  %5614 = vmatmul.mubr.msk.f32.gmra.mrb[72].mxu0 %vm2571_vm4, %v2536_v30 }
 0x368   :  { %5616 = vmatprep.mubr.msk.f32.mxu0 %vm5714_vm2, %v5713_v0 }
 0x369   :  { %v2537_v8 = vmax.f32 %v2322_v38, 0.0  ;;  %3686 = vst.msk [vmem:[%s8455_s7 + $0x180] sm:$0xff] %vm3637_vm5, %v3254_v41 }
 0x36a   :  { %v2326_v50 = vpop.f32.mrb[74].mxu1  ;;  %v3258_v35 = vpop.f32.mrb[224].mxu0 }
 0x36b   :  { %v2327_v55 = vadd.f32 %v7900_v12, %v2326_v50  ;;  %v3259_v21 = vadd.f32 %v7933_v63, %v3258_v35  ;;  %v5238_v25 = vpop.f32.mrb[75].mxu1  ;;  %v5459_v58 = vpop.f32.mrb[225].mxu0  ;;  %5617 = vmatmul.mubr.msk.f32.gmra.mrb[74].mxu0 %vm2571_vm4, %v2537_v8 }
 0x36c   :  { %5619 = vmatprep.mubr.msk.f32.mxu0 %vm5714_vm2, %v5713_v0 }
 0x36d   :  { %v2538_v34 = vmax.f32 %v2327_v55, 0.0  ;;  %3687 = vst.msk [vmem:[%s8455_s7 + $0x188] sm:$0xff] %vm3637_vm5, %v3259_v21 }
 0x36e   :  { %v2331_v39 = vpop.f32.mrb[76].mxu1  ;;  %v3263_v62 = vpop.f32.mrb[226].mxu0 }
 0x36f   :  { %v2332_v2 = vadd.f32 %v7900_v12, %v2331_v39  ;;  %v3264_v46 = vadd.f32 %v7933_v63, %v3263_v62  ;;  %v5241_v36 = vpop.f32.mrb[77].mxu1  ;;  %v5462_v18 = vpop.f32.mrb[227].mxu0  ;;  %5620 = vmatmul.mubr.msk.f32.gmra.mrb[76].mxu0 %vm2571_vm4, %v2538_v34 }
 0x370   :  { %5622 = vmatprep.mubr.msk.f32.mxu0 %vm5714_vm2, %v5713_v0 }
 0x371   :  { %v2539_v42 = vmax.f32 %v2332_v2, 0.0  ;;  %3688 = vst.msk [vmem:[%s8455_s7 + $0x190] sm:$0xff] %vm3637_vm5, %v3264_v46 }
 0x372   :  { %v2336_v40 = vpop.f32.mrb[78].mxu1  ;;  %v3268_v16 = vpop.f32.mrb[228].mxu0 }
 0x373   :  { %v2337_v47 = vadd.f32 %v7900_v12, %v2336_v40  ;;  %v3269_v3 = vadd.f32 %v7933_v63, %v3268_v16  ;;  %v5244_v29 = vpop.f32.mrb[79].mxu1  ;;  %v5465_v31 = vpop.f32.mrb[229].mxu0  ;;  %5623 = vmatmul.mubr.msk.f32.gmra.mrb[78].mxu0 %vm2571_vm4, %v2539_v42 }
 0x374   :  { %5625 = vmatprep.mubr.msk.f32.mxu0 %vm5714_vm2, %v5713_v0 }
 0x375   :  { %v2540_v28 = vmax.f32 %v2337_v47, 0.0  ;;  %3689 = vst.msk [vmem:[%s8455_s7 + $0x198] sm:$0xff] %vm3637_vm5, %v3269_v3 }
 0x376   :  { %v2341_v52 = vpop.f32.mrb[80].mxu1  ;;  %v3273_v14 = vpop.f32.mrb[230].mxu0 }
 0x377   :  { %v2342_v6 = vadd.f32 %v7900_v12, %v2341_v52  ;;  %v3274_v53 = vadd.f32 %v7933_v63, %v3273_v14  ;;  %v5247_v54 = vpop.f32.mrb[81].mxu1  ;;  %v5468_v27 = vpop.f32.mrb[231].mxu0  ;;  %5626 = vmatmul.mubr.msk.f32.gmra.mrb[80].mxu0 %vm2571_vm4, %v2540_v28 }
 0x378   :  { %5628 = vmatprep.mubr.msk.f32.mxu0 %vm5714_vm2, %v5713_v0 }
 0x379   :  { %v2541_v10 = vmax.f32 %v2342_v6, 0.0  ;;  %3690 = vst.msk [vmem:[%s8455_s7 + $0x1a0] sm:$0xff] %vm3637_vm5, %v3274_v53 }
 0x37a   :  { %v2346_v45 = vpop.f32.mrb[82].mxu1  ;;  %v3278_v33 = vpop.f32.mrb[232].mxu0 }
 0x37b   :  { %v2347_v37 = vadd.f32 %v7900_v12, %v2346_v45  ;;  %v3279_v23 = vadd.f32 %v7933_v63, %v3278_v33  ;;  %v5250_v61 = vpop.f32.mrb[83].mxu1  ;;  %v5471_v57 = vpop.f32.mrb[233].mxu0  ;;  %5629 = vmatmul.mubr.msk.f32.gmra.mrb[82].mxu0 %vm2571_vm4, %v2541_v10 }
 0x37c   :  { %5631 = vmatprep.mubr.msk.f32.mxu0 %vm5714_vm2, %v5713_v0 }
 0x37d   :  { %v2542_v1 = vmax.f32 %v2347_v37, 0.0  ;;  %3691 = vst.msk [vmem:[%s8455_s7 + $0x1a8] sm:$0xff] %vm3637_vm5, %v3279_v23 }
 0x37e   :  { %v2351_v9 = vpop.f32.mrb[84].mxu1  ;;  %v3283_v13 = vpop.f32.mrb[234].mxu0 }
 0x37f   :  { %v2352_v17 = vadd.f32 %v7900_v12, %v2351_v9  ;;  %v3284_v4 = vadd.f32 %v7933_v63, %v3283_v13  ;;  %v5253_v11 = vpop.f32.mrb[85].mxu1  ;;  %v5474_v22 = vpop.f32.mrb[235].mxu0  ;;  %5632 = vmatmul.mubr.msk.f32.gmra.mrb[84].mxu0 %vm2571_vm4, %v2542_v1 }
 0x380   :  { %5634 = vmatprep.mubr.msk.f32.mxu0 %vm5714_vm2, %v5713_v0 }
 0x381   :  { %v2543_v7 = vmax.f32 %v2352_v17, 0.0  ;;  %3692 = vst.msk [vmem:[%s8455_s7 + $0x1b0] sm:$0xff] %vm3637_vm5, %v3284_v4 }
 0x382   :  { %v2356_v20 = vpop.f32.mrb[86].mxu1  ;;  %v3288_v44 = vpop.f32.mrb[236].mxu0 }
 0x383   :  { %v2357_v56 = vadd.f32 %v7900_v12, %v2356_v20  ;;  %v3289_v59 = vadd.f32 %v7933_v63, %v3288_v44  ;;  %v5256_v49 = vpop.f32.mrb[87].mxu1  ;;  %v5477_v24 = vpop.f32.mrb[237].mxu0  ;;  %5635 = vmatmul.mubr.msk.f32.gmra.mrb[86].mxu0 %vm2571_vm4, %v2543_v7 }
 0x384   :  { %5637 = vmatprep.mubr.msk.f32.mxu0 %vm5714_vm2, %v5713_v0 }
 0x385   :  { %v2544_v5 = vmax.f32 %v2357_v56, 0.0  ;;  %3693 = vst.msk [vmem:[%s8455_s7 + $0x1b8] sm:$0xff] %vm3637_vm5, %v3289_v59 }
 0x386   :  { %v2361_v43 = vpop.f32.mrb[88].mxu1  ;;  %v3293_v15 = vpop.f32.mrb[238].mxu0 }
 0x387   :  { %v2362_v48 = vadd.f32 %v7900_v12, %v2361_v43  ;;  %v3294_v19 = vadd.f32 %v7933_v63, %v3293_v15  ;;  %v5259_v30 = vpop.f32.mrb[89].mxu1  ;;  %v5480_v51 = vpop.f32.mrb[239].mxu0  ;;  %5638 = vmatmul.mubr.msk.f32.gmra.mrb[88].mxu0 %vm2571_vm4, %v2544_v5 }
 0x388   :  { %5640 = vmatprep.mubr.msk.f32.mxu0 %vm5714_vm2, %v5713_v0 }
 0x389   :  { %v2545_v60 = vmax.f32 %v2362_v48, 0.0  ;;  %3694 = vst.msk [vmem:[%s8455_s7 + $0x1c0] sm:$0xff] %vm3637_vm5, %v3294_v19 }
 0x38a   :  { %v2366_v38 = vpop.f32.mrb[90].mxu1  ;;  %v3298_v41 = vpop.f32.mrb[240].mxu0 }
 0x38b   :  { %v2367_v32 = vadd.f32 %v7900_v12, %v2366_v38  ;;  %v3299_v26 = vadd.f32 %v7933_v63, %v3298_v41  ;;  %v5262_v8 = vpop.f32.mrb[91].mxu1  ;;  %v5483_v50 = vpop.f32.mrb[241].mxu0  ;;  %5641 = vmatmul.mubr.msk.f32.gmra.mrb[90].mxu0 %vm2571_vm4, %v2545_v60 }
 0x38c   :  { %5643 = vmatprep.mubr.msk.f32.mxu0 %vm5714_vm2, %v5713_v0 }
 0x38d   :  { %v2546_v35 = vmax.f32 %v2367_v32, 0.0  ;;  %3695 = vst.msk [vmem:[%s8455_s7 + $0x1c8] sm:$0xff] %vm3637_vm5, %v3299_v26 }
 0x38e   :  { %v2371_v55 = vpop.f32.mrb[92].mxu1  ;;  %v3303_v21 = vpop.f32.mrb[242].mxu0 }
 0x38f   :  { %v2372_v25 = vadd.f32 %v7900_v12, %v2371_v55  ;;  %v3304_v58 = vadd.f32 %v7933_v63, %v3303_v21  ;;  %v5265_v34 = vpop.f32.mrb[93].mxu1  ;;  %v5486_v39 = vpop.f32.mrb[243].mxu0  ;;  %5644 = vmatmul.mubr.msk.f32.gmra.mrb[92].mxu0 %vm2571_vm4, %v2546_v35 }
 0x390   :  { %5646 = vmatprep.mubr.msk.f32.mxu0 %vm5714_vm2, %v5713_v0 }
 0x391   :  { %v2547_v62 = vmax.f32 %v2372_v25, 0.0  ;;  %3696 = vst.msk [vmem:[%s8455_s7 + $0x1d0] sm:$0xff] %vm3637_vm5, %v3304_v58 }
 0x392   :  { %v2376_v2 = vpop.f32.mrb[94].mxu1  ;;  %v3308_v46 = vpop.f32.mrb[244].mxu0 }
 0x393   :  { %v2377_v36 = vadd.f32 %v7900_v12, %v2376_v2  ;;  %v3309_v18 = vadd.f32 %v7933_v63, %v3308_v46  ;;  %v5268_v42 = vpop.f32.mrb[95].mxu1  ;;  %v5489_v40 = vpop.f32.mrb[245].mxu0  ;;  %5647 = vmatmul.mubr.msk.f32.gmra.mrb[94].mxu0 %vm2571_vm4, %v2547_v62 }
 0x394   :  { %5649 = vmatprep.mubr.msk.f32.mxu0 %vm5714_vm2, %v5713_v0 }
 0x395   :  { %v2548_v16 = vmax.f32 %v2377_v36, 0.0  ;;  %3697 = vst.msk [vmem:[%s8455_s7 + $0x1d8] sm:$0xff] %vm3637_vm5, %v3309_v18 }
 0x396   :  { %v2381_v47 = vpop.f32.mrb[96].mxu1  ;;  %v3313_v3 = vpop.f32.mrb[246].mxu0 }
 0x397   :  { %v2382_v29 = vadd.f32 %v7900_v12, %v2381_v47  ;;  %v3314_v31 = vadd.f32 %v7933_v63, %v3313_v3  ;;  %v5271_v28 = vpop.f32.mrb[97].mxu1  ;;  %v5492_v52 = vpop.f32.mrb[247].mxu0  ;;  %5650 = vmatmul.mubr.msk.f32.gmra.mrb[96].mxu0 %vm2571_vm4, %v2548_v16 }
 0x398   :  { %5652 = vmatprep.mubr.msk.f32.mxu0 %vm5714_vm2, %v5713_v0 }
 0x399   :  { %v2549_v14 = vmax.f32 %v2382_v29, 0.0  ;;  %3698 = vst.msk [vmem:[%s8455_s7 + $0x1e0] sm:$0xff] %vm3637_vm5, %v3314_v31 }
 0x39a   :  { %v2386_v6 = vpop.f32.mrb[98].mxu1  ;;  %v3318_v53 = vpop.f32.mrb[248].mxu0 }
 0x39b   :  { %v2387_v54 = vadd.f32 %v7900_v12, %v2386_v6  ;;  %v3319_v27 = vadd.f32 %v7933_v63, %v3318_v53  ;;  %v5274_v10 = vpop.f32.mrb[99].mxu1  ;;  %v5495_v45 = vpop.f32.mrb[249].mxu0  ;;  %5653 = vmatmul.mubr.msk.f32.gmra.mrb[98].mxu0 %vm2571_vm4, %v2549_v14 }
 0x39c   :  { %5655 = vmatprep.mubr.msk.f32.mxu0 %vm5714_vm2, %v5713_v0 }
 0x39d   :  { %v2550_v33 = vmax.f32 %v2387_v54, 0.0  ;;  %3699 = vst.msk [vmem:[%s8455_s7 + $0x1e8] sm:$0xff] %vm3637_vm5, %v3319_v27 }
 0x39e   :  { %v2391_v37 = vpop.f32.mrb[100].mxu1  ;;  %v3323_v23 = vpop.f32.mrb[250].mxu0 }
 0x39f   :  { %v2392_v61 = vadd.f32 %v7900_v12, %v2391_v37  ;;  %v3324_v57 = vadd.f32 %v7933_v63, %v3323_v23  ;;  %v5277_v1 = vpop.f32.mrb[101].mxu1  ;;  %v5498_v9 = vpop.f32.mrb[251].mxu0  ;;  %5656 = vmatmul.mubr.msk.f32.gmra.mrb[100].mxu0 %vm2571_vm4, %v2550_v33 }
 0x3a0   :  { %5658 = vmatprep.mubr.msk.f32.mxu0 %vm5714_vm2, %v5713_v0 }
 0x3a1   :  { %v2551_v13 = vmax.f32 %v2392_v61, 0.0  ;;  %3700 = vst.msk [vmem:[%s8455_s7 + $0x1f0] sm:$0xff] %vm3637_vm5, %v3324_v57 }
 0x3a2   :  { %v2396_v17 = vpop.f32.mrb[102].mxu1  ;;  %v3328_v4 = vpop.f32.mrb[252].mxu0 }
 0x3a3   :  { %v2397_v11 = vadd.f32 %v7900_v12, %v2396_v17  ;;  %v3329_v22 = vadd.f32 %v7933_v63, %v3328_v4  ;;  %v5280_v7 = vpop.f32.mrb[103].mxu1  ;;  %v5501_v20 = vpop.f32.mrb[253].mxu0  ;;  %5659 = vmatmul.mubr.msk.f32.gmra.mrb[102].mxu0 %vm2571_vm4, %v2551_v13 }
 0x3a4   :  { %5661 = vmatprep.mubr.msk.f32.mxu0 %vm5714_vm2, %v5713_v0 }
 0x3a5   :  { %v2552_v44 = vmax.f32 %v2397_v11, 0.0  ;;  %3701 = vst.msk [vmem:[%s8455_s7 + $0x1f8] sm:$0xff] %vm3637_vm5, %v3329_v22 }
 0x3a6   :  { %v2401_v56 = vpop.f32.mrb[104].mxu1  ;;  %v3333_v59 = vpop.f32.mrb[254].mxu0 }
 0x3a7   :  { %v2402_v49 = vadd.f32 %v7900_v12, %v2401_v56  ;;  %v3334_v24 = vadd.f32 %v7933_v63, %v3333_v59  ;;  %v5283_v5 = vpop.f32.mrb[105].mxu1  ;;  %v5504_v43 = vpop.f32.mrb[255].mxu0  ;;  %5662 = vmatmul.mubr.msk.f32.gmra.mrb[104].mxu0 %vm2571_vm4, %v2552_v44 }
 0x3a8   :  { %5664 = vmatprep.mubr.msk.f32.mxu0 %vm5714_vm2, %v5713_v0 }
 0x3a9   :  { %v2553_v15 = vmax.f32 %v2402_v49, 0.0  ;;  %3702 = vst.msk [vmem:[%s8455_s7 + $0x200] sm:$0xff] %vm3637_vm5, %v3334_v24 }
 0x3aa   :  { %v2406_v48 = vpop.f32.mrb[106].mxu1  ;;  %v3338_v19 = vpop.f32.mrb[0].mxu0 }
 0x3ab   :  { %v2407_v30 = vadd.f32 %v7900_v12, %v2406_v48  ;;  %v3339_v51 = vadd.f32 %v7933_v63, %v3338_v19  ;;  %v5286_v60 = vpop.f32.mrb[107].mxu1  ;;  %v5507_v38 = vpop.f32.mrb[1].mxu0  ;;  %5665 = vmatmul.mubr.msk.f32.gmra.mrb[106].mxu0 %vm2571_vm4, %v2553_v15 }
 0x3ac   :  { %5667 = vmatprep.mubr.msk.f32.mxu0 %vm5714_vm2, %v5713_v0 }
 0x3ad   :  { %v2554_v41 = vmax.f32 %v2407_v30, 0.0  ;;  %3703 = vst.msk [vmem:[%s8455_s7 + $0x208] sm:$0xff] %vm3637_vm5, %v3339_v51 }
 0x3ae   :  { %v2411_v32 = vpop.f32.mrb[108].mxu1  ;;  %v3343_v26 = vpop.f32.mrb[2].mxu0 }
 0x3af   :  { %v2412_v8 = vadd.f32 %v7900_v12, %v2411_v32  ;;  %v3344_v50 = vadd.f32 %v7933_v63, %v3343_v26  ;;  %v5289_v35 = vpop.f32.mrb[109].mxu1  ;;  %v5510_v55 = vpop.f32.mrb[3].mxu0  ;;  %5668 = vmatmul.mubr.msk.f32.gmra.mrb[108].mxu0 %vm2571_vm4, %v2554_v41 }
 0x3b0   :  { %5670 = vmatprep.mubr.msk.f32.mxu0 %vm5714_vm2, %v5713_v0 }
 0x3b1   :  { %v2555_v21 = vmax.f32 %v2412_v8, 0.0  ;;  %3704 = vst.msk [vmem:[%s8455_s7 + $0x210] sm:$0xff] %vm3637_vm5, %v3344_v50 }
 0x3b2   :  { %v2416_v25 = vpop.f32.mrb[110].mxu1  ;;  %v3348_v58 = vpop.f32.mrb[4].mxu0 }
 0x3b3   :  { %v2417_v34 = vadd.f32 %v7900_v12, %v2416_v25  ;;  %v3349_v39 = vadd.f32 %v7933_v63, %v3348_v58  ;;  %v5292_v62 = vpop.f32.mrb[111].mxu1  ;;  %v5513_v2 = vpop.f32.mrb[5].mxu0  ;;  %5671 = vmatmul.mubr.msk.f32.gmra.mrb[110].mxu0 %vm2571_vm4, %v2555_v21 }
 0x3b4   :  { %5673 = vmatprep.mubr.msk.f32.mxu0 %vm5714_vm2, %v5713_v0 }
 0x3b5   :  { %v2556_v46 = vmax.f32 %v2417_v34, 0.0  ;;  %3705 = vst.msk [vmem:[%s8455_s7 + $0x218] sm:$0xff] %vm3637_vm5, %v3349_v39 }
 0x3b6   :  { %v2421_v36 = vpop.f32.mrb[112].mxu1  ;;  %v3353_v18 = vpop.f32.mrb[6].mxu0 }
 0x3b7   :  { %v2422_v42 = vadd.f32 %v7900_v12, %v2421_v36  ;;  %v3354_v40 = vadd.f32 %v7933_v63, %v3353_v18  ;;  %v5295_v16 = vpop.f32.mrb[113].mxu1  ;;  %v5516_v47 = vpop.f32.mrb[7].mxu0  ;;  %5674 = vmatmul.mubr.msk.f32.gmra.mrb[112].mxu0 %vm2571_vm4, %v2556_v46 }
 0x3b8   :  { %5676 = vmatprep.mubr.msk.f32.mxu0 %vm5714_vm2, %v5713_v0 }
 0x3b9   :  { %v2557_v3 = vmax.f32 %v2422_v42, 0.0  ;;  %3706 = vst.msk [vmem:[%s8455_s7 + $0x220] sm:$0xff] %vm3637_vm5, %v3354_v40 }
 0x3ba   :  { %v2426_v29 = vpop.f32.mrb[114].mxu1  ;;  %v3358_v31 = vpop.f32.mrb[8].mxu0 }
 0x3bb   :  { %v2427_v28 = vadd.f32 %v7900_v12, %v2426_v29  ;;  %v3359_v52 = vadd.f32 %v7933_v63, %v3358_v31  ;;  %v5298_v14 = vpop.f32.mrb[115].mxu1  ;;  %v5519_v6 = vpop.f32.mrb[9].mxu0  ;;  %5677 = vmatmul.mubr.msk.f32.gmra.mrb[114].mxu0 %vm2571_vm4, %v2557_v3 }
 0x3bc   :  { %5679 = vmatprep.mubr.msk.f32.mxu0 %vm5714_vm2, %v5713_v0 }
 0x3bd   :  { %v2558_v53 = vmax.f32 %v2427_v28, 0.0  ;;  %3707 = vst.msk [vmem:[%s8455_s7 + $0x228] sm:$0xff] %vm3637_vm5, %v3359_v52 }
 0x3be   :  { %v2431_v54 = vpop.f32.mrb[116].mxu1  ;;  %v3363_v27 = vpop.f32.mrb[10].mxu0 }
 0x3bf   :  { %v2432_v10 = vadd.f32 %v7900_v12, %v2431_v54  ;;  %v3364_v45 = vadd.f32 %v7933_v63, %v3363_v27  ;;  %v5301_v33 = vpop.f32.mrb[117].mxu1  ;;  %v5522_v37 = vpop.f32.mrb[11].mxu0  ;;  %5680 = vmatmul.mubr.msk.f32.gmra.mrb[116].mxu0 %vm2571_vm4, %v2558_v53 }
 0x3c0   :  { %5682 = vmatprep.mubr.msk.f32.mxu0 %vm5714_vm2, %v5713_v0 }
 0x3c1   :  { %v2559_v23 = vmax.f32 %v2432_v10, 0.0  ;;  %3708 = vst.msk [vmem:[%s8455_s7 + $0x230] sm:$0xff] %vm3637_vm5, %v3364_v45 }
 0x3c2   :  { %v3368_v61 = vpop.f32.mrb[12].mxu0 }
 0x3c3   :  { %v3369_v57 = vadd.f32 %v7933_v63, %v3368_v61  ;;  %v5525_v1 = vpop.f32.mrb[13].mxu0  ;;  %5683 = vmatmul.mubr.msk.f32.gmra.mrb[118].mxu0 %vm2571_vm4, %v2559_v23 }
 0x3c5   :  { %3709 = vst.msk [vmem:[%s8455_s7 + $0x238] sm:$0xff] %vm3637_vm5, %v3369_v57 }
 0x3c6   :  { %v3373_v12 = vpop.f32.mrb[14].mxu0 }
 0x3c7   :  { %v3374_v0 = vadd.f32 %v7933_v63, %v3373_v12  ;;  %v5528_v9 = vpop.f32.mrb[15].mxu0 }
 0x3c9   :  { %3710 = vst.msk [vmem:[%s8455_s7 + $0x240] sm:$0xff] %vm3637_vm5, %v3374_v0 }
 0x3ca   :  { %v3378_v13 = vpop.f32.mrb[16].mxu0 }
 0x3cb   :  { %v3379_v17 = vadd.f32 %v7933_v63, %v3378_v13  ;;  %v5531_v4 = vpop.f32.mrb[17].mxu0 }
 0x3cd   :  { %3711 = vst.msk [vmem:[%s8455_s7 + $0x248] sm:$0xff] %vm3637_vm5, %v3379_v17 }
 0x3ce   :  { %v3383_v11 = vpop.f32.mrb[18].mxu0 }
 0x3cf   :  { %v3384_v22 = vadd.f32 %v7933_v63, %v3383_v11  ;;  %v5534_v7 = vpop.f32.mrb[19].mxu0 }
 0x3d1   :  { %3712 = vst.msk [vmem:[%s8455_s7 + $0x250] sm:$0xff] %vm3637_vm5, %v3384_v22 }
 0x3d2   :  { %v3388_v20 = vpop.f32.mrb[20].mxu0 }
 0x3d3   :  { %v3389_v44 = vadd.f32 %v7933_v63, %v3388_v20  ;;  %v5537_v56 = vpop.f32.mrb[21].mxu0 }
 0x3d5   :  { %3713 = vst.msk [vmem:[%s8455_s7 + $0x258] sm:$0xff] %vm3637_vm5, %v3389_v44 }
 0x3d6   :  { %v3393_v59 = vpop.f32.mrb[22].mxu0 }
 0x3d7   :  { %v3394_v49 = vadd.f32 %v7933_v63, %v3393_v59  ;;  %v5540_v24 = vpop.f32.mrb[23].mxu0 }
 0x3d9   :  { %3714 = vst.msk [vmem:[%s8455_s7 + $0x260] sm:$0xff] %vm3637_vm5, %v3394_v49 }
 0x3da   :  { %v3398_v5 = vpop.f32.mrb[24].mxu0 }
 0x3db   :  { %v3399_v43 = vadd.f32 %v7933_v63, %v3398_v5  ;;  %v5543_v15 = vpop.f32.mrb[25].mxu0 }
 0x3dd   :  { %3715 = vst.msk [vmem:[%s8455_s7 + $0x268] sm:$0xff] %vm3637_vm5, %v3399_v43 }
 0x3de   :  { %v3403_v48 = vpop.f32.mrb[26].mxu0 }
 0x3df   :  { %v3404_v19 = vadd.f32 %v7933_v63, %v3403_v48  ;;  %v5546_v30 = vpop.f32.mrb[27].mxu0 }
 0x3e1   :  { %3716 = vst.msk [vmem:[%s8455_s7 + $0x270] sm:$0xff] %vm3637_vm5, %v3404_v19 }
 0x3e2   :  { %v3408_v51 = vpop.f32.mrb[28].mxu0 }
 0x3e3   :  { %v3409_v60 = vadd.f32 %v7933_v63, %v3408_v51  ;;  %v5549_v38 = vpop.f32.mrb[29].mxu0 }
 0x3e5   :  { %3717 = vst.msk [vmem:[%s8455_s7 + $0x278] sm:$0xff] %vm3637_vm5, %v3409_v60 }
 0x3e6   :  { %v3413_v41 = vpop.f32.mrb[30].mxu0 }
 0x3e7   :  { %v3414_v32 = vadd.f32 %v7933_v63, %v3413_v41  ;;  %v5552_v26 = vpop.f32.mrb[31].mxu0 }
 0x3e9   :  { %3718 = vst.msk [vmem:[%s8455_s7 + $0x280] sm:$0xff] %vm3637_vm5, %v3414_v32 }
 0x3ea   :  { %v3418_v8 = vpop.f32.mrb[32].mxu0 }
 0x3eb   :  { %v3419_v50 = vadd.f32 %v7933_v63, %v3418_v8  ;;  %v5555_v35 = vpop.f32.mrb[33].mxu0 }
 0x3ed   :  { %3719 = vst.msk [vmem:[%s8455_s7 + $0x288] sm:$0xff] %vm3637_vm5, %v3419_v50 }
 0x3ee   :  { %v3423_v55 = vpop.f32.mrb[34].mxu0 }
 0x3ef   :  { %v3424_v21 = vadd.f32 %v7933_v63, %v3423_v55  ;;  %v5558_v25 = vpop.f32.mrb[35].mxu0 }
 0x3f1   :  { %3720 = vst.msk [vmem:[%s8455_s7 + $0x290] sm:$0xff] %vm3637_vm5, %v3424_v21 }
 0x3f2   :  { %v3428_v58 = vpop.f32.mrb[36].mxu0 }
 0x3f3   :  { %v3429_v34 = vadd.f32 %v7933_v63, %v3428_v58  ;;  %v5561_v39 = vpop.f32.mrb[37].mxu0 }
 0x3f5   :  { %3721 = vst.msk [vmem:[%s8455_s7 + $0x298] sm:$0xff] %vm3637_vm5, %v3429_v34 }
 0x3f6   :  { %v3433_v62 = vpop.f32.mrb[38].mxu0 }
 0x3f7   :  { %v3434_v2 = vadd.f32 %v7933_v63, %v3433_v62  ;;  %v5564_v46 = vpop.f32.mrb[39].mxu0 }
 0x3f9   :  { %3722 = vst.msk [vmem:[%s8455_s7 + $0x2a0] sm:$0xff] %vm3637_vm5, %v3434_v2 }
 0x3fa   :  { %v3438_v36 = vpop.f32.mrb[40].mxu0 }
 0x3fb   :  { %v3439_v18 = vadd.f32 %v7933_v63, %v3438_v36  ;;  %v5567_v42 = vpop.f32.mrb[41].mxu0 }
 0x3fd   :  { %3723 = vst.msk [vmem:[%s8455_s7 + $0x2a8] sm:$0xff] %vm3637_vm5, %v3439_v18 }
 0x3fe   :  { %v3443_v40 = vpop.f32.mrb[42].mxu0 }
 0x3ff   :  { %v3444_v16 = vadd.f32 %v7933_v63, %v3443_v40  ;;  %v5570_v47 = vpop.f32.mrb[43].mxu0 }
 0x401   :  { %3724 = vst.msk [vmem:[%s8455_s7 + $0x2b0] sm:$0xff] %vm3637_vm5, %v3444_v16 }
 0x402   :  { %v3448_v3 = vpop.f32.mrb[44].mxu0 }
 0x403   :  { %v3449_v29 = vadd.f32 %v7933_v63, %v3448_v3  ;;  %v5573_v31 = vpop.f32.mrb[45].mxu0 }
 0x405   :  { %3725 = vst.msk [vmem:[%s8455_s7 + $0x2b8] sm:$0xff] %vm3637_vm5, %v3449_v29 }
 0x406   :  { %v3453_v28 = vpop.f32.mrb[46].mxu0 }
 0x407   :  { %v3454_v52 = vadd.f32 %v7933_v63, %v3453_v28  ;;  %v5576_v14 = vpop.f32.mrb[47].mxu0 }
 0x409   :  { %3726 = vst.msk [vmem:[%s8455_s7 + $0x2c0] sm:$0xff] %vm3637_vm5, %v3454_v52 }
 0x40a   :  { %v3458_v6 = vpop.f32.mrb[48].mxu0 }
 0x40b   :  { %v3459_v53 = vadd.f32 %v7933_v63, %v3458_v6  ;;  %v5579_v54 = vpop.f32.mrb[49].mxu0 }
 0x40d   :  { %3727 = vst.msk [vmem:[%s8455_s7 + $0x2c8] sm:$0xff] %vm3637_vm5, %v3459_v53 }
 0x40e   :  { %v3463_v27 = vpop.f32.mrb[50].mxu0 }
 0x40f   :  { %v3464_v10 = vadd.f32 %v7933_v63, %v3463_v27  ;;  %v5582_v45 = vpop.f32.mrb[51].mxu0 }
 0x411   :  { %3728 = vst.msk [vmem:[%s8455_s7 + $0x2d0] sm:$0xff] %vm3637_vm5, %v3464_v10 }
 0x412   :  { %v3468_v33 = vpop.f32.mrb[52].mxu0 }
 0x413   :  { %v3469_v37 = vadd.f32 %v7933_v63, %v3468_v33  ;;  %v5585_v23 = vpop.f32.mrb[53].mxu0 }
 0x415   :  { %3729 = vst.msk [vmem:[%s8455_s7 + $0x2d8] sm:$0xff] %vm3637_vm5, %v3469_v37 }
 0x416   :  { %v3473_v61 = vpop.f32.mrb[54].mxu0 }
 0x417   :  { %v3474_v57 = vadd.f32 %v7933_v63, %v3473_v61  ;;  %v5588_v1 = vpop.f32.mrb[55].mxu0 }
 0x419   :  { %3730 = vst.msk [vmem:[%s8455_s7 + $0x2e0] sm:$0xff] %vm3637_vm5, %v3474_v57 }
 0x41a   :  { %v3478_v12 = vpop.f32.mrb[56].mxu0 }
 0x41b   :  { %v3479_v0 = vadd.f32 %v7933_v63, %v3478_v12  ;;  %v5591_v9 = vpop.f32.mrb[57].mxu0 }
 0x41d   :  { %3731 = vst.msk [vmem:[%s8455_s7 + $0x2e8] sm:$0xff] %vm3637_vm5, %v3479_v0 }
 0x41e   :  { %v3483_v13 = vpop.f32.mrb[58].mxu0 }
 0x41f   :  { %v3484_v17 = vadd.f32 %v7933_v63, %v3483_v13  ;;  %v5594_v4 = vpop.f32.mrb[59].mxu0 }
 0x421   :  { %3732 = vst.msk [vmem:[%s8455_s7 + $0x2f0] sm:$0xff] %vm3637_vm5, %v3484_v17 }
 0x422   :  { %v3488_v11 = vpop.f32.mrb[60].mxu0 }
 0x423   :  { %v3489_v22 = vadd.f32 %v7933_v63, %v3488_v11  ;;  %v5597_v7 = vpop.f32.mrb[61].mxu0 }
 0x425   :  { %3733 = vst.msk [vmem:[%s8455_s7 + $0x2f8] sm:$0xff] %vm3637_vm5, %v3489_v22 }
 0x426   :  { %v3493_v20 = vpop.f32.mrb[62].mxu0 }
 0x427   :  { %v3494_v44 = vadd.f32 %v7933_v63, %v3493_v20  ;;  %v5600_v56 = vpop.f32.mrb[63].mxu0 }
 0x429   :  { %3734 = vst.msk [vmem:[%s8455_s7 + $0x300] sm:$0xff] %vm3637_vm5, %v3494_v44 }
 0x42a   :  { %v3498_v59 = vpop.f32.mrb[64].mxu0 }
 0x42b   :  { %v3499_v49 = vadd.f32 %v7933_v63, %v3498_v59  ;;  %v5603_v24 = vpop.f32.mrb[65].mxu0 }
 0x42d   :  { %3735 = vst.msk [vmem:[%s8455_s7 + $0x308] sm:$0xff] %vm3637_vm5, %v3499_v49 }
 0x42e   :  { %v3503_v5 = vpop.f32.mrb[66].mxu0 }
 0x42f   :  { %v3504_v43 = vadd.f32 %v7933_v63, %v3503_v5  ;;  %v5606_v15 = vpop.f32.mrb[67].mxu0 }
 0x431   :  { %3736 = vst.msk [vmem:[%s8455_s7 + $0x310] sm:$0xff] %vm3637_vm5, %v3504_v43 }
 0x432   :  { %v3508_v48 = vpop.f32.mrb[68].mxu0 }
 0x433   :  { %v3509_v19 = vadd.f32 %v7933_v63, %v3508_v48  ;;  %v5609_v30 = vpop.f32.mrb[69].mxu0 }
 0x435   :  { %3737 = vst.msk [vmem:[%s8455_s7 + $0x318] sm:$0xff] %vm3637_vm5, %v3509_v19 }
 0x436   :  { %v3513_v51 = vpop.f32.mrb[70].mxu0 }
 0x437   :  { %v3514_v60 = vadd.f32 %v7933_v63, %v3513_v51  ;;  %v5612_v38 = vpop.f32.mrb[71].mxu0 }
 0x439   :  { %3738 = vst.msk [vmem:[%s8455_s7 + $0x320] sm:$0xff] %vm3637_vm5, %v3514_v60 }
 0x43a   :  { %v3518_v41 = vpop.f32.mrb[72].mxu0 }
 0x43b   :  { %v3519_v32 = vadd.f32 %v7933_v63, %v3518_v41  ;;  %v5615_v26 = vpop.f32.mrb[73].mxu0 }
 0x43d   :  { %3739 = vst.msk [vmem:[%s8455_s7 + $0x328] sm:$0xff] %vm3637_vm5, %v3519_v32 }
 0x43e   :  { %v3523_v8 = vpop.f32.mrb[74].mxu0 }
 0x43f   :  { %v3524_v50 = vadd.f32 %v7933_v63, %v3523_v8  ;;  %v5618_v35 = vpop.f32.mrb[75].mxu0 }
 0x441   :  { %3740 = vst.msk [vmem:[%s8455_s7 + $0x330] sm:$0xff] %vm3637_vm5, %v3524_v50 }
 0x442   :  { %v3528_v55 = vpop.f32.mrb[76].mxu0 }
 0x443   :  { %v3529_v21 = vadd.f32 %v7933_v63, %v3528_v55  ;;  %v5621_v25 = vpop.f32.mrb[77].mxu0 }
 0x445   :  { %3741 = vst.msk [vmem:[%s8455_s7 + $0x338] sm:$0xff] %vm3637_vm5, %v3529_v21 }
 0x446   :  { %v3533_v58 = vpop.f32.mrb[78].mxu0 }
 0x447   :  { %v3534_v34 = vadd.f32 %v7933_v63, %v3533_v58  ;;  %v5624_v39 = vpop.f32.mrb[79].mxu0 }
 0x449   :  { %3742 = vst.msk [vmem:[%s8455_s7 + $0x340] sm:$0xff] %vm3637_vm5, %v3534_v34 }
 0x44a   :  { %v3538_v62 = vpop.f32.mrb[80].mxu0 }
 0x44b   :  { %v3539_v2 = vadd.f32 %v7933_v63, %v3538_v62  ;;  %v5627_v46 = vpop.f32.mrb[81].mxu0 }
 0x44d   :  { %3743 = vst.msk [vmem:[%s8455_s7 + $0x348] sm:$0xff] %vm3637_vm5, %v3539_v2 }
 0x44e   :  { %v3543_v36 = vpop.f32.mrb[82].mxu0 }
 0x44f   :  { %v3544_v18 = vadd.f32 %v7933_v63, %v3543_v36  ;;  %v5630_v42 = vpop.f32.mrb[83].mxu0 }
 0x451   :  { %3744 = vst.msk [vmem:[%s8455_s7 + $0x350] sm:$0xff] %vm3637_vm5, %v3544_v18 }
 0x452   :  { %v3548_v40 = vpop.f32.mrb[84].mxu0 }
 0x453   :  { %v3549_v16 = vadd.f32 %v7933_v63, %v3548_v40  ;;  %v5633_v47 = vpop.f32.mrb[85].mxu0 }
 0x455   :  { %3745 = vst.msk [vmem:[%s8455_s7 + $0x358] sm:$0xff] %vm3637_vm5, %v3549_v16 }
 0x456   :  { %v3553_v3 = vpop.f32.mrb[86].mxu0 }
 0x457   :  { %v3554_v29 = vadd.f32 %v7933_v63, %v3553_v3  ;;  %v5636_v31 = vpop.f32.mrb[87].mxu0 }
 0x459   :  { %3746 = vst.msk [vmem:[%s8455_s7 + $0x360] sm:$0xff] %vm3637_vm5, %v3554_v29 }
 0x45a   :  { %v3558_v28 = vpop.f32.mrb[88].mxu0 }
 0x45b   :  { %v3559_v52 = vadd.f32 %v7933_v63, %v3558_v28  ;;  %v5639_v14 = vpop.f32.mrb[89].mxu0 }
 0x45d   :  { %3747 = vst.msk [vmem:[%s8455_s7 + $0x368] sm:$0xff] %vm3637_vm5, %v3559_v52 }
 0x45e   :  { %v3563_v6 = vpop.f32.mrb[90].mxu0 }
 0x45f   :  { %v3564_v53 = vadd.f32 %v7933_v63, %v3563_v6  ;;  %v5642_v54 = vpop.f32.mrb[91].mxu0 }
 0x461   :  { %3748 = vst.msk [vmem:[%s8455_s7 + $0x370] sm:$0xff] %vm3637_vm5, %v3564_v53 }
 0x462   :  { %v3568_v27 = vpop.f32.mrb[92].mxu0 }
 0x463   :  { %v3569_v10 = vadd.f32 %v7933_v63, %v3568_v27  ;;  %v5645_v45 = vpop.f32.mrb[93].mxu0 }
 0x465   :  { %3749 = vst.msk [vmem:[%s8455_s7 + $0x378] sm:$0xff] %vm3637_vm5, %v3569_v10 }
 0x466   :  { %v3573_v33 = vpop.f32.mrb[94].mxu0 }
 0x467   :  { %v3574_v37 = vadd.f32 %v7933_v63, %v3573_v33  ;;  %v5648_v23 = vpop.f32.mrb[95].mxu0 }
 0x469   :  { %3750 = vst.msk [vmem:[%s8455_s7 + $0x380] sm:$0xff] %vm3637_vm5, %v3574_v37 }
 0x46a   :  { %v3578_v61 = vpop.f32.mrb[96].mxu0 }
 0x46b   :  { %v3579_v57 = vadd.f32 %v7933_v63, %v3578_v61  ;;  %v5651_v1 = vpop.f32.mrb[97].mxu0 }
 0x46d   :  { %3751 = vst.msk [vmem:[%s8455_s7 + $0x388] sm:$0xff] %vm3637_vm5, %v3579_v57 }
 0x46e   :  { %v3583_v12 = vpop.f32.mrb[98].mxu0 }
 0x46f   :  { %v3584_v0 = vadd.f32 %v7933_v63, %v3583_v12  ;;  %v5654_v9 = vpop.f32.mrb[99].mxu0 }
 0x471   :  { %3752 = vst.msk [vmem:[%s8455_s7 + $0x390] sm:$0xff] %vm3637_vm5, %v3584_v0 }
 0x472   :  { %v3588_v13 = vpop.f32.mrb[100].mxu0 }
 0x473   :  { %v3589_v17 = vadd.f32 %v7933_v63, %v3588_v13  ;;  %v5657_v4 = vpop.f32.mrb[101].mxu0 }
 0x475   :  { %3753 = vst.msk [vmem:[%s8455_s7 + $0x398] sm:$0xff] %vm3637_vm5, %v3589_v17 }
 0x476   :  { %v3593_v11 = vpop.f32.mrb[102].mxu0 }
 0x477   :  { %v3594_v22 = vadd.f32 %v7933_v63, %v3593_v11  ;;  %v5660_v7 = vpop.f32.mrb[103].mxu0 }
 0x479   :  { %3754 = vst.msk [vmem:[%s8455_s7 + $0x3a0] sm:$0xff] %vm3637_vm5, %v3594_v22 }
 0x47a   :  { %v3598_v20 = vpop.f32.mrb[104].mxu0 }
 0x47b   :  { %v3599_v44 = vadd.f32 %v7933_v63, %v3598_v20  ;;  %v5663_v56 = vpop.f32.mrb[105].mxu0 }
 0x47d   :  { %3755 = vst.msk [vmem:[%s8455_s7 + $0x3a8] sm:$0xff] %vm3637_vm5, %v3599_v44 }
 0x47e   :  { %v3603_v59 = vpop.f32.mrb[106].mxu0 }
 0x47f   :  { %v3604_v49 = vadd.f32 %v7933_v63, %v3603_v59  ;;  %v5666_v24 = vpop.f32.mrb[107].mxu0 }
 0x481   :  { %3756 = vst.msk [vmem:[%s8455_s7 + $0x3b0] sm:$0xff] %vm3637_vm5, %v3604_v49 }
 0x482   :  { %v3608_v5 = vpop.f32.mrb[108].mxu0 }
 0x483   :  { %v3609_v43 = vadd.f32 %v7933_v63, %v3608_v5  ;;  %v5669_v15 = vpop.f32.mrb[109].mxu0 }
 0x485   :  { %3757 = vst.msk [vmem:[%s8455_s7 + $0x3b8] sm:$0xff] %vm3637_vm5, %v3609_v43 }
 0x486   :  { %v3613_v48 = vpop.f32.mrb[110].mxu0 }
 0x487   :  { %v3614_v19 = vadd.f32 %v7933_v63, %v3613_v48  ;;  %v5672_v30 = vpop.f32.mrb[111].mxu0 }
 0x489   :  { %3758 = vst.msk [vmem:[%s8455_s7 + $0x3c0] sm:$0xff] %vm3637_vm5, %v3614_v19 }
 0x48a   :  { %v3618_v51 = vpop.f32.mrb[112].mxu0 }
 0x48b   :  { %v3619_v60 = vadd.f32 %v7933_v63, %v3618_v51  ;;  %v5675_v38 = vpop.f32.mrb[113].mxu0 }
 0x48d   :  { %3759 = vst.msk [vmem:[%s8455_s7 + $0x3c8] sm:$0xff] %vm3637_vm5, %v3619_v60 }
 0x48e   :  { %v3623_v41 = vpop.f32.mrb[114].mxu0 }
 0x48f   :  { %v3624_v32 = vadd.f32 %v7933_v63, %v3623_v41  ;;  %v5678_v26 = vpop.f32.mrb[115].mxu0 }
 0x491   :  { %3760 = vst.msk [vmem:[%s8455_s7 + $0x3d0] sm:$0xff] %vm3637_vm5, %v3624_v32 }
 0x492   :  { %v3628_v8 = vpop.f32.mrb[116].mxu0 }
 0x493   :  { %v3629_v50 = vadd.f32 %v7933_v63, %v3628_v8  ;;  %v5681_v35 = vpop.f32.mrb[117].mxu0 }
 0x495   :  { %3761 = vst.msk [vmem:[%s8455_s7 + $0x3d8] sm:$0xff] %vm3637_vm5, %v3629_v50 }
 0x496   :  { %v3633_v55 = vpop.f32.mrb[118].mxu0 }
 0x497   :  { %v3634_v21 = vadd.f32 %v7933_v63, %v3633_v55  ;;  %v5684_v25 = vpop.f32.mrb[119].mxu0 }
 0x499   :  { %3762 = vst.msk [vmem:[%s8455_s7 + $0x3e0] sm:$0xff] %vm3637_vm5, %v3634_v21 }

</bundles_post_ra>
